<compile_context>
chip_gen: v6e
topology: v6e:2x2x1
jax: 0.10.0
libtpu: 0.0.40
codegen_flags: <defaults>
</compile_context>

<pallas_src>
import jax
import jax.numpy as jnp
from jax.experimental import pallas as pl
from jax.experimental.pallas import tpu as pltpu

BITWIDTH = 2
BN_EPS = 1e-5
_LEVELS = float(2 ** BITWIDTH - 1)
C_PAD = 128  # lane-dense channel width carried through the whole network

VMEM = pltpu.MemorySpace.VMEM
SMEM = pltpu.MemorySpace.SMEM
# Safe on every generation (v5e/v6e scoped default 16/32 MiB, v7x phys 64 MiB
# per TC).  The resident-y fusion at TM=512 and trimmed K stays well under this
# at CIFAR scale; raise together with batch size if needed.
_VMEM_LIMIT = 32 * 1024 * 1024


def _round_up(x, m):
    return (x + m - 1) // m * m


def _tile_m(m):
    """M tile: big (<=512) for pipeline efficiency, 16-row aligned for bf16."""
    tm = min(512, _round_up(m, 16))
    if tm >= 128:
        tm = _round_up(tm, 128)
    return tm, _round_up(m, tm)


# ---------------------------------------------------------------------------
# Fused conv + BN + (residual) + PACT kernel
# ---------------------------------------------------------------------------
def _make_fused_conv_kernel(nt, m_true, with_residual):
    """M-tiled conv GEMM (bf16 MXU, f32 acc) with VMEM-resident output,
    global BatchNorm batch-stats accumulation, and a last-step epilogue that
    finalizes BN, adds the residual, and applies PACT quantization."""
    inv_m = 1.0 / float(m_true)

    def kernel(p_ref, w_ref, g_ref, b_ref, q_ref, *rest):
        if with_residual:
            r_ref, o_ref, y_ref, sum_ref, ssq_ref = rest
        else:
            r_ref = None
            o_ref, y_ref, sum_ref, ssq_ref = rest

        i = pl.program_id(0)

        @pl.when(i == 0)
        def _init():
            sum_ref[...] = jnp.zeros_like(sum_ref)
            ssq_ref[...] = jnp.zeros_like(ssq_ref)

        # --- every grid step: M-tile GEMM + per-channel stats accumulation --
        y = jnp.dot(p_ref[...], w_ref[...], preferred_element_type=jnp.float32)
        yb = y.astype(jnp.bfloat16)
        y_ref[i] = yb                        # conv output stays resident in VMEM
        yf = yb.astype(jnp.float32)          # stats from the SAME rounded y
        sum_ref[...] += jnp.sum(yf, axis=0, keepdims=True)
        ssq_ref[...] += jnp.sum(yf * yf, axis=0, keepdims=True)

        # --- last grid step: finalize BN, residual add, PACT epilogue --------
        @pl.when(i == nt - 1)
        def _epilogue():
            mean = sum_ref[...] * inv_m                           # (1, 128)
            var = jnp.maximum(ssq_ref[...] * inv_m - mean * mean, 0.0)
            scale = g_ref[...] * jax.lax.rsqrt(var + BN_EPS)
            bias = b_ref[...] - mean * scale
            alpha = q_ref[0]      # PACT clamp ceiling
            qs = q_ref[1]         # levels / alpha
            iqs = q_ref[2]        # alpha / levels (precomputed inverse)

            def body(j, carry):
                t = y_ref[j].astype(jnp.float32) * scale + bias
                if with_residual:
                    t = t + r_ref[j].astype(jnp.float32)
                t = jnp.minimum(jnp.maximum(t, 0.0), alpha)
                o_ref[j] = (jnp.round(t * qs) * iqs).astype(o_ref.dtype)
                return carry

            jax.lax.fori_loop(0, nt, body, 0)

    return kernel


def fused_conv_bn_act(patches, wq, gamma_pad, beta_pad, qparams, tm, m_true,
                      residual=None):
    m_pad, k_pad = patches.shape
    nt = m_pad // tm
    with_res = residual is not None

    in_specs = [
        pl.BlockSpec((tm, k_pad), lambda i: (i, 0)),       # M-tiled patches
        pl.BlockSpec((k_pad, C_PAD), lambda i: (0, 0)),    # weight (resident)
        pl.BlockSpec((1, C_PAD), lambda i: (0, 0)),        # gamma
        pl.BlockSpec((1, C_PAD), lambda i: (0, 0)),        # beta
        pl.BlockSpec(memory_space=SMEM),                   # PACT scalars
    ]
    args = [patches, wq, gamma_pad, beta_pad, qparams]
    if with_res:
        # whole residual resident in VMEM (needed only in the epilogue)
        in_specs.append(pl.BlockSpec((nt, tm, C_PAD), lambda i: (0, 0, 0)))
        args.append(residual.reshape(nt, tm, C_PAD))

    out = pl.pallas_call(
        _make_fused_conv_kernel(nt, m_true, with_res),
        grid=(nt,),
        in_specs=in_specs,
        # output is VMEM-resident across the (reduction) grid; written back to
        # HBM exactly once after the epilogue.
        out_specs=pl.BlockSpec((nt, tm, C_PAD), lambda i: (0, 0, 0)),
        out_shape=jax.ShapeDtypeStruct((nt, tm, C_PAD), jnp.bfloat16),
        scratch_shapes=[
            pltpu.VMEM((nt, tm, C_PAD), jnp.bfloat16),     # resident conv out
            pltpu.VMEM((1, C_PAD), jnp.float32),           # channel sum
            pltpu.VMEM((1, C_PAD), jnp.float32),           # channel sum of sq
        ],
        compiler_params=pltpu.CompilerParams(
            dimension_semantics=("arbitrary",),  # stats reduction over M tiles
            vmem_limit_bytes=_VMEM_LIMIT,
        ),
    )(*args)
    return out.reshape(m_pad, C_PAD)


# ---------------------------------------------------------------------------
# Global average pool + quantized linear head
# ---------------------------------------------------------------------------
def pool_linear_kernel(x_ref, w_ref, b_ref, o_ref):
    pooled = jnp.mean(x_ref[...].astype(jnp.float32), axis=1)      # (n_pad,128)
    o_ref[...] = (
        jnp.dot(pooled.astype(jnp.bfloat16), w_ref[...],
                preferred_element_type=jnp.float32)
        + b_ref[...]
    )


def pool_linear(x3, wq_t_bf16, bias_pad):
    n_pad = x3.shape[0]
    return pl.pallas_call(
        pool_linear_kernel,
        in_specs=[pl.BlockSpec(memory_space=VMEM)] * 3,
        out_specs=pl.BlockSpec(memory_space=VMEM),
        out_shape=jax.ShapeDtypeStruct((n_pad, C_PAD), jnp.float32),
    )(x3, wq_t_bf16, bias_pad)


# ---------------------------------------------------------------------------
# Weight quantization / prepacking (hoisted out of the forward path)
# ---------------------------------------------------------------------------
def dorefa_weight_quant(w, k):
    t = jnp.tanh(w)
    t = t / (2.0 * jnp.maximum(jnp.max(jnp.abs(t)), 1e-8)) + 0.5
    n = float(2 ** k - 1)
    return 2.0 * (jnp.round(t * n) / n) - 1.0


def prepack_conv_weight(w):
    """(3,3,cin,cout) f32 -> DoReFa-quantized (round_up(9*cin,128), 128) bf16."""
    cin, cout = int(w.shape[2]), int(w.shape[3])
    k_real = 9 * cin
    k_pad = _round_up(k_real, 128)
    wq = dorefa_weight_quant(w, BITWIDTH).reshape(k_real, cout)  # (kh,kw,ci) rows
    wq = jnp.pad(wq, ((0, k_pad - k_real), (0, C_PAD - cout)))
    return wq.astype(jnp.bfloat16)


def prepack_params(params):
    """Quantize + pad every weight once, off the per-forward critical path."""
    def conv_pack(w):
        return {"wq": prepack_conv_weight(w),
                "cin": int(w.shape[2]), "cout": int(w.shape[3])}

    packed = {
        "conv1": conv_pack(params["conv1_w"]),
        "bn1_g": params["bn1_g"], "bn1_b": params["bn1_b"],
        "alpha1": params["alpha1"],
    }
    for ln in ("layer1", "layer2", "layer3"):
        blocks = []
        for bp in params[ln]:
            blocks.append({
                "c1": conv_pack(bp["w1"]), "g1": bp["g1"], "b1": bp["b1"],
                "alpha1": bp["alpha1"],
                "c2": conv_pack(bp["w2"]), "g2": bp["g2"], "b2": bp["b2"],
                "alpha2": bp["alpha2"],
                "in_planes": int(bp["w1"].shape[2]),
                "planes": int(bp["w1"].shape[3]),
            })
        packed[ln] = blocks

    num_classes, feat = params["lin_w"].shape
    lwq = dorefa_weight_quant(params["lin_w"], BITWIDTH).T          # (feat, nc)
    lwq = jnp.pad(lwq, ((0, C_PAD - feat), (0, C_PAD - num_classes)))
    packed["lin_wq"] = lwq.astype(jnp.bfloat16)
    packed["lin_b"] = jnp.pad(params["lin_b"],
                              (0, C_PAD - num_classes)).reshape(1, C_PAD)
    packed["num_classes"] = int(num_classes)
    return packed


# ---------------------------------------------------------------------------
# Pure-JAX layout plumbing
# ---------------------------------------------------------------------------
def im2col3x3(x, cin, stride):
    """3x3 / padding=1 patch extraction over the first `cin` real channels.

    x: (N,H,W,C>=cin) bf16 -> (M, 9*cin) bf16 with M = N*Ho*Wo.
    """
    # TODO(synk): replace with in-kernel implicit GEMM (9 shifted-slice
    # accumulations / halo DMA) to remove this patch-matrix HBM round trip.
    n, h, w, _ = x.shape
    ho = (h + 2 - 3) // stride + 1
    wo = (w + 2 - 3) // stride + 1
    xs = x[..., :cin]
    xp = jnp.pad(xs, ((0, 0), (1, 1), (1, 1), (0, 0)))
    cols = []
    for kh in range(3):
        for kw in range(3):
            cols.append(xp[:, kh:kh + (ho - 1) * stride + 1:stride,
                            kw:kw + (wo - 1) * stride + 1:stride, :])
    patches = jnp.concatenate(cols, axis=-1)          # (N,Ho,Wo,9*cin)
    return patches.reshape(n * ho * wo, 9 * cin), (n, ho, wo)


def conv_bn_act(x, cpack, gamma, beta, alpha, stride, residual=None):
    """Conv3x3 + training-mode BN + optional residual + PACT (one Pallas call)."""
    cin, cout = cpack["cin"], cpack["cout"]
    wq = cpack["wq"]
    k_pad = wq.shape[0]

    patches, (n, ho, wo) = im2col3x3(x, cin, stride)
    m = patches.shape[0]
    tm, m_pad = _tile_m(m)
    patches = jnp.pad(patches, ((0, m_pad - m), (0, k_pad - 9 * cin)))
    patches = patches.astype(jnp.bfloat16)

    g = jnp.pad(gamma, (0, C_PAD - cout),
                constant_values=1.0).reshape(1, C_PAD).astype(jnp.float32)
    b = jnp.pad(beta, (0, C_PAD - cout)).reshape(1, C_PAD).astype(jnp.float32)
    alpha_c = jnp.maximum(jnp.asarray(alpha, jnp.float32), 1e-3)
    qparams = jnp.stack([alpha_c, _LEVELS / alpha_c,
                         alpha_c / _LEVELS]).astype(jnp.float32)

    res = None
    if residual is not None:
        res = residual.reshape(m, C_PAD)
        if m_pad != m:
            res = jnp.pad(res, ((0, m_pad - m), (0, 0)))

    out = fused_conv_bn_act(patches, wq, g, b, qparams, tm, m, res)
    return out[:m].reshape(n, ho, wo, C_PAD)


def basic_block(x, bp, stride):
    """PACT BasicBlock on channel-padded (128) NHWC bf16 input."""
    in_planes, planes = bp["in_planes"], bp["planes"]

    out = conv_bn_act(x, bp["c1"], bp["g1"], bp["b1"], bp["alpha1"], stride)

    # option-A shortcut (LambdaLayer): spatial subsample + zero-pad channels.
    shortcut = x
    if stride != 1 or in_planes != planes:
        pad = planes // 4
        sub = x[:, ::2, ::2, :in_planes]
        shortcut = jnp.pad(
            sub, ((0, 0), (0, 0), (0, 0), (pad, C_PAD - in_planes - pad)))

    return conv_bn_act(out, bp["c2"], bp["g2"], bp["b2"], bp["alpha2"], 1,
                       residual=shortcut)


def resnet_forward(packed, x_nchw):
    x = jnp.transpose(x_nchw, (0, 2, 3, 1)).astype(jnp.bfloat16)  # NCHW -> NHWC

    # stem: conv1 -> bn1 -> PACT
    out = conv_bn_act(x, packed["conv1"], packed["bn1_g"], packed["bn1_b"],
                      packed["alpha1"], 1)

    for layer_name, first_stride in (("layer1", 1), ("layer2", 2), ("layer3", 2)):
        for i, bp in enumerate(packed[layer_name]):
            out = basic_block(out, bp, first_stride if i == 0 else 1)

    # global avg-pool + quantized linear head; pad batch rows to >= 8 so the
    # MXU LHS has full sublanes and the output store is unmasked.
    n, h, w, c = out.shape
    n_pad = max(8, _round_up(n, 8))
    x3 = out.reshape(n, h * w, c)
    if n_pad != n:
        x3 = jnp.pad(x3, ((0, n_pad - n), (0, 0), (0, 0)))
    logits = pool_linear(x3, packed["lin_wq"], packed["lin_b"])
    return logits[:n, :packed["num_classes"]]


# ---------------------------------------------------------------------------
# Deterministic parameter initialization (matches PyTorch shapes / init rules)
# ---------------------------------------------------------------------------
def init_params(key, num_blocks=(1, 1, 1), num_classes=10):
    keys = iter(jax.random.split(key, 128))

    def conv_w(cin, cout):
        std = (2.0 / (cin * 9)) ** 0.5  # kaiming_normal_, fan_in mode
        return jax.random.normal(next(keys), (3, 3, cin, cout), jnp.float32) * std

    params = {
        "conv1_w": conv_w(1, 16),
        "bn1_g": jnp.ones((16,), jnp.float32),
        "bn1_b": jnp.zeros((16,), jnp.float32),
        "alpha1": jnp.float32(10.0),
    }
    in_planes = 16
    for li, (planes, nb) in enumerate(zip((16, 32, 64), num_blocks), start=1):
        layer = []
        for _ in range(nb):
            layer.append({
                "w1": conv_w(in_planes, planes),
                "g1": jnp.ones((planes,), jnp.float32),
                "b1": jnp.zeros((planes,), jnp.float32),
                "alpha1": jnp.float32(10.0),
                "w2": conv_w(planes, planes),
                "g2": jnp.ones((planes,), jnp.float32),
                "b2": jnp.zeros((planes,), jnp.float32),
                "alpha2": jnp.float32(10.0),
            })
            in_planes = planes
        params[f"layer{li}"] = layer

    std = (2.0 / 64) ** 0.5
    params["lin_w"] = jax.random.normal(next(keys), (num_classes, 64),
                                        jnp.float32) * std
    bound = 1.0 / (64 ** 0.5)
    params["lin_b"] = jax.random.uniform(next(keys), (num_classes,),
                                         jnp.float32, -bound, bound)
    return params


if __name__ == "__main__":
    key = jax.random.PRNGKey(0)
    pkey, xkey = jax.random.split(key)
    params = init_params(pkey, num_blocks=(1, 1, 1), num_classes=10)
    packed = prepack_params(params)   # weight quantization hoisted off the fwd

    # PyTorch-convention NCHW input: batch=2, 1 channel, 16x16 spatial.
    x = jax.random.normal(xkey, (2, 1, 16, 16), jnp.float32)

    logits = resnet_forward(packed, x)
    jax.block_until_ready(logits)
    assert logits.shape == (2, 10) and logits.dtype == jnp.float32
    print("KERNEL_OK")
</pallas_src>

<mosaic_0001>
module attributes {stable_mosaic.version = 11 : i64} {
  func.func @kernel(%arg0: i32, %arg1: memref<512x128xbf16, #tpu.memory_space<vmem>>, %arg2: memref<128x128xbf16, #tpu.memory_space<vmem>>, %arg3: memref<1x128xf32, #tpu.memory_space<vmem>>, %arg4: memref<1x128xf32, #tpu.memory_space<vmem>>, %arg5: memref<3xf32, #tpu.memory_space<smem>>, %arg6: memref<1x512x128xbf16, #tpu.memory_space<vmem>>, %arg7: memref<1x512x128xbf16, #tpu.memory_space<vmem>>, %arg8: memref<1x128xf32, #tpu.memory_space<vmem>>, %arg9: memref<1x128xf32, #tpu.memory_space<vmem>>) attributes {dimension_semantics = [#tpu.dimension_semantics<arbitrary>], iteration_bounds = array<i64: 1>, scalar_prefetch = 0 : i64, scratch_operands = 3 : i64, tpu.core_type = #tpu.core_type<tc>, window_params = [{transform_indices = @transform_0, window_bounds = array<i64: 512, 128>}, {pipeline_mode = #tpu.pipeline_mode<synchronous>, transform_indices = @transform_1, window_bounds = array<i64: 128, 128>}, {pipeline_mode = #tpu.pipeline_mode<synchronous>, transform_indices = @transform_2, window_bounds = array<i64: 1, 128>}, {pipeline_mode = #tpu.pipeline_mode<synchronous>, transform_indices = @transform_3, window_bounds = array<i64: 1, 128>}, {transform_indices = @transform_4, window_bounds = array<i64: 3>}, {pipeline_mode = #tpu.pipeline_mode<synchronous>, transform_indices = @transform_5, window_bounds = array<i64: 1, 512, 128>}]} {
    %c0_i32 = arith.constant 0 : i32
    %0 = arith.cmpi eq, %arg0, %c0_i32 : i32
    %1 = arith.extui %0 : i1 to i32
    %c0_i32_0 = arith.constant 0 : i32
    %2 = arith.cmpi ne, %1, %c0_i32_0 : i32
    scf.if %2 {
      %cst_18 = arith.constant 0.000000e+00 : f32
      %26 = vector.broadcast %cst_18 : f32 to vector<1x128xf32>
      %c0_19 = arith.constant 0 : index
      %c0_20 = arith.constant 0 : index
      %27 = vector.load %arg8[%c0_19, %c0_20] : memref<1x128xf32, #tpu.memory_space<vmem>>, vector<1x128xf32>
      tpu.vector_store %arg8[%c0_19, %c0_20], %26 {strides = array<i32>} : memref<1x128xf32, #tpu.memory_space<vmem>>, vector<1x128xf32>,
      %cst_21 = arith.constant 0.000000e+00 : f32
      %28 = vector.broadcast %cst_21 : f32 to vector<1x128xf32>
      %c0_22 = arith.constant 0 : index
      %c0_23 = arith.constant 0 : index
      %29 = vector.load %arg9[%c0_22, %c0_23] : memref<1x128xf32, #tpu.memory_space<vmem>>, vector<1x128xf32>
      tpu.vector_store %arg9[%c0_22, %c0_23], %28 {strides = array<i32>} : memref<1x128xf32, #tpu.memory_space<vmem>>, vector<1x128xf32>,
    } else {
    }
    %c0 = arith.constant 0 : index
    %c0_1 = arith.constant 0 : index
    %3 = vector.load %arg1[%c0, %c0_1] : memref<512x128xbf16, #tpu.memory_space<vmem>>, vector<512x128xbf16>
    %c0_2 = arith.constant 0 : index
    %c0_3 = arith.constant 0 : index
    %4 = vector.load %arg2[%c0_2, %c0_3] : memref<128x128xbf16, #tpu.memory_space<vmem>>, vector<128x128xbf16>
    %cst = arith.constant dense<0.000000e+00> : vector<512x128xf32>
    %5 = tpu.matmul %3, %4, %cst {dimension_numbers = #tpu.dot_dimension_numbers<[1], [0], [0], [1], [0, 0, 1, 1], [], []>} : vector<512x128xbf16>, vector<128x128xbf16>, vector<512x128xf32> -> vector<512x128xf32>
    %6 = arith.truncf %5 : vector<512x128xf32> to vector<512x128xbf16>
    %7 = arith.index_cast %arg0 : i32 to index
    %c0_4 = arith.constant 0 : index
    %c0_5 = arith.constant 0 : index
    %8 = vector.load %arg7[%7, %c0_4, %c0_5] : memref<1x512x128xbf16, #tpu.memory_space<vmem>>, vector<1x512x128xbf16>
    %9 = vector.shape_cast %8 : vector<1x512x128xbf16> to vector<512x128xbf16>
    %10 = vector.shape_cast %6 : vector<512x128xbf16> to vector<1x512x128xbf16>
    tpu.vector_store %arg7[%7, %c0_4, %c0_5], %10 {strides = array<i32>} : memref<1x512x128xbf16, #tpu.memory_space<vmem>>, vector<1x512x128xbf16>,
    %11 = arith.extf %6 : vector<512x128xbf16> to vector<512x128xf32>
    %c0_6 = arith.constant 0 : index
    %c0_7 = arith.constant 0 : index
    %12 = vector.load %arg8[%c0_6, %c0_7] : memref<1x128xf32, #tpu.memory_space<vmem>>, vector<1x128xf32>
    %cst_8 = arith.constant dense<0.000000e+00> : vector<128xf32>
    %13 = vector.multi_reduction <add>, %11, %cst_8 [0] : vector<512x128xf32> to vector<128xf32>
    %14 = vector.shape_cast %13 : vector<128xf32> to vector<1x128xf32>
    %15 = arith.addf %12, %14 : vector<1x128xf32>
    %c0_9 = arith.constant 0 : index
    %c0_10 = arith.constant 0 : index
    %16 = vector.load %arg8[%c0_9, %c0_10] : memref<1x128xf32, #tpu.memory_space<vmem>>, vector<1x128xf32>
    tpu.vector_store %arg8[%c0_9, %c0_10], %15 {strides = array<i32>} : memref<1x128xf32, #tpu.memory_space<vmem>>, vector<1x128xf32>,
    %c0_11 = arith.constant 0 : index
    %c0_12 = arith.constant 0 : index
    %17 = vector.load %arg9[%c0_11, %c0_12] : memref<1x128xf32, #tpu.memory_space<vmem>>, vector<1x128xf32>
    %18 = arith.mulf %11, %11 : vector<512x128xf32>
    %cst_13 = arith.constant dense<0.000000e+00> : vector<128xf32>
    %19 = vector.multi_reduction <add>, %18, %cst_13 [0] : vector<512x128xf32> to vector<128xf32>
    %20 = vector.shape_cast %19 : vector<128xf32> to vector<1x128xf32>
    %21 = arith.addf %17, %20 : vector<1x128xf32>
    %c0_14 = arith.constant 0 : index
    %c0_15 = arith.constant 0 : index
    %22 = vector.load %arg9[%c0_14, %c0_15] : memref<1x128xf32, #tpu.memory_space<vmem>>, vector<1x128xf32>
    tpu.vector_store %arg9[%c0_14, %c0_15], %21 {strides = array<i32>} : memref<1x128xf32, #tpu.memory_space<vmem>>, vector<1x128xf32>,
    %c0_i32_16 = arith.constant 0 : i32
    %23 = arith.cmpi eq, %arg0, %c0_i32_16 : i32
    %24 = arith.extui %23 : i1 to i32
    %c0_i32_17 = arith.constant 0 : i32
    %25 = arith.cmpi ne, %24, %c0_i32_17 : i32
    scf.if %25 {
      %c0_18 = arith.constant 0 : index
      %c0_19 = arith.constant 0 : index
      %26 = vector.load %arg8[%c0_18, %c0_19] : memref<1x128xf32, #tpu.memory_space<vmem>>, vector<1x128xf32>
      %cst_20 = arith.constant 0.001953125 : f32
      %27 = vector.broadcast %cst_20 : f32 to vector<1x128xf32>
      %28 = arith.mulf %26, %27 : vector<1x128xf32>
      %c0_21 = arith.constant 0 : index
      %c0_22 = arith.constant 0 : index
      %29 = vector.load %arg9[%c0_21, %c0_22] : memref<1x128xf32, #tpu.memory_space<vmem>>, vector<1x128xf32>
      %cst_23 = arith.constant 0.001953125 : f32
      %30 = vector.broadcast %cst_23 : f32 to vector<1x128xf32>
      %31 = arith.mulf %29, %30 : vector<1x128xf32>
      %32 = arith.mulf %28, %28 : vector<1x128xf32>
      %33 = arith.subf %31, %32 : vector<1x128xf32>
      %cst_24 = arith.constant 0.000000e+00 : f32
      %34 = vector.broadcast %cst_24 : f32 to vector<1x128xf32>
      %35 = arith.maximumf %33, %34 : vector<1x128xf32>
      %c0_25 = arith.constant 0 : index
      %c0_26 = arith.constant 0 : index
      %36 = vector.load %arg3[%c0_25, %c0_26] : memref<1x128xf32, #tpu.memory_space<vmem>>, vector<1x128xf32>
      %cst_27 = arith.constant 9.99999974E-6 : f32
      %37 = vector.broadcast %cst_27 : f32 to vector<1x128xf32>
      %38 = arith.addf %35, %37 : vector<1x128xf32>
      %39 = math.rsqrt %38 : vector<1x128xf32>
      %40 = arith.mulf %36, %39 : vector<1x128xf32>
      %c0_28 = arith.constant 0 : index
      %c0_29 = arith.constant 0 : index
      %41 = vector.load %arg4[%c0_28, %c0_29] : memref<1x128xf32, #tpu.memory_space<vmem>>, vector<1x128xf32>
      %42 = arith.mulf %28, %40 : vector<1x128xf32>
      %43 = arith.subf %41, %42 : vector<1x128xf32>
      %c0_30 = arith.constant 0 : index
      %44 = memref.load %arg5[%c0_30] : memref<3xf32, #tpu.memory_space<smem>>
      %c1 = arith.constant 1 : index
      %45 = memref.load %arg5[%c1] : memref<3xf32, #tpu.memory_space<smem>>
      %c2 = arith.constant 2 : index
      %46 = memref.load %arg5[%c2] : memref<3xf32, #tpu.memory_space<smem>>
      %c0_i32_31 = arith.constant 0 : i32
      %47 = arith.index_cast %c0_i32_31 : i32 to index
      %c0_32 = arith.constant 0 : index
      %c0_33 = arith.constant 0 : index
      %48 = vector.load %arg7[%47, %c0_32, %c0_33] : memref<1x512x128xbf16, #tpu.memory_space<vmem>>, vector<1x512x128xbf16>
      %49 = vector.shape_cast %48 : vector<1x512x128xbf16> to vector<512x128xbf16>
      %50 = arith.extf %49 : vector<512x128xbf16> to vector<512x128xf32>
      %51 = vector.broadcast %40 : vector<1x128xf32> to vector<512x128xf32>
      %52 = arith.mulf %50, %51 : vector<512x128xf32>
      %53 = vector.broadcast %43 : vector<1x128xf32> to vector<512x128xf32>
      %54 = arith.addf %52, %53 : vector<512x128xf32>
      %cst_34 = arith.constant 0.000000e+00 : f32
      %55 = vector.broadcast %cst_34 : f32 to vector<512x128xf32>
      %56 = arith.maximumf %54, %55 : vector<512x128xf32>
      %57 = vector.broadcast %44 : f32 to vector<512x128xf32>
      %58 = arith.minimumf %56, %57 : vector<512x128xf32>
      %59 = vector.broadcast %45 : f32 to vector<512x128xf32>
      %60 = arith.mulf %58, %59 : vector<512x128xf32>
      %61 = math.roundeven %60 : vector<512x128xf32>
      %62 = vector.broadcast %46 : f32 to vector<512x128xf32>
      %63 = arith.mulf %61, %62 : vector<512x128xf32>
      %64 = arith.truncf %63 : vector<512x128xf32> to vector<512x128xbf16>
      %65 = arith.index_cast %c0_i32_31 : i32 to index
      %c0_35 = arith.constant 0 : index
      %c0_36 = arith.constant 0 : index
      %66 = vector.load %arg6[%65, %c0_35, %c0_36] : memref<1x512x128xbf16, #tpu.memory_space<vmem>>, vector<1x512x128xbf16>
      %67 = vector.shape_cast %66 : vector<1x512x128xbf16> to vector<512x128xbf16>
      %68 = vector.shape_cast %64 : vector<512x128xbf16> to vector<1x512x128xbf16>
      tpu.vector_store %arg6[%65, %c0_35, %c0_36], %68 {strides = array<i32>} : memref<1x512x128xbf16, #tpu.memory_space<vmem>>, vector<1x512x128xbf16>,
      %c1_i32 = arith.constant 1 : i32
    } else {
    }
    return
  }
  func.func @transform_0(%arg0: i32) -> (i32, i32) {
    %c0_i32 = arith.constant 0 : i32
    %c0_i32_0 = arith.constant 0 : i32
    return %arg0, %c0_i32 : i32, i32
  }
  func.func @transform_1(%arg0: i32) -> (i32, i32) {
    %c0_i32 = arith.constant 0 : i32
    %c0_i32_0 = arith.constant 0 : i32
    %c0_i32_1 = arith.constant 0 : i32
    return %c0_i32, %c0_i32_0 : i32, i32
  }
  func.func @transform_2(%arg0: i32) -> (i32, i32) {
    %c0_i32 = arith.constant 0 : i32
    %c0_i32_0 = arith.constant 0 : i32
    %c0_i32_1 = arith.constant 0 : i32
    return %c0_i32, %c0_i32_0 : i32, i32
  }
  func.func @transform_3(%arg0: i32) -> (i32, i32) {
    %c0_i32 = arith.constant 0 : i32
    %c0_i32_0 = arith.constant 0 : i32
    %c0_i32_1 = arith.constant 0 : i32
    return %c0_i32, %c0_i32_0 : i32, i32
  }
  func.func @transform_4(%arg0: i32) -> i32 {
    %c0_i32 = arith.constant 0 : i32
    %c0_i32_0 = arith.constant 0 : i32
    return %c0_i32 : i32
  }
  func.func @transform_5(%arg0: i32) -> (i32, i32, i32) {
    %c0_i32 = arith.constant 0 : i32
    %c0_i32_0 = arith.constant 0 : i32
    %c0_i32_1 = arith.constant 0 : i32
    %c0_i32_2 = arith.constant 0 : i32
    return %c0_i32, %c0_i32_0, %c0_i32_1 : i32, i32, i32
  }
}

</mosaic_0001>

<bundles_post_ra>
// kernel: tpu_custom_call.1
= control target key start
LH: loop header
LB: loop body
LE: loop exit
PB: predicated region body
PF: predicated region fallthrough
CT: control target
= control target key end

     0   :  { %10 = vsyncpa [#allocation6], 0  ;;  %s6472_s0 = inlined_call_operand.hbm [shape: bf16[512,128], index: 0, kind: input, shape index: {}]   ;;  %s6473_s1 = inlined_call_operand.hbm [shape: bf16[128,128], index: 1, kind: input, shape index: {}]   ;;  %s6474_s2 = inlined_call_operand.vmem [shape: f32[1,128], index: 2, kind: input, shape index: {}]   ;;  %s6475_s3 = inlined_call_operand.vmem [shape: f32[1,128], index: 3, kind: input, shape index: {}]   ;;  %s6476_s4 = inlined_call_operand.vmem [shape: f32[3], index: 4, kind: input, shape index: {}]   ;;  %s6477_s5 = inlined_call_operand.hbm [shape: bf16[1,512,128], index: 5, kind: output, shape index: {}]  }
   0x1   :  { %11 = vsyncpa [#allocation10], 0 }
   0x2   :  { %12 = vsyncpa [#allocation8], 0 }
   0x3   :  { %13 = vsyncpa [#allocation7], 0  ;;  %s3839_s18 = smov [#allocation5]  }
   0x4   :  { %s19_s19 = sshll.u32 %s3839_s18, 4  ;;  %s20_s19 = int_to_ptr.vmem [resolvable:$true] %s19_s19 }
   0x5   :  { %s3767_s20 = scalar_lea.vmem %s20_s19, 4096  ;;  %p3772_p1 = scmp.lt.s32.totalorder %s20_s19, %s20_s19 }
   0x6   :  { %p3768_p0 = scmp.ne.s32.totalorder %s20_s19, %s3767_s20  ;;  %p3773_p2 = scmp.lt.s32.totalorder %s3767_s20, %s3767_s20 }
   0x8   :  { %p3774_p3 = por %p3773_p2, %p3772_p1 }
   0xa   :  { %p3775_p4 = pnand %p3774_p3, %p3768_p0 }
   0xc   :  { %3778 = shalt.err (!%p3775_p4)
}
   0xd   :  { %s3840_s21 = smov 64   ;;  %s3841_s22 = smov 4  }
   0xe   :  { %25 = dma.hbm_to_vmem [thread:$0]  %s6472_s0, 4096, %s20_s19, [#allocation6], %s3840_s21, %s3840_s21, %s3841_s22  }
   0xf   :  { %s3842_s25 = smov [#allocation9]   ;;  %s48_s29 = sshll.u32 %s6476_s4, 4  ;;  %s49_s29 = int_to_ptr.vmem [resolvable:$true] %s48_s29 }
  0x10   :  { %s31_s26 = sshll.u32 %s3842_s25, 4  ;;  %s32_s26 = int_to_ptr.vmem [resolvable:$true] %s31_s26 }
  0x11   :  { %s3787_s30 = scalar_lea.vmem %s32_s26, 1024  ;;  %p3792_p6 = scmp.lt.s32.totalorder %s32_s26, %s32_s26 }
  0x12   :  { %p3788_p5 = scmp.ne.s32.totalorder %s32_s26, %s3787_s30  ;;  %p3793_p7 = scmp.lt.s32.totalorder %s3787_s30, %s3787_s30 }
  0x14   :  { %p3794_p8 = por %p3793_p7, %p3792_p6 }
  0x16   :  { %p3795_p9 = pnand %p3794_p8, %p3788_p5 }
  0x18   :  { %3798 = shalt.err (!%p3795_p9)
}
  0x19   :  { %37 = dma.hbm_to_vmem [thread:$0]  %s6473_s1, 1024, %s32_s26, [#allocation10], %s3840_s21, %s3840_s21, %s3841_s22  }
  0x1a   :  { %s3799_s7 = scalar_lea.vmem %s49_s29, 16  ;;  %p3804_p11 = scmp.lt.s32.totalorder %s49_s29, %s49_s29 }
  0x1b   :  { %p3800_p10 = scmp.ne.s32.totalorder %s49_s29, %s3799_s7  ;;  %p3805_p12 = scmp.lt.s32.totalorder %s3799_s7, %s3799_s7 }
  0x1d   :  { %p3806_p13 = por %p3805_p12, %p3804_p11 }
  0x1f   :  { %p3807_p0 = pnand %p3806_p13, %p3800_p10 }
  0x21   :  { %3810 = shalt.err (!%p3807_p0)
}
  0x22   :  { %s3843_s4 = smov [#allocation11]  }
  0x23   :  { %51 = dma.vmem_to_smem %s49_s29, 16, %s3843_s4, [#allocation8]  }
  0x24   :  { %3831 = dma.done.wait [#allocation6], 4096  }
  0x25   :  { %3832 = vsyncadd [#allocation6], 4294963200 }
  0x26   :  { %3833 = dma.done.wait [#allocation10], 1024  }
  0x27   :  { %3834 = vsyncadd [#allocation10], 4294966272 }
  0x28   :  { %3835 = dma.done.wait [#allocation8], 16  }
  0x29   :  { %3836 = vsyncadd [#allocation8], 4294967280 }
  0x2a   :  { %61 = sfence }
  0x2b   :  { %v3717_v0 = vld [vmem:[#allocation9 + $0x38] sm:$0xff]   ;;  %v3718_v1 = vld [vmem:[#allocation9 + $0x30] sm:$0xff]   ;;  %v3719_v2 = vld [vmem:[#allocation9 + $0x28] sm:$0xff]   ;;  %v3844_v44 = vmov 0.0   ;;  %s1290_s1 = sld [smem:[#allocation11]] }
  0x2c   :  { %3102 = vmatprep.subr.bf16.mxu0 %v3717_v0  ;;  %3182 = vmatprep.subr.bf16.mxu1 %v3717_v0  ;;  %v3720_v3 = vld [vmem:[#allocation9 + $0x20] sm:$0xff]   ;;  %v3721_v5 = vld [vmem:[#allocation9 + $0x18] sm:$0xff]   ;;  %v3722_v6 = vld [vmem:[#allocation9 + $0x10] sm:$0xff]   ;;  %67 = vst [vmem:[#allocation3] sm:$0x1] %v3844_v44  ;;  %s2327_s8 = sld [smem:[#allocation11 + $0x1]] }
  0x2d   :  { %3103 = vmatpush3.bf16.msra.mxu0 %v3717_v0  ;;  %3190 = vmatpush3.bf16.msra.mxu1 %v3717_v0  ;;  %v3725_v4 = vld [vmem:[#allocation5] sm:$0xff]   ;;  %v3723_v7 = vld [vmem:[#allocation9 + $0x8] sm:$0xff]   ;;  %v3727_v11 = vld [vmem:[#allocation5 + $0x10] sm:$0xff]   ;;  %68 = vst [vmem:[#allocation4] sm:$0x1] %v3844_v44  ;;  %s2328_s9 = sld [smem:[#allocation11 + $0x2]] }
  0x2e   :  { %3104 = vmatprep.subr.bf16.mxu0 %v3718_v1  ;;  %3183 = vmatprep.subr.bf16.mxu1 %v3718_v1  ;;  %v3724_v8 = vld [vmem:[#allocation9] sm:$0xff]   ;;  %v3726_v10 = vld [vmem:[#allocation5 + $0x8] sm:$0xff]   ;;  %v3743_v13 = vld [vmem:[#allocation5 + $0x90] sm:$0xff]  }
  0x2f   :  { %3118 = vmatprep.mubr.bf16.mxu0 %v3725_v4  ;;  %v3741_v9 = vld [vmem:[#allocation5 + $0x80] sm:$0xff]   ;;  %v3742_v12 = vld [vmem:[#allocation5 + $0x88] sm:$0xff]   ;;  %v3728_v14 = vld [vmem:[#allocation5 + $0x18] sm:$0xff]  }
  0x30   :  { %3150 = vmatprep.mubr.bf16.mxu1 %v3741_v9  ;;  %v3729_v15 = vld [vmem:[#allocation5 + $0x20] sm:$0xff]   ;;  %v3744_v16 = vld [vmem:[#allocation5 + $0x98] sm:$0xff]   ;;  %v3730_v18 = vld [vmem:[#allocation5 + $0x28] sm:$0xff]  }
  0x31   :  { %3105 = vmatpush3.bf16.msra.mxu0 %v3718_v1  ;;  %3191 = vmatpush3.bf16.msra.mxu1 %v3718_v1  ;;  %v3745_v17 = vld [vmem:[#allocation5 + $0xa0] sm:$0xff]   ;;  %v3746_v19 = vld [vmem:[#allocation5 + $0xa8] sm:$0xff]   ;;  %v3731_v20 = vld [vmem:[#allocation5 + $0x30] sm:$0xff]  }
  0x32   :  { %3106 = vmatprep.subr.bf16.mxu0 %v3719_v2  ;;  %3184 = vmatprep.subr.bf16.mxu1 %v3719_v2  ;;  %v3747_v21 = vld [vmem:[#allocation5 + $0xb0] sm:$0xff]   ;;  %v3732_v22 = vld [vmem:[#allocation5 + $0x38] sm:$0xff]   ;;  %v3733_v24 = vld [vmem:[#allocation5 + $0x40] sm:$0xff]  }
  0x33   :  { %v3748_v23 = vld [vmem:[#allocation5 + $0xb8] sm:$0xff]   ;;  %v3749_v25 = vld [vmem:[#allocation5 + $0xc0] sm:$0xff]   ;;  %v3734_v26 = vld [vmem:[#allocation5 + $0x48] sm:$0xff]  }
  0x34   :  { %v3750_v27 = vld [vmem:[#allocation5 + $0xc8] sm:$0xff]   ;;  %v3735_v28 = vld [vmem:[#allocation5 + $0x50] sm:$0xff]   ;;  %v3736_v30 = vld [vmem:[#allocation5 + $0x58] sm:$0xff]  }
  0x35   :  { %3107 = vmatpush3.bf16.msra.mxu0 %v3719_v2  ;;  %3192 = vmatpush3.bf16.msra.mxu1 %v3719_v2  ;;  %v3751_v29 = vld [vmem:[#allocation5 + $0xd0] sm:$0xff]   ;;  %v3752_v31 = vld [vmem:[#allocation5 + $0xd8] sm:$0xff]   ;;  %v3737_v32 = vld [vmem:[#allocation5 + $0x60] sm:$0xff]  }
  0x36   :  { %3108 = vmatprep.subr.bf16.mxu0 %v3720_v3  ;;  %3185 = vmatprep.subr.bf16.mxu1 %v3720_v3  ;;  %v3753_v33 = vld [vmem:[#allocation5 + $0xe0] sm:$0xff]   ;;  %v3738_v34 = vld [vmem:[#allocation5 + $0x68] sm:$0xff]   ;;  %v3739_v36 = vld [vmem:[#allocation5 + $0x70] sm:$0xff]  }
  0x37   :  { %v3754_v35 = vld [vmem:[#allocation5 + $0xe8] sm:$0xff]   ;;  %v3755_v37 = vld [vmem:[#allocation5 + $0xf0] sm:$0xff]   ;;  %v3740_v38 = vld [vmem:[#allocation5 + $0x78] sm:$0xff]  }
  0x38   :  { %v3756_v39 = vld [vmem:[#allocation5 + $0xf8] sm:$0xff]  }
  0x39   :  { %3109 = vmatpush3.bf16.msra.mxu0 %v3720_v3  ;;  %3193 = vmatpush3.bf16.msra.mxu1 %v3720_v3 }
  0x3a   :  { %3110 = vmatprep.subr.bf16.mxu0 %v3721_v5  ;;  %3186 = vmatprep.subr.bf16.mxu1 %v3721_v5 }
  0x3d   :  { %3111 = vmatpush3.bf16.msra.mxu0 %v3721_v5  ;;  %3194 = vmatpush3.bf16.msra.mxu1 %v3721_v5 }
  0x3e   :  { %3112 = vmatprep.subr.bf16.mxu0 %v3722_v6  ;;  %3187 = vmatprep.subr.bf16.mxu1 %v3722_v6 }
  0x41   :  { %3113 = vmatpush3.bf16.msra.mxu0 %v3722_v6  ;;  %3195 = vmatpush3.bf16.msra.mxu1 %v3722_v6 }
  0x42   :  { %3114 = vmatprep.subr.bf16.mxu0 %v3723_v7  ;;  %3188 = vmatprep.subr.bf16.mxu1 %v3723_v7 }
  0x45   :  { %3115 = vmatpush3.bf16.msra.mxu0 %v3723_v7  ;;  %3196 = vmatpush3.bf16.msra.mxu1 %v3723_v7 }
  0x46   :  { %3116 = vmatprep.subr.bf16.mxu0 %v3724_v8  ;;  %3189 = vmatprep.subr.bf16.mxu1 %v3724_v8 }
  0x49   :  { %3117 = vmatpush3.bf16.msra.mxu0 %v3724_v8  ;;  %3197 = vmatpush3.bf16.msra.mxu1 %v3724_v8 }
  0x4c   :  { %3119 = vmatmul.mubr.bf16.vlgmr.msra.gmra.mxu0 %v3726_v10  ;;  %3151 = vmatmul.mubr.bf16.vlgmr.msra.gmra.mxu1 %v3742_v12 }
  0x4d   :  { %3122 = vmatprep.mubr.bf16.mxu0 %v3727_v11  ;;  %3154 = vmatprep.mubr.bf16.mxu1 %v3743_v13 }
  0x54   :  { %3123 = vmatmul.mubr.bf16.gmra.mxu0 %v3728_v14  ;;  %3155 = vmatmul.mubr.bf16.gmra.mxu1 %v3744_v16 }
  0x55   :  { %3126 = vmatprep.mubr.bf16.mxu0 %v3729_v15  ;;  %3158 = vmatprep.mubr.bf16.mxu1 %v3745_v17 }
  0x5c   :  { %3127 = vmatmul.mubr.bf16.gmra.mxu0 %v3730_v18  ;;  %3159 = vmatmul.mubr.bf16.gmra.mxu1 %v3746_v19 }
  0x5d   :  { %3130 = vmatprep.mubr.bf16.mxu0 %v3731_v20  ;;  %3162 = vmatprep.mubr.bf16.mxu1 %v3747_v21 }
  0x64   :  { %3131 = vmatmul.mubr.bf16.gmra.mxu0 %v3732_v22  ;;  %3163 = vmatmul.mubr.bf16.gmra.mxu1 %v3748_v23 }
  0x65   :  { %3134 = vmatprep.mubr.bf16.mxu0 %v3733_v24  ;;  %3166 = vmatprep.mubr.bf16.mxu1 %v3749_v25 }
  0x6c   :  { %3135 = vmatmul.mubr.bf16.gmra.mxu0 %v3734_v26  ;;  %3167 = vmatmul.mubr.bf16.gmra.mxu1 %v3750_v27 }
  0x6d   :  { %3138 = vmatprep.mubr.bf16.mxu0 %v3735_v28  ;;  %3170 = vmatprep.mubr.bf16.mxu1 %v3751_v29 }
  0x74   :  { %3139 = vmatmul.mubr.bf16.gmra.mxu0 %v3736_v30  ;;  %3171 = vmatmul.mubr.bf16.gmra.mxu1 %v3752_v31 }
  0x75   :  { %3142 = vmatprep.mubr.bf16.mxu0 %v3737_v32  ;;  %3174 = vmatprep.mubr.bf16.mxu1 %v3753_v33 }
  0x7c   :  { %3143 = vmatmul.mubr.bf16.gmra.mxu0 %v3738_v34  ;;  %3175 = vmatmul.mubr.bf16.gmra.mxu1 %v3754_v35 }
  0x7d   :  { %3146 = vmatprep.mubr.bf16.mxu0 %v3739_v36  ;;  %3178 = vmatprep.mubr.bf16.mxu1 %v3755_v37 }
  0x84   :  { %3147 = vmatmul.mubr.bf16.gmra.mxu0 %v3740_v38  ;;  %3179 = vmatmul.mubr.bf16.gmra.mxu1 %v3756_v39 }
 0x10c   :  { %v3120_v40 = vpop.f32.mrf.mxu0  ;;  %v3891_v41 = vpop.f32.mrf.mxu1 }
 0x10e   :  { %v423_v42 = vpop.f32.mrf.mxu0  ;;  %v3893_v43 = vpop.f32.mrf.mxu1 }
 0x110   :  { %v3121_v45 = vpop.f32.mrf.mxu0  ;;  %v3895_v47 = vpop.f32.mrf.mxu1 }
 0x111   :  { %v679_v46 = vpack.c.bf16 %v3121_v45, %v3120_v40 }
 0x112   :  { %v426_v48 = vpop.f32.mrf.mxu0  ;;  %v3903_v54 = vpop.f32.mrf.mxu1 }
 0x113   :  { %v678_v49 = vpack.c.bf16 %v426_v48, %v423_v42  ;;  %v3897_v51 = vunpack.c.l.bf16 %v679_v46  ;;  %v3911_v60 = vunpack.c.h.bf16 %v679_v46 }
 0x114   :  { %v3124_v50 = vpop.f32.mrf.mxu0  ;;  %v3916_v0 = vpop.f32.mrf.mxu1 }
 0x115   :  { %v3899_v52 = vunpack.c.l.bf16 %v678_v49  ;;  %v3901_v53 = vunpack.c.h.bf16 %v678_v49  ;;  %v1140_v61 = vmul.f32 %v3897_v51, %v3897_v51  ;;  %v1141_v6 = vmul.f32 %v3911_v60, %v3911_v60 }
 0x116   :  { %v439_v55 = vpop.f32.mrf.mxu0  ;;  %v3925_v10 = vpop.f32.mrf.mxu1 }
 0x117   :  { %v1066_v56 = vadd.f32 %v3901_v53, %v3899_v52  ;;  %v1138_v57 = vmul.f32 %v3899_v52, %v3899_v52  ;;  %v1139_v58 = vmul.f32 %v3901_v53, %v3901_v53 }
 0x118   :  { %v3125_v59 = vpop.f32.mrf.mxu0  ;;  %v3937_v21 = vpop.f32.mrf.mxu1 }
 0x119   :  { %v1067_v62 = vadd.f32 %v1066_v56, %v3897_v51  ;;  %v1202_v63 = vadd.f32 %v1139_v58, %v1138_v57  ;;  %v681_v3 = vpack.c.bf16 %v3125_v59, %v3124_v50 }
 0x11a   :  { %v442_v1 = vpop.f32.mrf.mxu0  ;;  %v3945_v32 = vpop.f32.mrf.mxu1 }
 0x11b   :  { %v1203_v2 = vadd.f32 %v1202_v63, %v1140_v61  ;;  %v680_v4 = vpack.c.bf16 %v442_v1, %v439_v55  ;;  %v1068_v9 = vadd.f32 %v1067_v62, %v3911_v60  ;;  %v3927_v12 = vunpack.c.l.bf16 %v681_v3 }
 0x11c   :  { %v3128_v5 = vpop.f32.mrf.mxu0  ;;  %v3932_v17 = vunpack.c.h.bf16 %v681_v3  ;;  %v3956_v42 = vpop.f32.mrf.mxu1 }
 0x11d   :  { %v3920_v7 = vunpack.c.l.bf16 %v680_v4  ;;  %v3922_v8 = vunpack.c.h.bf16 %v680_v4  ;;  %v1204_v15 = vadd.f32 %v1203_v2, %v1141_v6  ;;  %v1144_v23 = vmul.f32 %v3927_v12, %v3927_v12 }
 0x11e   :  { %v455_v11 = vpop.f32.mrf.mxu0  ;;  %v1145_v29 = vmul.f32 %v3932_v17, %v3932_v17  ;;  %v3968_v62 = vpop.f32.mrf.mxu1 }
 0x11f   :  { %v1069_v13 = vadd.f32 %v1068_v9, %v3920_v7  ;;  %v1142_v14 = vmul.f32 %v3920_v7, %v3920_v7  ;;  %v1143_v19 = vmul.f32 %v3922_v8, %v3922_v8 }
 0x120   :  { %v3129_v16 = vpop.f32.mrf.mxu0 }
 0x121   :  { %v1070_v18 = vadd.f32 %v1069_v13, %v3922_v8  ;;  %v1205_v20 = vadd.f32 %v1204_v15, %v1142_v14  ;;  %v683_v26 = vpack.c.bf16 %v3129_v16, %v3128_v5  ;;  %v3980_v14 = vpop.f32.mrf.mxu1 }
 0x122   :  { %v458_v22 = vpop.f32.mrf.mxu0 }
 0x123   :  { %v1071_v24 = vadd.f32 %v1070_v18, %v3927_v12  ;;  %v1206_v25 = vadd.f32 %v1205_v20, %v1143_v19  ;;  %v682_v27 = vpack.c.bf16 %v458_v22, %v455_v11  ;;  %v3951_v37 = vunpack.c.l.bf16 %v683_v26 }
 0x124   :  { %v3132_v28 = vpop.f32.mrf.mxu0  ;;  %v3958_v44 = vunpack.c.h.bf16 %v683_v26 }
 0x125   :  { %v1207_v30 = vadd.f32 %v1206_v25, %v1144_v23  ;;  %v1072_v31 = vadd.f32 %v1071_v24, %v3932_v17  ;;  %v3947_v33 = vunpack.c.l.bf16 %v682_v27  ;;  %v3949_v34 = vunpack.c.h.bf16 %v682_v27 }
 0x126   :  { %v471_v35 = vpop.f32.mrf.mxu0  ;;  %v1148_v55 = vmul.f32 %v3951_v37, %v3951_v37  ;;  %v1149_v63 = vmul.f32 %v3958_v44, %v3958_v44 }
 0x127   :  { %v1208_v36 = vadd.f32 %v1207_v30, %v1145_v29  ;;  %v1073_v38 = vadd.f32 %v1072_v31, %v3947_v33  ;;  %v1146_v39 = vmul.f32 %v3947_v33, %v3947_v33  ;;  %v1147_v46 = vmul.f32 %v3949_v34, %v3949_v34  ;;  %v3992_v29 = vpop.f32.mrf.mxu1 }
 0x128   :  { %v3133_v40 = vpop.f32.mrf.mxu0 }
 0x129   :  { %v1074_v45 = vadd.f32 %v1073_v38, %v3949_v34  ;;  %v1209_v48 = vadd.f32 %v1208_v36, %v1146_v39  ;;  %v685_v58 = vpack.c.bf16 %v3133_v40, %v3132_v28 }
 0x12a   :  { %v474_v49 = vpop.f32.mrf.mxu0 }
 0x12b   :  { %v684_v50 = vpack.c.bf16 %v474_v49, %v471_v35  ;;  %v1075_v56 = vadd.f32 %v1074_v45, %v3951_v37  ;;  %v1210_v57 = vadd.f32 %v1209_v48, %v1147_v46  ;;  %v3977_v6 = vunpack.c.l.bf16 %v685_v58  ;;  %v4004_v49 = vpop.f32.mrf.mxu1 }
 0x12c   :  { %v3136_v59 = vpop.f32.mrf.mxu0  ;;  %v3982_v15 = vunpack.c.h.bf16 %v685_v58 }
 0x12d   :  { %v3966_v61 = vunpack.c.l.bf16 %v684_v50  ;;  %v1211_v1 = vadd.f32 %v1210_v57, %v1148_v55  ;;  %v3972_v2 = vunpack.c.h.bf16 %v684_v50  ;;  %v1076_v3 = vadd.f32 %v1075_v56, %v3958_v44 }
 0x12e   :  { %v487_v4 = vpop.f32.mrf.mxu0  ;;  %v1152_v23 = vmul.f32 %v3977_v6, %v3977_v6  ;;  %v1153_v30 = vmul.f32 %v3982_v15, %v3982_v15 }
 0x12f   :  { %v1150_v5 = vmul.f32 %v3966_v61, %v3966_v61  ;;  %v1077_v9 = vadd.f32 %v1076_v3, %v3966_v61  ;;  %v1212_v11 = vadd.f32 %v1211_v1, %v1149_v63  ;;  %v1151_v18 = vmul.f32 %v3972_v2, %v3972_v2 }
 0x130   :  { %v3137_v13 = vpop.f32.mrf.mxu0 }
 0x131   :  { %v1078_v16 = vadd.f32 %v1077_v9, %v3972_v2  ;;  %v1213_v19 = vadd.f32 %v1212_v11, %v1150_v5  ;;  %v687_v26 = vpack.c.bf16 %v3137_v13, %v3136_v59  ;;  %v4016_v11 = vpop.f32.mrf.mxu1 }
 0x132   :  { %v490_v20 = vpop.f32.mrf.mxu0 }
 0x133   :  { %v686_v22 = vpack.c.bf16 %v490_v20, %v487_v4  ;;  %v1079_v24 = vadd.f32 %v1078_v16, %v3977_v6  ;;  %v1214_v25 = vadd.f32 %v1213_v19, %v1151_v18  ;;  %v4001_v40 = vunpack.c.l.bf16 %v687_v26 }
 0x134   :  { %v3140_v27 = vpop.f32.mrf.mxu0  ;;  %v4006_v50 = vunpack.c.h.bf16 %v687_v26 }
 0x135   :  { %v3990_v28 = vunpack.c.l.bf16 %v686_v22  ;;  %v1215_v31 = vadd.f32 %v1214_v25, %v1152_v23  ;;  %v3996_v35 = vunpack.c.h.bf16 %v686_v22  ;;  %v1080_v36 = vadd.f32 %v1079_v24, %v3982_v15 }
 0x136   :  { %v503_v38 = vpop.f32.mrf.mxu0  ;;  %v1156_v63 = vmul.f32 %v4001_v40, %v4001_v40  ;;  %v1157_v13 = vmul.f32 %v4006_v50, %v4006_v50 }
 0x137   :  { %v1154_v39 = vmul.f32 %v3990_v28, %v3990_v28  ;;  %v1081_v45 = vadd.f32 %v1080_v36, %v3990_v28  ;;  %v1216_v46 = vadd.f32 %v1215_v31, %v1153_v30  ;;  %v1155_v56 = vmul.f32 %v3996_v35, %v3996_v35 }
 0x138   :  { %v3141_v48 = vpop.f32.mrf.mxu0 }
 0x139   :  { %v1082_v55 = vadd.f32 %v1081_v45, %v3996_v35  ;;  %v1217_v57 = vadd.f32 %v1216_v46, %v1154_v39  ;;  %v689_v4 = vpack.c.bf16 %v3141_v48, %v3140_v27  ;;  %v4028_v27 = vpop.f32.mrf.mxu1 }
 0x13a   :  { %v506_v58 = vpop.f32.mrf.mxu0 }
 0x13b   :  { %v688_v59 = vpack.c.bf16 %v506_v58, %v503_v38  ;;  %v1083_v1 = vadd.f32 %v1082_v55, %v4001_v40  ;;  %v1218_v3 = vadd.f32 %v1217_v57, %v1155_v56  ;;  %v4025_v23 = vunpack.c.l.bf16 %v689_v4 }
 0x13c   :  { %v3144_v5 = vpop.f32.mrf.mxu0  ;;  %v4030_v30 = vunpack.c.h.bf16 %v689_v4 }
 0x13d   :  { %v4014_v9 = vunpack.c.l.bf16 %v688_v59  ;;  %v1219_v16 = vadd.f32 %v1218_v3, %v1156_v63  ;;  %v4020_v18 = vunpack.c.h.bf16 %v688_v59  ;;  %v1084_v19 = vadd.f32 %v1083_v1, %v4006_v50  ;;  %v4040_v59 = vpop.f32.mrf.mxu1 }
 0x13e   :  { %v519_v20 = vpop.f32.mrf.mxu0  ;;  %v1160_v46 = vmul.f32 %v4025_v23, %v4025_v23  ;;  %v1161_v63 = vmul.f32 %v4030_v30, %v4030_v30 }
 0x13f   :  { %v1158_v22 = vmul.f32 %v4014_v9, %v4014_v9  ;;  %v1085_v24 = vadd.f32 %v1084_v19, %v4014_v9  ;;  %v1220_v25 = vadd.f32 %v1219_v16, %v1157_v13  ;;  %v1159_v36 = vmul.f32 %v4020_v18, %v4020_v18 }
 0x140   :  { %v3145_v26 = vpop.f32.mrf.mxu0 }
 0x141   :  { %v1086_v31 = vadd.f32 %v1085_v24, %v4020_v18  ;;  %v1221_v38 = vadd.f32 %v1220_v25, %v1158_v22  ;;  %v691_v56 = vpack.c.bf16 %v3145_v26, %v3144_v5  ;;  %v4052_v24 = vpop.f32.mrf.mxu1 }
 0x142   :  { %v522_v39 = vpop.f32.mrf.mxu0 }
 0x143   :  { %v690_v45 = vpack.c.bf16 %v522_v39, %v519_v20  ;;  %v1087_v48 = vadd.f32 %v1086_v31, %v4025_v23  ;;  %v1222_v55 = vadd.f32 %v1221_v38, %v1159_v36  ;;  %v4049_v19 = vunpack.c.l.bf16 %v691_v56 }
 0x144   :  { %v3148_v57 = vpop.f32.mrf.mxu0  ;;  %v4054_v25 = vunpack.c.h.bf16 %v691_v56 }
 0x145   :  { %v4038_v58 = vunpack.c.l.bf16 %v690_v45  ;;  %v1223_v1 = vadd.f32 %v1222_v55, %v1160_v46  ;;  %v4044_v3 = vunpack.c.h.bf16 %v690_v45  ;;  %v1088_v4 = vadd.f32 %v1087_v48, %v4030_v30 }
 0x146   :  { %v535_v13 = vpop.f32.mrf.mxu0  ;;  %v1164_v45 = vmul.f32 %v4049_v19, %v4049_v19  ;;  %v1165_v56 = vmul.f32 %v4054_v25, %v4054_v25 }
 0x147   :  { %v1162_v16 = vmul.f32 %v4038_v58, %v4038_v58  ;;  %v1089_v5 = vadd.f32 %v1088_v4, %v4038_v58  ;;  %v1224_v20 = vadd.f32 %v1223_v1, %v1161_v63  ;;  %v1163_v31 = vmul.f32 %v4044_v3, %v4044_v3  ;;  %v4064_v1 = vpop.f32.mrf.mxu1 }
 0x148   :  { %v3149_v22 = vpop.f32.mrf.mxu0 }
 0x149   :  { %v1090_v26 = vadd.f32 %v1089_v5, %v4044_v3  ;;  %v1225_v36 = vadd.f32 %v1224_v20, %v1162_v16  ;;  %v693_v55 = vpack.c.bf16 %v3149_v22, %v3148_v57  ;;  %v694_v22 = vpack.c.bf16 %v3903_v54, %v3893_v43 }
 0x14a   :  { %v538_v38 = vpop.f32.mrf.mxu0 }
 0x14b   :  { %v692_v39 = vpack.c.bf16 %v538_v38, %v535_v13  ;;  %v1091_v46 = vadd.f32 %v1090_v26, %v4049_v19  ;;  %v1226_v48 = vadd.f32 %v1225_v36, %v1163_v31  ;;  %v4073_v20 = vunpack.c.l.bf16 %v693_v55  ;;  %v4078_v31 = vpop.f32.mrf.mxu1 }
 0x14c   :  { %v4080_v36 = vunpack.c.h.bf16 %v693_v55  ;;  %v4090_v43 = vunpack.c.l.bf16 %v694_v22 }
 0x14d   :  { %v4062_v63 = vunpack.c.l.bf16 %v692_v39  ;;  %v1227_v4 = vadd.f32 %v1226_v48, %v1164_v45  ;;  %v4068_v5 = vunpack.c.h.bf16 %v692_v39  ;;  %v1092_v16 = vadd.f32 %v1091_v46, %v4054_v25  ;;  %6715 = vst [vmem:[#allocation17_spill] sm:$0xff] %v4073_v20  ;;  %v4092_v54 = vpop.f32.mrf.mxu1 }
 0x14e   :  { %v695_v46 = vpack.c.bf16 %v3895_v47, %v3891_v41  ;;  %v1168_v48 = vmul.f32 %v4073_v20, %v4073_v20  ;;  %6716 = vst [vmem:[#allocation18_spill] sm:$0xff] %v4090_v43  ;;  %v1169_v55 = vmul.f32 %v4080_v36, %v4080_v36  ;;  %v1170_v47 = vmul.f32 %v4090_v43, %v4090_v43 }
 0x14f   :  { %v1166_v13 = vmul.f32 %v4062_v63, %v4062_v63  ;;  %v1093_v26 = vadd.f32 %v1092_v16, %v4062_v63  ;;  %v1228_v57 = vadd.f32 %v1227_v4, %v1165_v56  ;;  %v1167_v39 = vmul.f32 %v4068_v5, %v4068_v5 }
 0x151   :  { %v1094_v38 = vadd.f32 %v1093_v26, %v4068_v5  ;;  %v1229_v45 = vadd.f32 %v1228_v57, %v1166_v13  ;;  %v4096_v26 = vunpack.c.h.bf16 %v694_v22  ;;  %v4099_v57 = vunpack.c.l.bf16 %v695_v46 }
 0x153   :  { %v1095_v56 = vadd.f32 %v1094_v38, %v4073_v20  ;;  %v1230_v4 = vadd.f32 %v1229_v45, %v1167_v39  ;;  %6717 = vst [vmem:[#allocation19_spill] sm:$0xff] %v4099_v57  ;;  %v696_v39 = vpack.c.bf16 %v3945_v32, %v3925_v10  ;;  %v4106_v45 = vpop.f32.mrf.mxu1  ;;  %v4108_v20 = vunpack.c.h.bf16 %v695_v46 }
 0x155   :  { %v1231_v16 = vadd.f32 %v1230_v4, %v1168_v48  ;;  %v1096_v13 = vadd.f32 %v1095_v56, %v4080_v36  ;;  %v1171_v48 = vmul.f32 %v4096_v26, %v4096_v26  ;;  %v697_v4 = vpack.c.bf16 %v3937_v21, %v3916_v0  ;;  %v4120_v32 = vpop.f32.mrf.mxu1 }
 0x156   :  { %v4118_v10 = vunpack.c.l.bf16 %v696_v39  ;;  %v1173_v46 = vmul.f32 %v4108_v20, %v4108_v20 }
 0x157   :  { %v1097_v41 = vadd.f32 %v1096_v13, %v4090_v43  ;;  %v1232_v38 = vadd.f32 %v1231_v16, %v1169_v55  ;;  %v1172_v13 = vmul.f32 %v4099_v57, %v4099_v57  ;;  %v4124_v43 = vunpack.c.h.bf16 %v696_v39 }
 0x158   :  { %6718 = vst [vmem:[#allocation20_spill] sm:$0xff] %v4118_v10  ;;  %v1174_v21 = vmul.f32 %v4118_v10, %v4118_v10 }
 0x159   :  { %v1098_v22 = vadd.f32 %v1097_v41, %v4096_v26  ;;  %v1233_v56 = vadd.f32 %v1232_v38, %v1170_v47  ;;  %v4127_v38 = vunpack.c.l.bf16 %v697_v4 }
 0x15b   :  { %v1099_v55 = vadd.f32 %v1098_v22, %v4099_v57  ;;  %v1234_v16 = vadd.f32 %v1233_v56, %v1171_v48  ;;  %6719 = vst [vmem:[#allocation21_spill] sm:$0xff] %v4127_v38  ;;  %v698_v48 = vpack.c.bf16 %v3992_v29, %v3968_v62  ;;  %v4134_v56 = vpop.f32.mrf.mxu1  ;;  %v4136_v57 = vunpack.c.h.bf16 %v697_v4 }
 0x15d   :  { %v1235_v41 = vadd.f32 %v1234_v16, %v1172_v13  ;;  %v1100_v47 = vadd.f32 %v1099_v55, %v4108_v20  ;;  %v1175_v13 = vmul.f32 %v4124_v43, %v4124_v43  ;;  %v699_v16 = vpack.c.bf16 %v3980_v14, %v3956_v42  ;;  %v634_v29 = vpop.f32.mrf.mxu1 }
 0x15e   :  { %v4146_v62 = vunpack.c.l.bf16 %v698_v48  ;;  %v1177_v4 = vmul.f32 %v4136_v57, %v4136_v57 }
 0x15f   :  { %v1101_v0 = vadd.f32 %v1100_v47, %v4118_v10  ;;  %v1236_v22 = vadd.f32 %v1235_v41, %v1173_v46  ;;  %v1176_v47 = vmul.f32 %v4127_v38, %v4127_v38  ;;  %v4150_v10 = vunpack.c.h.bf16 %v698_v48 }
 0x160   :  { %6720 = vst [vmem:[#allocation22_spill] sm:$0xff] %v4146_v62  ;;  %v1178_v14 = vmul.f32 %v4146_v62, %v4146_v62 }
 0x161   :  { %v1102_v39 = vadd.f32 %v1101_v0, %v4124_v43  ;;  %v1237_v55 = vadd.f32 %v1236_v22, %v1174_v21  ;;  %v4153_v22 = vunpack.c.l.bf16 %v699_v16 }
 0x163   :  { %v1103_v46 = vadd.f32 %v1102_v39, %v4127_v38  ;;  %v1238_v41 = vadd.f32 %v1237_v55, %v1175_v13  ;;  %6721 = vst [vmem:[#allocation23_spill] sm:$0xff] %v4153_v22  ;;  %v700_v13 = vpack.c.bf16 %v4040_v59, %v4016_v11  ;;  %v4160_v55 = vpop.f32.mrf.mxu1  ;;  %v4162_v38 = vunpack.c.h.bf16 %v699_v16 }
 0x165   :  { %v1239_v0 = vadd.f32 %v1238_v41, %v1176_v47  ;;  %v1104_v21 = vadd.f32 %v1103_v46, %v4136_v57  ;;  %v1179_v47 = vmul.f32 %v4150_v10, %v4150_v10  ;;  %v701_v41 = vpack.c.bf16 %v4028_v27, %v4004_v49  ;;  %v647_v59 = vpop.f32.mrf.mxu1 }
 0x166   :  { %v4172_v11 = vunpack.c.l.bf16 %v700_v13  ;;  %v1181_v16 = vmul.f32 %v4162_v38, %v4162_v38 }
 0x167   :  { %v1105_v42 = vadd.f32 %v1104_v21, %v4146_v62  ;;  %v1240_v39 = vadd.f32 %v1239_v0, %v1177_v4  ;;  %v1180_v21 = vmul.f32 %v4153_v22, %v4153_v22  ;;  %v4176_v62 = vunpack.c.h.bf16 %v700_v13 }
 0x168   :  { %6722 = vst [vmem:[#allocation24_spill] sm:$0xff] %v4172_v11  ;;  %v1182_v27 = vmul.f32 %v4172_v11, %v4172_v11 }
 0x169   :  { %v1106_v48 = vadd.f32 %v1105_v42, %v4150_v10  ;;  %v1241_v46 = vadd.f32 %v1240_v39, %v1178_v14  ;;  %6723 = vst [vmem:[#allocation25_spill] sm:$0xff] %v4176_v62  ;;  %v4179_v39 = vunpack.c.l.bf16 %v701_v41  ;;  %v1183_v13 = vmul.f32 %v4176_v62, %v4176_v62 }
 0x16b   :  { %v1107_v4 = vadd.f32 %v1106_v48, %v4153_v22  ;;  %v1242_v0 = vadd.f32 %v1241_v46, %v1179_v47  ;;  %6724 = vst [vmem:[#allocation26_spill] sm:$0xff] %v4179_v39  ;;  %v702_v47 = vpack.c.bf16 %v4092_v54, %v4064_v1  ;;  %v3177_v46 = vpop.f32.mrf.mxu1  ;;  %v4186_v22 = vunpack.c.h.bf16 %v701_v41 }
 0x16d   :  { %v1243_v42 = vadd.f32 %v1242_v0, %v1180_v21  ;;  %v1108_v14 = vadd.f32 %v1107_v4, %v4162_v38  ;;  %v703_v0 = vpack.c.bf16 %v4078_v31, %v4052_v24  ;;  %v650_v1 = vpop.f32.mrf.mxu1  ;;  %v1185_v54 = vmul.f32 %v4186_v22, %v4186_v22 }
 0x16f   :  { %v1109_v49 = vadd.f32 %v1108_v14, %v4172_v11  ;;  %v1244_v48 = vadd.f32 %v1243_v42, %v1181_v16  ;;  %v1184_v14 = vmul.f32 %v4179_v39, %v4179_v39  ;;  %v4196_v11 = vunpack.c.l.bf16 %v702_v47 }
 0x171   :  { %v1110_v21 = vadd.f32 %v1109_v49, %v4176_v62  ;;  %v1245_v4 = vadd.f32 %v1244_v48, %v1182_v27  ;;  %6725 = vst [vmem:[#allocation27_spill] sm:$0xff] %v4196_v11  ;;  %v4200_v49 = vunpack.c.h.bf16 %v702_v47  ;;  %v4203_v48 = vunpack.c.l.bf16 %v703_v0 }
 0x172   :  { %v1186_v31 = vmul.f32 %v4196_v11, %v4196_v11 }
 0x173   :  { %v1111_v16 = vadd.f32 %v1110_v21, %v4179_v39  ;;  %v1246_v42 = vadd.f32 %v1245_v4, %v1183_v13  ;;  %6726 = vst [vmem:[#allocation28_spill] sm:$0xff] %v4200_v49  ;;  %6727 = vst [vmem:[#allocation29_spill] sm:$0xff] %v4203_v48  ;;  %v704_v13 = vpack.c.bf16 %v634_v29, %v4120_v32  ;;  %v3180_v4 = vpop.f32.mrf.mxu1  ;;  %v4209_v39 = vunpack.c.h.bf16 %v703_v0 }
 0x174   :  { %v1187_v47 = vmul.f32 %v4200_v49, %v4200_v49 }
 0x175   :  { %v1247_v41 = vadd.f32 %v1246_v42, %v1184_v14  ;;  %v1112_v27 = vadd.f32 %v1111_v16, %v4186_v22  ;;  %6728 = vst [vmem:[#allocation30_spill] sm:$0xff] %v4209_v39  ;;  %v705_v16 = vpack.c.bf16 %v4134_v56, %v4106_v45  ;;  %v1188_v42 = vmul.f32 %v4203_v48, %v4203_v48  ;;  %v663_v32 = vpop.f32.mrf.mxu1 }
 0x176   :  { %v1189_v29 = vmul.f32 %v4209_v39, %v4209_v39 }
 0x177   :  { %v1113_v24 = vadd.f32 %v1112_v27, %v4196_v11  ;;  %v1248_v21 = vadd.f32 %v1247_v41, %v1185_v54  ;;  %v4219_v41 = vunpack.c.l.bf16 %v704_v13 }
 0x179   :  { %v1114_v62 = vadd.f32 %v1113_v24, %v4200_v49  ;;  %v1249_v14 = vadd.f32 %v1248_v21, %v1186_v31  ;;  %6729 = vst [vmem:[#allocation31_spill] sm:$0xff] %v4219_v41  ;;  %v4223_v24 = vunpack.c.h.bf16 %v704_v13  ;;  %v4226_v21 = vunpack.c.l.bf16 %v705_v16 }
 0x17a   :  { %v1190_v56 = vmul.f32 %v4219_v41, %v4219_v41 }
 0x17b   :  { %v1115_v27 = vadd.f32 %v1114_v62, %v4203_v48  ;;  %v1250_v54 = vadd.f32 %v1249_v14, %v1187_v47  ;;  %6730 = vst [vmem:[#allocation32_spill] sm:$0xff] %v4223_v24  ;;  %6731 = vst [vmem:[#allocation33_spill] sm:$0xff] %v4226_v21  ;;  %v706_v47 = vpack.c.bf16 %v650_v1, %v647_v59  ;;  %v3181_v14 = vpop.f32.mrf.mxu1  ;;  %v4231_v48 = vunpack.c.h.bf16 %v705_v16 }
 0x17c   :  { %v1191_v13 = vmul.f32 %v4223_v24, %v4223_v24 }
 0x17d   :  { %v1251_v0 = vadd.f32 %v1250_v54, %v1188_v42  ;;  %v1116_v31 = vadd.f32 %v1115_v27, %v4209_v39  ;;  %6732 = vst [vmem:[#allocation34_spill] sm:$0xff] %v4231_v48  ;;  %v707_v27 = vpack.c.bf16 %v3177_v46, %v4160_v55  ;;  %v1192_v54 = vmul.f32 %v4226_v21, %v4226_v21  ;;  %v666_v59 = vpop.f32.mrf.mxu1 }
 0x17e   :  { %v1193_v1 = vmul.f32 %v4231_v48, %v4231_v48 }
 0x17f   :  { %v1117_v45 = vadd.f32 %v1116_v31, %v4219_v41  ;;  %v1252_v62 = vadd.f32 %v1251_v0, %v1189_v29  ;;  %v4240_v41 = vunpack.c.l.bf16 %v706_v47  ;;  %v4244_v29 = vunpack.c.h.bf16 %v706_v47 }
 0x181   :  { %v1118_v49 = vadd.f32 %v1117_v45, %v4223_v24  ;;  %v1253_v42 = vadd.f32 %v1252_v62, %v1190_v56  ;;  %6733 = vst [vmem:[#allocation35_spill] sm:$0xff] %v4240_v41  ;;  %6734 = vst [vmem:[#allocation36_spill] sm:$0xff] %v4244_v29  ;;  %v4247_v45 = vunpack.c.l.bf16 %v707_v27  ;;  %v1194_v46 = vmul.f32 %v4240_v41, %v4240_v41 }
 0x182   :  { %v708_v56 = vpack.c.bf16 %v666_v59, %v663_v32  ;;  %v4252_v62 = vunpack.c.h.bf16 %v707_v27 }
 0x183   :  { %v1119_v31 = vadd.f32 %v1118_v49, %v4226_v21  ;;  %v1254_v39 = vadd.f32 %v1253_v42, %v1191_v13  ;;  %6735 = vst [vmem:[#allocation37_spill] sm:$0xff] %v4247_v45  ;;  %v1196_v42 = vmul.f32 %v4247_v45, %v4247_v45  ;;  %v1065_v21 = vld [vmem:[#allocation3] sm:$0x1] }
 0x184   :  { %6736 = vst [vmem:[#allocation38_spill] sm:$0xff] %v4252_v62  ;;  %v1197_v32 = vmul.f32 %v4252_v62, %v4252_v62  ;;  %v1062_v59 = vunpack.c.h.bf16 %v708_v56 }
 0x185   :  { %v1255_v16 = vadd.f32 %v1254_v39, %v1192_v54  ;;  %v1120_v0 = vadd.f32 %v1119_v31, %v4231_v48  ;;  %v1195_v39 = vmul.f32 %v4244_v29, %v4244_v29  ;;  %v4260_v48 = vunpack.c.l.bf16 %v708_v56 }
 0x187   :  { %v1121_v55 = vadd.f32 %v1120_v0, %v4240_v41  ;;  %v1256_v49 = vadd.f32 %v1255_v16, %v1193_v1  ;;  %v709_v0 = vpack.c.bf16 %v3181_v14, %v3180_v4  ;;  %v1199_v14 = vmul.f32 %v1062_v59, %v1062_v59 }
 0x189   :  { %v1122_v13 = vadd.f32 %v1121_v55, %v4244_v29  ;;  %v1257_v47 = vadd.f32 %v1256_v49, %v1194_v46  ;;  %v4265_v16 = vunpack.c.l.bf16 %v709_v0  ;;  %v1198_v46 = vmul.f32 %v4260_v48, %v4260_v48 }
 0x18b   :  { %v1123_v54 = vadd.f32 %v1122_v13, %v4247_v45  ;;  %v1258_v31 = vadd.f32 %v1257_v47, %v1195_v39  ;;  %6737 = vst [vmem:[#allocation39_spill] sm:$0xff] %v4265_v16  ;;  %v4270_v13 = vunpack.c.h.bf16 %v709_v0  ;;  %v1200_v47 = vmul.f32 %v4265_v16, %v4265_v16 }
 0x18d   :  { %v1259_v27 = vadd.f32 %v1258_v31, %v1196_v42  ;;  %v1124_v1 = vadd.f32 %v1123_v54, %v4252_v62  ;;  %v1201_v54 = vmul.f32 %v4270_v13, %v4270_v13 }
 0x18f   :  { %v1125_v55 = vadd.f32 %v1124_v1, %v4260_v48  ;;  %v1260_v49 = vadd.f32 %v1259_v27, %v1197_v32 }
 0x191   :  { %v1126_v4 = vadd.f32 %v1125_v55, %v1062_v59  ;;  %v1261_v39 = vadd.f32 %v1260_v49, %v1198_v46 }
 0x193   :  { %v1127_v56 = vadd.f32 %v1126_v4, %v4265_v16  ;;  %v1262_v42 = vadd.f32 %v1261_v39, %v1199_v14  ;;  %v1137_v14 = vld [vmem:[#allocation4] sm:$0x1] }
 0x195   :  { %v1128_v31 = vadd.f32 %v1127_v56, %v4270_v13  ;;  %v1263_v1 = vadd.f32 %v1262_v42, %v1200_v47 }
 0x197   :  { %v1129_v62 = vrot.slane %v1128_v31, 4  ;;  %v1264_v45 = vadd.f32 %v1263_v1, %v1201_v54 }
 0x199   :  { %v1130_v32 = vadd.f32 %v1129_v62, %v1128_v31  ;;  %v1265_v0 = vrot.slane %v1264_v45, 4 }
 0x19b   :  { %v1131_v27 = vrot.slane %v1130_v32, 2  ;;  %v1266_v55 = vadd.f32 %v1265_v0, %v1264_v45 }
 0x19d   :  { %v1132_v29 = vadd.f32 %v1131_v27, %v1130_v32  ;;  %v1267_v46 = vrot.slane %v1266_v55, 2  ;;  %v1422_v32 = vlaneseq }
 0x19f   :  { %v1133_v49 = vrot.slane %v1132_v29, 1  ;;  %v1268_v41 = vadd.f32 %v1267_v46, %v1266_v55  ;;  %v4286_v55 = vstv %s1290_s1  ;;  %v4288_v46 = vstv %s2327_s8 }
 0x1a0   :  { %6738 = vst [vmem:[#allocation40_spill] sm:$0xff] %v4286_v55  ;;  %6739 = vst [vmem:[#allocation41_spill] sm:$0xff] %v4288_v46 }
 0x1a1   :  { %v1134_v24 = vadd.f32 %v1133_v49, %v1132_v29  ;;  %v1269_v4 = vrot.slane %v1268_v41, 1  ;;  %v1423_v29 = vshrl.u32 %v1422_v32, 7  ;;  %v4290_v49 = vstv %s2328_s9 }
 0x1a2   :  { %6740 = vst [vmem:[#allocation42_spill] sm:$0xff] %v4290_v49 }
 0x1a3   :  { %v1135_v39 = vadd.f32 %v1134_v24, %v1065_v21  ;;  %v1270_v16 = vadd.f32 %v1269_v4, %v1268_v41  ;;  %v1283_v41 = vld [vmem:[%s6474_s2] sm:$0x1]  ;;  %v1424_v24 = vsub.s32 0, %v1423_v29  ;;  %s3845_s2 = smov [#allocation12]  }
 0x1a5   :  { %1136 = vst [vmem:[#allocation3] sm:$0x1] %v1135_v39  ;;  %v1271_v11 = vadd.f32 %v1270_v16, %v1137_v14  ;;  %v1287_v16 = vld [vmem:[%s6475_s3] sm:$0x1]  ;;  %s2209_s3 = sshll.u32 %s3845_s2, 4  ;;  %s2210_s3 = int_to_ptr.vmem [resolvable:$true] %s2209_s3 }
 0x1a6   :  { %s3811_s14 = scalar_lea.vmem %s2210_s3, 4096  ;;  %p3816_p2 = scmp.lt.s32.totalorder %s2210_s3, %s2210_s3 }
 0x1a7   :  { %1272 = vst [vmem:[#allocation4] sm:$0x1] %v1271_v11  ;;  %p3812_p1 = scmp.ne.s32.totalorder %s2210_s3, %s3811_s14  ;;  %p3817_p3 = scmp.lt.s32.totalorder %s3811_s14, %s3811_s14 }
 0x1a9   :  { %p3818_p4 = por %p3817_p3, %p3816_p2 }
 0x1ab   :  { %p3819_p5 = pnand %p3818_p4, %p3812_p1 }
 0x1ac   :  { %v1276_v47 = vld [vmem:[#allocation3] sm:$0x1] }
 0x1ad   :  { %v1277_v56 = vmul.f32 0.001953125, %v1276_v47 }
 0x1ae   :  { %v1278_v42 = vld [vmem:[#allocation4] sm:$0x1] }
 0x1af   :  { %v1279_v62 = vmul.f32 0.001953125, %v1278_v42  ;;  %v1280_v54 = vmul.f32 %v1277_v56, %v1277_v56 }
 0x1b1   :  { %v1281_v31 = vsub.f32 %v1279_v62, %v1280_v54 }
 0x1b3   :  { %v1282_v45 = vmax.f32 %v1281_v31, 0.0 }
 0x1b5   :  { %v1284_v1 = vadd.f32 1e-05, %v1282_v45 }
 0x1b7   :  { %3757 = vrsqrt.f32 %v1284_v1 }
 0x1c4   :  { %v3758_v11 = vpop.eup %3757 }
 0x1c5   :  { %v1286_v21 = vmul.f32 %v3758_v11, %v1283_v41  ;;  %v6742_v11 = vld [vmem:[#allocation18_spill] sm:$0xff] }
 0x1c7   :  { %v1288_v0 = vmul.f32 %v1286_v21, %v1277_v56  ;;  %v4284_v27 = vrot.slane %v1286_v21, %v1424_v24  ;;  %v6743_v21 = vld [vmem:[#allocation19_spill] sm:$0xff] }
 0x1c9   :  { %v1289_v4 = vsub.f32 %v1287_v16, %v1288_v0  ;;  %v1487_v14 = vmul.f32 %v4284_v27, %v4260_v48  ;;  %v1488_v39 = vmul.f32 %v4284_v27, %v1062_v59  ;;  %v4297_v47 = vmul.f32 %v4284_v27, %v3899_v52 }
 0x1ca   :  { %v4301_v56 = vmul.f32 %v4284_v27, %v3901_v53  ;;  %v4305_v42 = vmul.f32 %v4284_v27, %v3897_v51  ;;  %v4309_v62 = vmul.f32 %v4284_v27, %v3911_v60  ;;  %v4313_v48 = vmul.f32 %v4284_v27, %v3920_v7 }
 0x1cb   :  { %v4315_v59 = vrot.slane %v1289_v4, %v1424_v24  ;;  %v4319_v52 = vmul.f32 %v4284_v27, %v3922_v8  ;;  %v4323_v53 = vmul.f32 %v4284_v27, %v3927_v12  ;;  %v4327_v51 = vmul.f32 %v4284_v27, %v3932_v17  ;;  %v6741_v24 = vld [vmem:[#allocation17_spill] sm:$0xff] }
 0x1cc   :  { %v4331_v60 = vmul.f32 %v4284_v27, %v3947_v33  ;;  %v4335_v7 = vmul.f32 %v4284_v27, %v3949_v34  ;;  %v4339_v8 = vmul.f32 %v4284_v27, %v3951_v37  ;;  %v4343_v12 = vmul.f32 %v4284_v27, %v3958_v44 }
 0x1cd   :  { %v1557_v54 = vadd.f32 %v4315_v59, %v1487_v14  ;;  %v1558_v17 = vadd.f32 %v4315_v59, %v1488_v39  ;;  %v4349_v33 = vmul.f32 %v4284_v27, %v3966_v61  ;;  %v4353_v34 = vmul.f32 %v4284_v27, %v3972_v2 }
 0x1ce   :  { %v4357_v37 = vmul.f32 %v4284_v27, %v3977_v6  ;;  %v4361_v44 = vmul.f32 %v4284_v27, %v3982_v15  ;;  %v4365_v31 = vmul.f32 %v4284_v27, %v3990_v28  ;;  %v4369_v61 = vmul.f32 %v4284_v27, %v3996_v35 }
 0x1cf   :  { %v1621_v45 = vmax.f32 %v1557_v54, 0.0  ;;  %v1622_v1 = vmax.f32 %v1558_v17, 0.0  ;;  %v4373_v2 = vmul.f32 %v4284_v27, %v4001_v40  ;;  %v4377_v6 = vmul.f32 %v4284_v27, %v4006_v50 }
 0x1d0   :  { %v4381_v15 = vmul.f32 %v4284_v27, %v4014_v9  ;;  %v4385_v28 = vmul.f32 %v4284_v27, %v4020_v18  ;;  %v4389_v35 = vmul.f32 %v4284_v27, %v4025_v23  ;;  %v4393_v40 = vmul.f32 %v4284_v27, %v4030_v30 }
 0x1d1   :  { %v1686_v32 = vmin.f32 %v1621_v45, %v4286_v55  ;;  %v1687_v50 = vmin.f32 %v1622_v1, %v4286_v55  ;;  %v4399_v9 = vmul.f32 %v4284_v27, %v4038_v58  ;;  %v4403_v18 = vmul.f32 %v4284_v27, %v4044_v3  ;;  %v6744_v45 = vld [vmem:[#allocation20_spill] sm:$0xff] }
 0x1d2   :  { %v4407_v23 = vmul.f32 %v4284_v27, %v4049_v19  ;;  %v4411_v30 = vmul.f32 %v4284_v27, %v4054_v25  ;;  %v4415_v29 = vmul.f32 %v4284_v27, %v4062_v63  ;;  %v4419_v58 = vmul.f32 %v4284_v27, %v4068_v5 }
 0x1d3   :  { %v1751_v41 = vmul.f32 %v4288_v46, %v1686_v32  ;;  %v1752_v3 = vmul.f32 %v4288_v46, %v1687_v50  ;;  %v4425_v19 = vmul.f32 %v4284_v27, %v6741_v24  ;;  %v4429_v25 = vmul.f32 %v4284_v27, %v4080_v36  ;;  %v6749_v24 = vld [vmem:[#allocation21_spill] sm:$0xff]  ;;  %v6753_v46 = vld [vmem:[#allocation23_spill] sm:$0xff] }
 0x1d4   :  { %v4433_v63 = vmul.f32 %v4284_v27, %v6742_v11  ;;  %v4437_v5 = vmul.f32 %v4284_v27, %v4096_v26  ;;  %v4441_v16 = vmul.f32 %v4284_v27, %v6743_v21  ;;  %v4445_v0 = vmul.f32 %v4284_v27, %v4108_v20 }
 0x1d5   :  { %v3678_v4 = vand.u32 2147483647, %v1751_v41  ;;  %v3680_v14 = vcvt.f32.s32 %v1751_v41  ;;  %v3683_v36 = vand.u32 2147483648, %v1751_v41  ;;  %v3686_v39 = vand.u32 2147483647, %v1752_v3 }
 0x1d6   :  { %v3688_v54 = vcvt.f32.s32 %v1752_v3  ;;  %v3691_v17 = vand.u32 2147483648, %v1752_v3  ;;  %v4449_v1 = vmul.f32 %v4284_v27, %v6744_v45  ;;  %v4453_v26 = vmul.f32 %v4284_v27, %v4124_v43  ;;  %v6751_v43 = vld [vmem:[#allocation22_spill] sm:$0xff] }
 0x1d7   :  { %vm4455_vm0 = vcmp.lt.f32.partialorder %v3678_v4, 8388608.0  ;;  %v3681_v20 = vcvt.s32.f32 %v3680_v14  ;;  %vm4459_vm1 = vcmp.lt.f32.partialorder %v3686_v39, 8388608.0  ;;  %v4465_v11 = vmul.f32 %v4284_v27, %v6749_v24  ;;  %v6756_v24 = vld [vmem:[#allocation24_spill] sm:$0xff] }
 0x1d8   :  { %v3689_v21 = vcvt.s32.f32 %v3688_v54  ;;  %v4469_v45 = vmul.f32 %v4284_v27, %v4136_v57  ;;  %v4473_v4 = vmul.f32 %v4284_v27, %v6751_v43  ;;  %v4477_v14 = vmul.f32 %v4284_v27, %v4150_v10  ;;  %v6758_v43 = vld [vmem:[#allocation25_spill] sm:$0xff]  ;;  %v6760_v10 = vld [vmem:[#allocation26_spill] sm:$0xff] }
 0x1d9   :  { %v3682_v39 = vand.u32 2147483647, %v3681_v20  ;;  %v4481_v55 = vmul.f32 %v4284_v27, %v6753_v46  ;;  %v4485_v54 = vmul.f32 %v4284_v27, %v4162_v38  ;;  %v4489_v57 = vmul.f32 %v4284_v27, %v6756_v24  ;;  %v6762_v38 = vld [vmem:[#allocation27_spill] sm:$0xff]  ;;  %v6763_v24 = vld [vmem:[#allocation28_spill] sm:$0xff] }
 0x1da   :  { %6750 = vst [vmem:[#allocation17_spill] sm:$0xff] %v4469_v45  ;;  %6752 = vst [vmem:[#allocation18_spill] sm:$0xff] %v4473_v4  ;;  %v3690_v45 = vand.u32 2147483647, %v3689_v21  ;;  %v4493_v4 = vmul.f32 %v4284_v27, %v6758_v43  ;;  %v4497_v20 = vmul.f32 %v4284_v27, %v6760_v10  ;;  %v4501_v46 = vmul.f32 %v4284_v27, %v4186_v22  ;;  %v6766_v10 = vld [vmem:[#allocation30_spill] sm:$0xff]  ;;  %v6768_v22 = vld [vmem:[#allocation31_spill] sm:$0xff] }
 0x1db   :  { %6754 = vst [vmem:[#allocation19_spill] sm:$0xff] %v4481_v55  ;;  %6755 = vst [vmem:[#allocation20_spill] sm:$0xff] %v4485_v54  ;;  %v3684_v55 = vor.u32 %v3683_v36, %v3682_v39  ;;  %v4505_v54 = vmul.f32 %v4284_v27, %v6762_v38  ;;  %v4509_v21 = vmul.f32 %v4284_v27, %v6763_v24  ;;  %v6769_v39 = vld [vmem:[#allocation32_spill] sm:$0xff] }
 0x1dc   :  { %6757 = vst [vmem:[#allocation21_spill] sm:$0xff] %v4489_v57  ;;  %6759 = vst [vmem:[#allocation22_spill] sm:$0xff] %v4493_v4  ;;  %v6765_v57 = vld [vmem:[#allocation29_spill] sm:$0xff]  ;;  %v3692_v4 = vor.u32 %v3691_v17, %v3690_v45  ;;  %v4521_v36 = vmul.f32 %v4284_v27, %v6768_v22  ;;  %v4525_v38 = vmul.f32 %v4284_v27, %v6769_v39  ;;  %v6772_v17 = vld [vmem:[#allocation34_spill] sm:$0xff] }
 0x1dd   :  { %6761 = vst [vmem:[#allocation23_spill] sm:$0xff] %v4497_v20  ;;  %6764 = vst [vmem:[#allocation24_spill] sm:$0xff] %v4509_v21  ;;  %v4513_v43 = vmul.f32 %v4284_v27, %v6765_v57  ;;  %v4517_v20 = vmul.f32 %v4284_v27, %v6766_v10  ;;  %v3685_v24 = vsel %vm4455_vm0, %v3684_v55, %v1751_v41  ;;  %v6771_v21 = vld [vmem:[#allocation33_spill] sm:$0xff]  ;;  %v6774_v10 = vld [vmem:[#allocation35_spill] sm:$0xff] }
 0x1de   :  { %6770 = vst [vmem:[#allocation26_spill] sm:$0xff] %v4525_v38  ;;  %v4531_v57 = vmul.f32 %v4284_v27, %v6771_v21  ;;  %v4535_v45 = vmul.f32 %v4284_v27, %v6772_v17  ;;  %v3693_v22 = vsel %vm4459_vm1, %v3692_v4, %v1752_v3  ;;  %v1880_v39 = vmul.f32 %v3685_v24, %v4290_v49  ;;  %v6775_v38 = vld [vmem:[#allocation36_spill] sm:$0xff]  ;;  %v6776_v41 = vld [vmem:[#allocation37_spill] sm:$0xff]  ;;  %v6777_v17 = vld [vmem:[#allocation38_spill] sm:$0xff] }
 0x1df   :  { %6767 = vst [vmem:[#allocation25_spill] sm:$0xff] %v4517_v20  ;;  %v4539_v20 = vmul.f32 %v4284_v27, %v6774_v10  ;;  %v4546_v55 = vmul.f32 %v4284_v27, %v6775_v38  ;;  %v4550_v32 = vmul.f32 %v4284_v27, %v6776_v41  ;;  %v1881_v21 = vmul.f32 %v3693_v22, %v4290_v49  ;;  %v6778_v10 = vld [vmem:[#allocation39_spill] sm:$0xff] }
 0x1e0   :  { %6773 = vst [vmem:[#allocation27_spill] sm:$0xff] %v4535_v45  ;;  %v4555_v45 = vmul.f32 %v4284_v27, %v6777_v17  ;;  %v4559_v50 = vmul.f32 %v4284_v27, %v6778_v10  ;;  %v4563_v3 = vmul.f32 %v4284_v27, %v4270_v13  ;;  %v4567_v4 = vadd.f32 %v4315_v59, %v4297_v47 }
 0x1e1   :  { %v4571_v38 = vadd.f32 %v4315_v59, %v4301_v56  ;;  %v4575_v24 = vadd.f32 %v4315_v59, %v4305_v42  ;;  %v4579_v22 = vadd.f32 %v4315_v59, %v4309_v62  ;;  %v2962_v41 = vpack.c.bf16 %v1881_v21, %v1880_v39  ;;  %v6780_v39 = vld [vmem:[#allocation18_spill] sm:$0xff] }
 0x1e2   :  { %v4583_v13 = vadd.f32 %v4315_v59, %v4313_v48  ;;  %v4587_v27 = vadd.f32 %v4315_v59, %v4319_v52  ;;  %v4591_v47 = vadd.f32 %v4315_v59, %v4323_v53  ;;  %v4595_v56 = vadd.f32 %v4315_v59, %v4327_v51  ;;  %v6781_v21 = vld [vmem:[#allocation19_spill] sm:$0xff]  ;;  %v6782_v17 = vld [vmem:[#allocation20_spill] sm:$0xff] }
 0x1e3   :  { %v4599_v42 = vadd.f32 %v4315_v59, %v4331_v60  ;;  %v4603_v62 = vadd.f32 %v4315_v59, %v4335_v7  ;;  %v4607_v48 = vadd.f32 %v4315_v59, %v4339_v8  ;;  %3060 = vst [vmem:[#allocation12 + $0xf0] sm:$0xff] %v2962_v41   ;;  %v4611_v52 = vadd.f32 %v4315_v59, %v4343_v12  ;;  %v6784_v10 = vld [vmem:[#allocation21_spill] sm:$0xff] }
 0x1e4   :  { %v4615_v53 = vadd.f32 %v4315_v59, %v4349_v33  ;;  %v4619_v51 = vadd.f32 %v4315_v59, %v4353_v34  ;;  %v4623_v60 = vadd.f32 %v4315_v59, %v4357_v37  ;;  %v4627_v7 = vadd.f32 %v4315_v59, %v4361_v44  ;;  %v6787_v49 = vld [vmem:[#allocation23_spill] sm:$0xff] }
 0x1e5   :  { %v4631_v8 = vadd.f32 %v4315_v59, %v4365_v31  ;;  %v4635_v12 = vadd.f32 %v4315_v59, %v4369_v61  ;;  %v4639_v33 = vadd.f32 %v4315_v59, %v4373_v2  ;;  %v4643_v34 = vadd.f32 %v4315_v59, %v4377_v6 }
 0x1e6   :  { %v4647_v37 = vadd.f32 %v4315_v59, %v4381_v15  ;;  %v4651_v44 = vadd.f32 %v4315_v59, %v4385_v28  ;;  %v4655_v31 = vadd.f32 %v4315_v59, %v4389_v35  ;;  %v4659_v61 = vadd.f32 %v4315_v59, %v4393_v40 }
 0x1e7   :  { %v4663_v2 = vadd.f32 %v4315_v59, %v4399_v9  ;;  %v4667_v6 = vadd.f32 %v4315_v59, %v4403_v18  ;;  %v4671_v15 = vadd.f32 %v4315_v59, %v4407_v23  ;;  %v4675_v28 = vadd.f32 %v4315_v59, %v4411_v30 }
 0x1e8   :  { %v4679_v35 = vadd.f32 %v4315_v59, %v4415_v29  ;;  %v4683_v40 = vadd.f32 %v4315_v59, %v4419_v58  ;;  %v4687_v9 = vadd.f32 %v4315_v59, %v4425_v19  ;;  %v4691_v18 = vadd.f32 %v4315_v59, %v4429_v25 }
 0x1e9   :  { %v4695_v23 = vadd.f32 %v4315_v59, %v4433_v63  ;;  %v4699_v30 = vadd.f32 %v4315_v59, %v4437_v5  ;;  %v4703_v29 = vadd.f32 %v4315_v59, %v4441_v16  ;;  %v4707_v58 = vadd.f32 %v4315_v59, %v4445_v0  ;;  %v6779_v5 = vld [vmem:[#allocation17_spill] sm:$0xff] }
 0x1ea   :  { %v4711_v19 = vadd.f32 %v4315_v59, %v4449_v1  ;;  %v4715_v25 = vadd.f32 %v4315_v59, %v4453_v26  ;;  %v4719_v63 = vadd.f32 %v4315_v59, %v4465_v11  ;;  %v4723_v16 = vadd.f32 %v4315_v59, %v6779_v5  ;;  %v6785_v5 = vld [vmem:[#allocation22_spill] sm:$0xff] }
 0x1eb   :  { %v4727_v0 = vadd.f32 %v4315_v59, %v6780_v39  ;;  %v4731_v1 = vadd.f32 %v4315_v59, %v4477_v14  ;;  %v4735_v26 = vadd.f32 %v4315_v59, %v6781_v21  ;;  %v4739_v11 = vadd.f32 %v4315_v59, %v6782_v17 }
 0x1ec   :  { %v4743_v41 = vadd.f32 %v4315_v59, %v6784_v10  ;;  %v4747_v39 = vadd.f32 %v4315_v59, %v6785_v5  ;;  %v4751_v14 = vadd.f32 %v4315_v59, %v6787_v49  ;;  %v4755_v21 = vadd.f32 %v4315_v59, %v4501_v46 }
 0x1ed   :  { %6783 = vst [vmem:[#allocation28_spill] sm:$0xff] %v4739_v11  ;;  %v4759_v17 = vadd.f32 %v4315_v59, %v4505_v54  ;;  %v6789_v11 = vld [vmem:[#allocation24_spill] sm:$0xff]  ;;  %v4767_v5 = vadd.f32 %v4315_v59, %v4513_v43  ;;  %v4775_v46 = vadd.f32 %v4315_v59, %v4521_v36  ;;  %v4795_v36 = vadd.f32 %v4315_v59, %v4546_v55 }
 0x1ee   :  { %6786 = vst [vmem:[#allocation29_spill] sm:$0xff] %v4747_v39  ;;  %6788 = vst [vmem:[#allocation30_spill] sm:$0xff] %v4755_v21  ;;  %v4763_v10 = vadd.f32 %v4315_v59, %v6789_v11  ;;  %v6791_v39 = vld [vmem:[#allocation25_spill] sm:$0xff]  ;;  %v6792_v21 = vld [vmem:[#allocation26_spill] sm:$0xff]  ;;  %v4783_v11 = vadd.f32 %v4315_v59, %v4531_v57  ;;  %v4803_v57 = vadd.f32 %v4315_v59, %v4555_v45  ;;  %v1562_v55 = vmax.f32 %v4571_v38, 0.0 }
 0x1ef   :  { %v4771_v49 = vadd.f32 %v4315_v59, %v6791_v39  ;;  %v4779_v54 = vadd.f32 %v4315_v59, %v6792_v21  ;;  %v4791_v39 = vadd.f32 %v4315_v59, %v4539_v20  ;;  %6797 = vst [vmem:[#allocation35_spill] sm:$0xff] %v4795_v36  ;;  %v4799_v21 = vadd.f32 %v4315_v59, %v4550_v32 }
 0x1f0   :  { %6790 = vst [vmem:[#allocation31_spill] sm:$0xff] %v4763_v10  ;;  %6793 = vst [vmem:[#allocation32_spill] sm:$0xff] %v4783_v11  ;;  %v6794_v10 = vld [vmem:[#allocation27_spill] sm:$0xff]  ;;  %v4811_v20 = vadd.f32 %v4315_v59, %v4563_v3  ;;  %v1563_v36 = vmax.f32 %v4575_v24, 0.0  ;;  %v1564_v32 = vmax.f32 %v4579_v22, 0.0  ;;  %v1566_v45 = vmax.f32 %v4587_v27, 0.0 }
 0x1f1   :  { %v4787_v43 = vadd.f32 %v4315_v59, %v6794_v10  ;;  %6796 = vst [vmem:[#allocation34_spill] sm:$0xff] %v4791_v39  ;;  %6798 = vst [vmem:[#allocation36_spill] sm:$0xff] %v4799_v21  ;;  %v4807_v10 = vadd.f32 %v4315_v59, %v4559_v50  ;;  %v1561_v39 = vmax.f32 %v4567_v4, 0.0  ;;  %v1565_v21 = vmax.f32 %v4583_v13, 0.0 }
 0x1f2   :  { %6799 = vst [vmem:[#allocation37_spill] sm:$0xff] %v4803_v57  ;;  %6801 = vst [vmem:[#allocation39_spill] sm:$0xff] %v4811_v20  ;;  %v1567_v57 = vmax.f32 %v4591_v47, 0.0  ;;  %v1568_v50 = vmax.f32 %v4595_v56, 0.0  ;;  %v1570_v59 = vmax.f32 %v4603_v62, 0.0  ;;  %v1571_v3 = vmax.f32 %v4607_v48, 0.0 }
 0x1f3   :  { %6795 = vst [vmem:[#allocation33_spill] sm:$0xff] %v4787_v43  ;;  %6800 = vst [vmem:[#allocation38_spill] sm:$0xff] %v4807_v10  ;;  %v1569_v10 = vmax.f32 %v4599_v42, 0.0  ;;  %v1572_v4 = vmax.f32 %v4611_v52, 0.0  ;;  %v1573_v38 = vmax.f32 %v4615_v53, 0.0  ;;  %v1574_v24 = vmax.f32 %v4619_v51, 0.0 }
 0x1f4   :  { %v1575_v22 = vmax.f32 %v4623_v60, 0.0  ;;  %v1576_v13 = vmax.f32 %v4627_v7, 0.0  ;;  %v1577_v27 = vmax.f32 %v4631_v8, 0.0  ;;  %v1578_v47 = vmax.f32 %v4635_v12, 0.0 }
 0x1f5   :  { %v1579_v56 = vmax.f32 %v4639_v33, 0.0  ;;  %v1580_v42 = vmax.f32 %v4643_v34, 0.0  ;;  %v1581_v62 = vmax.f32 %v4647_v37, 0.0  ;;  %v1582_v48 = vmax.f32 %v4651_v44, 0.0  ;;  %v6803_v20 = vld [vmem:[#allocation29_spill] sm:$0xff]  ;;  %v6804_v43 = vld [vmem:[#allocation30_spill] sm:$0xff] }
 0x1f6   :  { %v1583_v52 = vmax.f32 %v4655_v31, 0.0  ;;  %v1584_v53 = vmax.f32 %v4659_v61, 0.0  ;;  %v1585_v51 = vmax.f32 %v4663_v2, 0.0  ;;  %v1586_v60 = vmax.f32 %v4667_v6, 0.0 }
 0x1f7   :  { %v1587_v7 = vmax.f32 %v4671_v15, 0.0  ;;  %v1588_v8 = vmax.f32 %v4675_v28, 0.0  ;;  %v1589_v12 = vmax.f32 %v4679_v35, 0.0  ;;  %v1590_v33 = vmax.f32 %v4683_v40, 0.0  ;;  %v6805_v11 = vld [vmem:[#allocation31_spill] sm:$0xff] }
 0x1f8   :  { %v1591_v34 = vmax.f32 %v4687_v9, 0.0  ;;  %v1592_v37 = vmax.f32 %v4691_v18, 0.0  ;;  %v1593_v44 = vmax.f32 %v4695_v23, 0.0  ;;  %v1594_v31 = vmax.f32 %v4699_v30, 0.0  ;;  %v6802_v23 = vld [vmem:[#allocation28_spill] sm:$0xff] }
 0x1f9   :  { %v1595_v61 = vmax.f32 %v4703_v29, 0.0  ;;  %v1596_v2 = vmax.f32 %v4707_v58, 0.0  ;;  %v1597_v6 = vmax.f32 %v4711_v19, 0.0  ;;  %v1598_v15 = vmax.f32 %v4715_v25, 0.0 }
 0x1fa   :  { %v1599_v28 = vmax.f32 %v4719_v63, 0.0  ;;  %v1600_v35 = vmax.f32 %v4723_v16, 0.0  ;;  %v1601_v40 = vmax.f32 %v4727_v0, 0.0  ;;  %v1602_v9 = vmax.f32 %v4731_v1, 0.0 }
 0x1fb   :  { %v1603_v18 = vmax.f32 %v4735_v26, 0.0  ;;  %v1604_v30 = vmax.f32 %v6802_v23, 0.0  ;;  %v1605_v29 = vmax.f32 %v4743_v41, 0.0  ;;  %v1606_v58 = vmax.f32 %v6803_v20, 0.0  ;;  %v6806_v41 = vld [vmem:[#allocation32_spill] sm:$0xff] }
 0x1fc   :  { %v1607_v19 = vmax.f32 %v4751_v14, 0.0  ;;  %v1608_v25 = vmax.f32 %v6804_v43, 0.0  ;;  %v1609_v63 = vmax.f32 %v4759_v17, 0.0  ;;  %v1610_v16 = vmax.f32 %v6805_v11, 0.0  ;;  %v6807_v14 = vld [vmem:[#allocation33_spill] sm:$0xff]  ;;  %v6808_v17 = vld [vmem:[#allocation34_spill] sm:$0xff] }
 0x1fd   :  { %v1611_v0 = vmax.f32 %v4767_v5, 0.0  ;;  %v1612_v1 = vmax.f32 %v4771_v49, 0.0  ;;  %v1613_v26 = vmax.f32 %v4775_v46, 0.0  ;;  %v1614_v23 = vmax.f32 %v4779_v54, 0.0  ;;  %v6809_v5 = vld [vmem:[#allocation35_spill] sm:$0xff]  ;;  %v6810_v46 = vld [vmem:[#allocation36_spill] sm:$0xff] }
 0x1fe   :  { %v1615_v20 = vmax.f32 %v6806_v41, 0.0  ;;  %v1616_v43 = vmax.f32 %v6807_v14, 0.0  ;;  %v1617_v11 = vmax.f32 %v6808_v17, 0.0  ;;  %v1618_v49 = vmax.f32 %v6809_v5, 0.0  ;;  %v6811_v41 = vld [vmem:[#allocation37_spill] sm:$0xff]  ;;  %v6812_v17 = vld [vmem:[#allocation38_spill] sm:$0xff] }
 0x1ff   :  { %v1619_v54 = vmax.f32 %v6810_v46, 0.0  ;;  %v1620_v14 = vmax.f32 %v6811_v41, 0.0  ;;  %v1623_v5 = vmax.f32 %v6812_v17, 0.0  ;;  %v6813_v46 = vld [vmem:[#allocation39_spill] sm:$0xff]  ;;  %v6814_v17 = vld [vmem:[#allocation40_spill] sm:$0xff] }
 0x200   :  { %v1624_v41 = vmax.f32 %v6813_v46, 0.0  ;;  %v1626_v46 = vmin.f32 %v1561_v39, %v6814_v17  ;;  %v1627_v39 = vmin.f32 %v1562_v55, %v6814_v17  ;;  %v1628_v55 = vmin.f32 %v1563_v36, %v6814_v17 }
 0x201   :  { %v1629_v36 = vmin.f32 %v1564_v32, %v6814_v17  ;;  %v1630_v32 = vmin.f32 %v1565_v21, %v6814_v17  ;;  %v1631_v21 = vmin.f32 %v1566_v45, %v6814_v17  ;;  %v1632_v45 = vmin.f32 %v1567_v57, %v6814_v17 }
 0x202   :  { %v1633_v57 = vmin.f32 %v1568_v50, %v6814_v17  ;;  %v1634_v50 = vmin.f32 %v1569_v10, %v6814_v17  ;;  %v1635_v10 = vmin.f32 %v1570_v59, %v6814_v17  ;;  %v1636_v59 = vmin.f32 %v1571_v3, %v6814_v17 }
 0x203   :  { %v1637_v3 = vmin.f32 %v1572_v4, %v6814_v17  ;;  %v1638_v4 = vmin.f32 %v1573_v38, %v6814_v17  ;;  %v1639_v38 = vmin.f32 %v1574_v24, %v6814_v17  ;;  %v1640_v24 = vmin.f32 %v1575_v22, %v6814_v17 }
 0x204   :  { %v1641_v22 = vmin.f32 %v1576_v13, %v6814_v17  ;;  %v1642_v13 = vmin.f32 %v1577_v27, %v6814_v17  ;;  %v1643_v27 = vmin.f32 %v1578_v47, %v6814_v17  ;;  %v1644_v47 = vmin.f32 %v1579_v56, %v6814_v17 }
 0x205   :  { %v1645_v56 = vmin.f32 %v1580_v42, %v6814_v17  ;;  %v1646_v42 = vmin.f32 %v1581_v62, %v6814_v17  ;;  %v1647_v62 = vmin.f32 %v1582_v48, %v6814_v17  ;;  %v1648_v48 = vmin.f32 %v1583_v52, %v6814_v17 }
 0x206   :  { %v1649_v52 = vmin.f32 %v1584_v53, %v6814_v17  ;;  %v1650_v53 = vmin.f32 %v1585_v51, %v6814_v17  ;;  %v1651_v51 = vmin.f32 %v1586_v60, %v6814_v17  ;;  %v1652_v60 = vmin.f32 %v1587_v7, %v6814_v17 }
 0x207   :  { %v1653_v7 = vmin.f32 %v1588_v8, %v6814_v17  ;;  %v1654_v8 = vmin.f32 %v1589_v12, %v6814_v17  ;;  %v1655_v12 = vmin.f32 %v1590_v33, %v6814_v17  ;;  %v1656_v33 = vmin.f32 %v1591_v34, %v6814_v17 }
 0x208   :  { %v1657_v34 = vmin.f32 %v1592_v37, %v6814_v17  ;;  %v1658_v37 = vmin.f32 %v1593_v44, %v6814_v17  ;;  %v1659_v44 = vmin.f32 %v1594_v31, %v6814_v17  ;;  %v1660_v31 = vmin.f32 %v1595_v61, %v6814_v17 }
 0x209   :  { %v1661_v61 = vmin.f32 %v1596_v2, %v6814_v17  ;;  %v1662_v2 = vmin.f32 %v1597_v6, %v6814_v17  ;;  %v1663_v6 = vmin.f32 %v1598_v15, %v6814_v17  ;;  %v1664_v15 = vmin.f32 %v1599_v28, %v6814_v17 }
 0x20a   :  { %v1665_v28 = vmin.f32 %v1600_v35, %v6814_v17  ;;  %v1666_v35 = vmin.f32 %v1601_v40, %v6814_v17  ;;  %v1667_v40 = vmin.f32 %v1602_v9, %v6814_v17  ;;  %v1668_v9 = vmin.f32 %v1603_v18, %v6814_v17 }
 0x20b   :  { %v1669_v18 = vmin.f32 %v1604_v30, %v6814_v17  ;;  %v1670_v30 = vmin.f32 %v1605_v29, %v6814_v17  ;;  %v1671_v29 = vmin.f32 %v1606_v58, %v6814_v17  ;;  %v1672_v58 = vmin.f32 %v1607_v19, %v6814_v17 }
 0x20c   :  { %v1673_v19 = vmin.f32 %v1608_v25, %v6814_v17  ;;  %v1674_v25 = vmin.f32 %v1609_v63, %v6814_v17  ;;  %v1675_v63 = vmin.f32 %v1610_v16, %v6814_v17  ;;  %v1676_v16 = vmin.f32 %v1611_v0, %v6814_v17 }
 0x20d   :  { %v1677_v0 = vmin.f32 %v1612_v1, %v6814_v17  ;;  %v1678_v1 = vmin.f32 %v1613_v26, %v6814_v17  ;;  %v1679_v26 = vmin.f32 %v1614_v23, %v6814_v17  ;;  %v1680_v23 = vmin.f32 %v1615_v20, %v6814_v17 }
 0x20e   :  { %v1681_v20 = vmin.f32 %v1616_v43, %v6814_v17  ;;  %v1682_v43 = vmin.f32 %v1617_v11, %v6814_v17  ;;  %v1683_v11 = vmin.f32 %v1618_v49, %v6814_v17  ;;  %v1684_v49 = vmin.f32 %v1619_v54, %v6814_v17 }
 0x20f   :  { %v1685_v54 = vmin.f32 %v1620_v14, %v6814_v17  ;;  %v1688_v14 = vmin.f32 %v1623_v5, %v6814_v17  ;;  %v1689_v5 = vmin.f32 %v1624_v41, %v6814_v17  ;;  %v6815_v17 = vld [vmem:[#allocation41_spill] sm:$0xff] }
 0x210   :  { %v4938_v41 = vmul.f32 %v6815_v17, %v1626_v46  ;;  %v4941_v46 = vmul.f32 %v6815_v17, %v1627_v39  ;;  %v4947_v39 = vmul.f32 %v6815_v17, %v1629_v36  ;;  %v4959_v36 = vmul.f32 %v6815_v17, %v1633_v57 }
 0x211   :  { %v4980_v57 = vmul.f32 %v6815_v17, %v1640_v24  ;;  %v5001_v24 = vmul.f32 %v6815_v17, %v1647_v62  ;;  %v5022_v62 = vmul.f32 %v6815_v17, %v1654_v8  ;;  %v5043_v8 = vmul.f32 %v6815_v17, %v1661_v61 }
 0x212   :  { %6816 = vst [vmem:[#allocation17_spill] sm:$0xff] %v4938_v41  ;;  %6817 = vst [vmem:[#allocation18_spill] sm:$0xff] %v4941_v46  ;;  %v4944_v41 = vmul.f32 %v6815_v17, %v1628_v55  ;;  %v4950_v46 = vmul.f32 %v6815_v17, %v1630_v32  ;;  %v4953_v55 = vmul.f32 %v6815_v17, %v1631_v21 }
 0x213   :  { %6819 = vst [vmem:[#allocation20_spill] sm:$0xff] %v4947_v39  ;;  %6823 = vst [vmem:[#allocation24_spill] sm:$0xff] %v4959_v36  ;;  %v4962_v39 = vmul.f32 %v6815_v17, %v1634_v50  ;;  %v4965_v32 = vmul.f32 %v6815_v17, %v1635_v10  ;;  %v4971_v21 = vmul.f32 %v6815_v17, %v1637_v3 }
 0x214   :  { %6818 = vst [vmem:[#allocation19_spill] sm:$0xff] %v4944_v41  ;;  %6820 = vst [vmem:[#allocation21_spill] sm:$0xff] %v4950_v46  ;;  %v4956_v41 = vmul.f32 %v6815_v17, %v1632_v45  ;;  %v4968_v46 = vmul.f32 %v6815_v17, %v1636_v59  ;;  %v4977_v45 = vmul.f32 %v6815_v17, %v1639_v38 }
 0x215   :  { %6821 = vst [vmem:[#allocation22_spill] sm:$0xff] %v4953_v55  ;;  %6824 = vst [vmem:[#allocation25_spill] sm:$0xff] %v4962_v39  ;;  %v4974_v55 = vmul.f32 %v6815_v17, %v1638_v4  ;;  %v4983_v50 = vmul.f32 %v6815_v17, %v1641_v22  ;;  %v4986_v10 = vmul.f32 %v6815_v17, %v1642_v13 }
 0x216   :  { %6822 = vst [vmem:[#allocation23_spill] sm:$0xff] %v4956_v41  ;;  %6825 = vst [vmem:[#allocation26_spill] sm:$0xff] %v4965_v32  ;;  %v4989_v59 = vmul.f32 %v6815_v17, %v1643_v27  ;;  %v4992_v3 = vmul.f32 %v6815_v17, %v1644_v47  ;;  %v4995_v4 = vmul.f32 %v6815_v17, %v1645_v56 }
 0x217   :  { %6826 = vst [vmem:[#allocation27_spill] sm:$0xff] %v4971_v21  ;;  %6827 = vst [vmem:[#allocation28_spill] sm:$0xff] %v4974_v55  ;;  %v4998_v38 = vmul.f32 %v6815_v17, %v1646_v42  ;;  %v5004_v22 = vmul.f32 %v6815_v17, %v1648_v48  ;;  %v5007_v13 = vmul.f32 %v6815_v17, %v1649_v52 }
 0x218   :  { %6828 = vst [vmem:[#allocation29_spill] sm:$0xff] %v4977_v45  ;;  %6829 = vst [vmem:[#allocation30_spill] sm:$0xff] %v4980_v57  ;;  %v5010_v27 = vmul.f32 %v6815_v17, %v1650_v53  ;;  %v5013_v47 = vmul.f32 %v6815_v17, %v1651_v51  ;;  %v5016_v56 = vmul.f32 %v6815_v17, %v1652_v60 }
 0x219   :  { %6830 = vst [vmem:[#allocation31_spill] sm:$0xff] %v4986_v10  ;;  %6831 = vst [vmem:[#allocation32_spill] sm:$0xff] %v4989_v59  ;;  %v5019_v42 = vmul.f32 %v6815_v17, %v1653_v7  ;;  %v5025_v48 = vmul.f32 %v6815_v17, %v1655_v12  ;;  %v5028_v52 = vmul.f32 %v6815_v17, %v1656_v33 }
 0x21a   :  { %6832 = vst [vmem:[#allocation33_spill] sm:$0xff] %v4992_v3  ;;  %6833 = vst [vmem:[#allocation34_spill] sm:$0xff] %v4995_v4  ;;  %v5031_v53 = vmul.f32 %v6815_v17, %v1657_v34  ;;  %v5034_v51 = vmul.f32 %v6815_v17, %v1658_v37  ;;  %v5037_v60 = vmul.f32 %v6815_v17, %v1659_v44 }
 0x21b   :  { %6834 = vst [vmem:[#allocation35_spill] sm:$0xff] %v5001_v24  ;;  %6835 = vst [vmem:[#allocation36_spill] sm:$0xff] %v5004_v22  ;;  %v5040_v7 = vmul.f32 %v6815_v17, %v1660_v31  ;;  %v5046_v12 = vmul.f32 %v6815_v17, %v1662_v2  ;;  %v5049_v33 = vmul.f32 %v6815_v17, %v1663_v6 }
 0x21c   :  { %6836 = vst [vmem:[#allocation37_spill] sm:$0xff] %v5007_v13  ;;  %6837 = vst [vmem:[#allocation38_spill] sm:$0xff] %v5010_v27  ;;  %v5052_v34 = vmul.f32 %v6815_v17, %v1664_v15  ;;  %v5055_v37 = vmul.f32 %v6815_v17, %v1665_v28  ;;  %v5058_v44 = vmul.f32 %v6815_v17, %v1666_v35 }
 0x21d   :  { %6838 = vst [vmem:[#allocation39_spill] sm:$0xff] %v5016_v56  ;;  %6839 = vst [vmem:[#allocation40_spill] sm:$0xff] %v5019_v42  ;;  %v5061_v31 = vmul.f32 %v6815_v17, %v1667_v40  ;;  %v5064_v61 = vmul.f32 %v6815_v17, %v1668_v9  ;;  %v5067_v2 = vmul.f32 %v6815_v17, %v1669_v18 }
 0x21e   :  { %6840 = vst [vmem:[#allocation41_spill] sm:$0xff] %v5022_v62  ;;  %6841 = vst [vmem:[#allocation43_spill] sm:$0xff] %v5025_v48  ;;  %v5070_v6 = vmul.f32 %v6815_v17, %v1670_v30  ;;  %v5073_v15 = vmul.f32 %v6815_v17, %v1671_v29  ;;  %v5076_v28 = vmul.f32 %v6815_v17, %v1672_v58 }
 0x21f   :  { %6842 = vst [vmem:[#allocation44_spill] sm:$0xff] %v5031_v53  ;;  %6843 = vst [vmem:[#allocation45_spill] sm:$0xff] %v5034_v51  ;;  %v5079_v35 = vmul.f32 %v6815_v17, %v1673_v19  ;;  %v5082_v40 = vmul.f32 %v6815_v17, %v1674_v25  ;;  %v5085_v9 = vmul.f32 %v6815_v17, %v1675_v63 }
 0x220   :  { %6844 = vst [vmem:[#allocation46_spill] sm:$0xff] %v5037_v60  ;;  %6845 = vst [vmem:[#allocation47_spill] sm:$0xff] %v5040_v7  ;;  %v5088_v18 = vmul.f32 %v6815_v17, %v1676_v16  ;;  %v5091_v30 = vmul.f32 %v6815_v17, %v1677_v0  ;;  %v5094_v29 = vmul.f32 %v6815_v17, %v1678_v1 }
 0x221   :  { %6846 = vst [vmem:[#allocation48_spill] sm:$0xff] %v5043_v8  ;;  %6847 = vst [vmem:[#allocation49_spill] sm:$0xff] %v5046_v12  ;;  %v5097_v58 = vmul.f32 %v6815_v17, %v1679_v26  ;;  %v5100_v19 = vmul.f32 %v6815_v17, %v1680_v23  ;;  %v5103_v25 = vmul.f32 %v6815_v17, %v1681_v20  ;;  %v6873_v20 = vld [vmem:[#allocation17_spill] sm:$0xff] }
 0x222   :  { %6848 = vst [vmem:[#allocation50_spill] sm:$0xff] %v5049_v33  ;;  %6849 = vst [vmem:[#allocation51_spill] sm:$0xff] %v5052_v34  ;;  %v5106_v63 = vmul.f32 %v6815_v17, %v1682_v43  ;;  %v5109_v16 = vmul.f32 %v6815_v17, %v1683_v11  ;;  %v5112_v0 = vmul.f32 %v6815_v17, %v1684_v49  ;;  %v3200_v43 = vcvt.f32.s32 %v6873_v20  ;;  %v6874_v11 = vld [vmem:[#allocation18_spill] sm:$0xff] }
 0x223   :  { %6850 = vst [vmem:[#allocation52_spill] sm:$0xff] %v5055_v37  ;;  %6851 = vst [vmem:[#allocation53_spill] sm:$0xff] %v5058_v44  ;;  %v5115_v1 = vmul.f32 %v6815_v17, %v1685_v54  ;;  %v5118_v26 = vmul.f32 %v6815_v17, %v1688_v14  ;;  %v5121_v23 = vmul.f32 %v6815_v17, %v1689_v5  ;;  %v3208_v49 = vcvt.f32.s32 %v6874_v11  ;;  %v6875_v54 = vld [vmem:[#allocation19_spill] sm:$0xff] }
 0x224   :  { %6852 = vst [vmem:[#allocation54_spill] sm:$0xff] %v5061_v31  ;;  %6853 = vst [vmem:[#allocation55_spill] sm:$0xff] %v5064_v61  ;;  %v3201_v5 = vcvt.s32.f32 %v3200_v43  ;;  %v3216_v17 = vcvt.f32.s32 %v6875_v54 }
 0x225   :  { %6854 = vst [vmem:[#allocation56_spill] sm:$0xff] %v5067_v2  ;;  %6855 = vst [vmem:[#allocation57_spill] sm:$0xff] %v5070_v6  ;;  %v6888_v2 = vmov 0 }
 0x226   :  { %6856 = vst [vmem:[#allocation58_spill] sm:$0xff] %v5073_v15  ;;  %6857 = vst [vmem:[#allocation59_spill] sm:$0xff] %v5076_v28 }
 0x227   :  { %6858 = vst [vmem:[#allocation60_spill] sm:$0xff] %v5079_v35  ;;  %6859 = vst [vmem:[#allocation61_spill] sm:$0xff] %v5082_v40  ;;  %v6884_v35 = vmov 0 }
 0x228   :  { %6860 = vst [vmem:[#allocation62_spill] sm:$0xff] %v5085_v9  ;;  %6861 = vst [vmem:[#allocation63_spill] sm:$0xff] %v5088_v18  ;;  %v3217_v18 = vcvt.s32.f32 %v3216_v17 }
 0x229   :  { %6862 = vst [vmem:[#allocation64_spill] sm:$0xff] %v5091_v30  ;;  %6863 = vst [vmem:[#allocation65_spill] sm:$0xff] %v5094_v29  ;;  %v6883_v29 = vld [vmem:[#allocation20_spill] sm:$0xff] }
 0x22a   :  { %6864 = vst [vmem:[#allocation66_spill] sm:$0xff] %v5097_v58  ;;  %6865 = vst [vmem:[#allocation67_spill] sm:$0xff] %v5100_v19  ;;  %v3209_v19 = vcvt.s32.f32 %v3208_v49  ;;  %v6880_v58 = vmov 0  ;;  %v3222_v30 = vand.u32 2147483647, %v6883_v29  ;;  %v3224_v9 = vcvt.f32.s32 %v6883_v29 }
 0x22b   :  { %6866 = vst [vmem:[#allocation68_spill] sm:$0xff] %v5103_v25  ;;  %6867 = vst [vmem:[#allocation69_spill] sm:$0xff] %v5106_v63  ;;  %v3198_v25 = vand.u32 2147483647, %v6873_v20  ;;  %v3203_v63 = vand.u32 2147483648, %v6873_v20  ;;  %v3227_v43 = vand.u32 2147483648, %v6883_v29  ;;  %v3264_v29 = vcvt.f32.s32 %v4962_v39 }
 0x22c   :  { %6868 = vst [vmem:[#allocation70_spill] sm:$0xff] %v5109_v16  ;;  %6869 = vst [vmem:[#allocation71_spill] sm:$0xff] %v5112_v0  ;;  %v3206_v16 = vand.u32 2147483647, %v6874_v11  ;;  %v3211_v0 = vand.u32 2147483648, %v6874_v11  ;;  %vm5147_vm5 = vcmp.lt.f32.partialorder %v3222_v30, 8388608.0  ;;  %v3225_v6 = vcvt.s32.f32 %v3224_v9 }
 0x22d   :  { %6870 = vst [vmem:[#allocation72_spill] sm:$0xff] %v5115_v1  ;;  %6871 = vst [vmem:[#allocation73_spill] sm:$0xff] %v5118_v26  ;;  %v3214_v1 = vand.u32 2147483647, %v6875_v54  ;;  %vm5130_vm2 = vcmp.lt.f32.partialorder %v3198_v25, 8388608.0  ;;  %v6885_v35 = vsel %vm5147_vm5, 4294967295, %v6884_v35 }
 0x22e   :  { %6872 = vst [vmem:[#allocation74_spill] sm:$0xff] %v5121_v23  ;;  %v3219_v23 = vand.u32 2147483648, %v6875_v54  ;;  %vm5136_vm3 = vcmp.lt.f32.partialorder %v3206_v16, 8388608.0  ;;  %v3202_v25 = vand.u32 2147483647, %v3201_v5  ;;  %6886 = vst [vmem:[#allocation75_spill] sm:$0xff] %v6885_v35 }
 0x22f   :  { %vm5140_vm4 = vcmp.lt.f32.partialorder %v3214_v1, 8388608.0  ;;  %v3210_v40 = vand.u32 2147483647, %v3209_v19  ;;  %v6887_v16 = vld [vmem:[#allocation21_spill] sm:$0xff]  ;;  %v3218_v15 = vand.u32 2147483647, %v3217_v18 }
 0x230   :  { %v6881_v58 = vsel %vm5140_vm4, 4294967295, %v6880_v58  ;;  %v3230_v28 = vand.u32 2147483647, %v6887_v16  ;;  %v3232_v1 = vcvt.f32.s32 %v6887_v16  ;;  %v5153_v49 = vor.u32 %v3203_v63, %v3202_v25  ;;  %v6891_v19 = vld [vmem:[#allocation22_spill] sm:$0xff] }
 0x231   :  { %6882 = vst [vmem:[#allocation17_spill] sm:$0xff] %v6881_v58  ;;  %v3235_v5 = vand.u32 2147483648, %v6887_v16  ;;  %v5156_v17 = vor.u32 %v3211_v0, %v3210_v40  ;;  %v3238_v61 = vand.u32 2147483647, %v6891_v19  ;;  %v5167_v63 = vor.u32 %v3219_v23, %v3218_v15 }
 0x232   :  { %vm5158_vm6 = vcmp.lt.f32.partialorder %v3230_v28, 8388608.0  ;;  %v3233_v30 = vcvt.s32.f32 %v3232_v1  ;;  %v3226_v18 = vand.u32 2147483647, %v3225_v6  ;;  %v3240_v9 = vcvt.f32.s32 %v6891_v19 }
 0x233   :  { %v6889_v2 = vsel %vm5158_vm6, 4294967295, %v6888_v2  ;;  %6892 = vst [vmem:[#allocation22_spill] sm:$0xff] %v5167_v63  ;;  %vm5174_vm7 = vcmp.lt.f32.partialorder %v3238_v61, 8388608.0  ;;  %v3243_v25 = vand.u32 2147483648, %v6891_v19  ;;  %v3246_v1 = vand.u32 2147483647, %v4956_v41 }
 0x234   :  { %6890 = vst [vmem:[#allocation76_spill] sm:$0xff] %v6889_v2  ;;  %v3234_v40 = vand.u32 2147483647, %v3233_v30  ;;  %v5183_v6 = vor.u32 %v3227_v43, %v3226_v18  ;;  %v3241_v23 = vcvt.s32.f32 %v3240_v9  ;;  %v3248_v30 = vcvt.f32.s32 %v4956_v41 }
 0x235   :  { %v3251_v61 = vand.u32 2147483648, %v4956_v41  ;;  %v3254_v28 = vand.u32 2147483647, %v4959_v36  ;;  %vm5195_vm8 = vcmp.lt.f32.partialorder %v3246_v1, 8388608.0  ;;  %v3256_v18 = vcvt.f32.s32 %v4959_v36 }
 0x236   :  { %6895 = vst [vmem:[#allocation77_spill] sm:$0xff] %v5183_v6  ;;  %v5186_v31 = vor.u32 %v3235_v5, %v3234_v40  ;;  %v3242_v58 = vand.u32 2147483647, %v3241_v23  ;;  %v3249_v9 = vcvt.s32.f32 %v3248_v30  ;;  %v6899_v40 = vmov 0 }
 0x237   :  { %vm5204_vm9 = vcmp.lt.f32.partialorder %v3254_v28, 8388608.0  ;;  %v3259_v15 = vand.u32 2147483648, %v4959_v36  ;;  %v3257_v23 = vcvt.s32.f32 %v3256_v18  ;;  %v3262_v1 = vand.u32 2147483647, %v4962_v39 }
 0x238   :  { %6896 = vst [vmem:[#allocation78_spill] sm:$0xff] %v5186_v31  ;;  %v6900_v40 = vsel %vm5204_vm9, 4294967295, %v6899_v40  ;;  %v5209_v11 = vor.u32 %v3243_v25, %v3242_v58  ;;  %v3250_v6 = vand.u32 2147483647, %v3249_v9  ;;  %v3267_v35 = vand.u32 2147483648, %v4962_v39 }
 0x239   :  { %6901 = vst [vmem:[#allocation79_spill] sm:$0xff] %v6900_v40  ;;  %v3270_v2 = vand.u32 2147483647, %v4965_v32  ;;  %v3272_v30 = vcvt.f32.s32 %v4965_v32  ;;  %v3258_v5 = vand.u32 2147483647, %v3257_v23  ;;  %vm5220_vm10 = vcmp.lt.f32.partialorder %v3262_v1, 8388608.0 }
 0x23a   :  { %v6902_v58 = vmov 0  ;;  %v3265_v25 = vcvt.s32.f32 %v3264_v29  ;;  %v5224_v18 = vor.u32 %v3251_v61, %v3250_v6  ;;  %v6905_v9 = vmov 0 }
 0x23b   :  { %v6903_v58 = vsel %vm5220_vm10, 4294967295, %v6902_v58  ;;  %vm5226_vm11 = vcmp.lt.f32.partialorder %v3270_v2, 8388608.0  ;;  %v3273_v16 = vcvt.s32.f32 %v3272_v30  ;;  %v3275_v31 = vand.u32 2147483648, %v4965_v32 }
 0x23c   :  { %6904 = vst [vmem:[#allocation80_spill] sm:$0xff] %v6903_v58  ;;  %v6906_v9 = vsel %vm5226_vm11, 4294967295, %v6905_v9  ;;  %v5231_v54 = vor.u32 %v3259_v15, %v3258_v5  ;;  %v3266_v63 = vand.u32 2147483647, %v3265_v25  ;;  %v3278_v28 = vand.u32 2147483647, %v4968_v46 }
 0x23d   :  { %6907 = vst [vmem:[#allocation81_spill] sm:$0xff] %v6906_v9  ;;  %v3280_v23 = vcvt.f32.s32 %v4968_v46  ;;  %v3274_v6 = vand.u32 2147483647, %v3273_v16  ;;  %v3283_v2 = vand.u32 2147483648, %v4968_v46  ;;  %v3286_v61 = vand.u32 2147483647, %v4971_v21 }
 0x23e   :  { %6908 = vst [vmem:[#allocation82_spill] sm:$0xff] %v5231_v54  ;;  %v5245_v5 = vor.u32 %v3267_v35, %v3266_v63  ;;  %vm5247_vm12 = vcmp.lt.f32.partialorder %v3278_v28, 8388608.0  ;;  %v6910_v1 = vmov 0  ;;  %v6913_v16 = vmov 0 }
 0x23f   :  { %v6911_v1 = vsel %vm5247_vm12, 4294967295, %v6910_v1  ;;  %v3281_v30 = vcvt.s32.f32 %v3280_v23  ;;  %v5251_v25 = vor.u32 %v3275_v31, %v3274_v6  ;;  %vm5253_vm13 = vcmp.lt.f32.partialorder %v3286_v61, 8388608.0 }
 0x240   :  { %6909 = vst [vmem:[#allocation83_spill] sm:$0xff] %v5245_v5  ;;  %v6914_v16 = vsel %vm5253_vm13, 4294967295, %v6913_v16  ;;  %v3288_v29 = vcvt.f32.s32 %v4971_v21  ;;  %v3291_v41 = vand.u32 2147483648, %v4971_v21  ;;  %v3294_v28 = vand.u32 2147483647, %v4974_v55 }
 0x241   :  { %6912 = vst [vmem:[#allocation84_spill] sm:$0xff] %v5251_v25  ;;  %v3282_v63 = vand.u32 2147483647, %v3281_v30  ;;  %v3296_v23 = vcvt.f32.s32 %v4974_v55  ;;  %v3299_v61 = vand.u32 2147483648, %v4974_v55  ;;  %v3302_v15 = vand.u32 2147483647, %v4977_v45 }
 0x242   :  { %v3289_v6 = vcvt.s32.f32 %v3288_v29  ;;  %vm5273_vm14 = vcmp.lt.f32.partialorder %v3294_v28, 8388608.0  ;;  %v6915_v58 = vmov 0  ;;  %v3304_v35 = vcvt.f32.s32 %v4977_v45 }
 0x243   :  { %v5271_v36 = vor.u32 %v3283_v2, %v3282_v63  ;;  %v6916_v58 = vsel %vm5273_vm14, 4294967295, %v6915_v58  ;;  %v3297_v30 = vcvt.s32.f32 %v3296_v23  ;;  %vm5278_vm15 = vcmp.lt.f32.partialorder %v3302_v15, 8388608.0 }
 0x244   :  { %6917 = vst [vmem:[#allocation85_spill] sm:$0xff] %v6916_v58  ;;  %v3290_v39 = vand.u32 2147483647, %v3289_v6  ;;  %v6918_v5 = vmov 0  ;;  %v3307_v29 = vand.u32 2147483648, %v4977_v45  ;;  %v3305_v28 = vcvt.s32.f32 %v3304_v35 }
 0x245   :  { %v6919_v5 = vsel %vm5278_vm15, 4294967295, %v6918_v5  ;;  %v3310_v31 = vand.u32 2147483647, %v4980_v57  ;;  %v3298_v63 = vand.u32 2147483647, %v3297_v30  ;;  %v3312_v23 = vcvt.f32.s32 %v4980_v57 }
 0x246   :  { %6920 = vst [vmem:[#allocation86_spill] sm:$0xff] %v6919_v5  ;;  %v5289_v32 = vor.u32 %v3291_v41, %v3290_v39  ;;  %v6921_v15 = vmov 0  ;;  %v3315_v6 = vand.u32 2147483648, %v4980_v57  ;;  %v3318_v25 = vand.u32 2147483647, %v4983_v50 }
 0x247   :  { %vm5291_vm0 = vcmp.lt.f32.partialorder %v3310_v31, 8388608.0  ;;  %v5297_v9 = vor.u32 %v3299_v61, %v3298_v63  ;;  %v3306_v54 = vand.u32 2147483647, %v3305_v28  ;;  %v3313_v40 = vcvt.s32.f32 %v3312_v23 }
 0x248   :  { %v6922_v15 = vsel %vm5291_vm0, 4294967295, %v6921_v15  ;;  %v3320_v2 = vcvt.f32.s32 %v4983_v50  ;;  %vm5304_vm1 = vcmp.lt.f32.partialorder %v3318_v25, 8388608.0  ;;  %v6925_v39 = vmov 0 }
 0x249   :  { %6923 = vst [vmem:[#allocation87_spill] sm:$0xff] %v6922_v15  ;;  %6924 = vst [vmem:[#allocation88_spill] sm:$0xff] %v5297_v9  ;;  %v6926_v39 = vsel %vm5304_vm1, 4294967295, %v6925_v39  ;;  %v3323_v35 = vand.u32 2147483648, %v4983_v50  ;;  %v3326_v31 = vand.u32 2147483647, %v4986_v10  ;;  %v5314_v30 = vor.u32 %v3307_v29, %v3306_v54 }
 0x24a   :  { %v3314_v63 = vand.u32 2147483647, %v3313_v40  ;;  %v3321_v28 = vcvt.s32.f32 %v3320_v2  ;;  %v6928_v23 = vmov 0  ;;  %v3328_v25 = vcvt.f32.s32 %v4986_v10 }
 0x24b   :  { %6927 = vst [vmem:[#allocation89_spill] sm:$0xff] %v5314_v30  ;;  %vm5316_vm12 = vcmp.lt.f32.partialorder %v3326_v31, 8388608.0  ;;  %v3331_v41 = vand.u32 2147483648, %v4986_v10  ;;  %v3334_v21 = vand.u32 2147483647, %v4989_v59  ;;  %v3336_v40 = vcvt.f32.s32 %v4989_v59 }
 0x24c   :  { %v6929_v23 = vsel %vm5316_vm12, 4294967295, %v6928_v23  ;;  %v5327_v61 = vor.u32 %v3315_v6, %v3314_v63  ;;  %v3322_v54 = vand.u32 2147483647, %v3321_v28  ;;  %v3329_v29 = vcvt.s32.f32 %v3328_v25 }
 0x24d   :  { %vm5330_vm14 = vcmp.lt.f32.partialorder %v3334_v21, 8388608.0  ;;  %v6931_v2 = vmov 0  ;;  %v3339_v31 = vand.u32 2147483648, %v4989_v59  ;;  %v3342_v55 = vand.u32 2147483647, %v4992_v3 }
 0x24e   :  { %6930 = vst [vmem:[#allocation90_spill] sm:$0xff] %v5327_v61  ;;  %v6932_v2 = vsel %vm5330_vm14, 4294967295, %v6931_v2  ;;  %v5340_v58 = vor.u32 %v3323_v35, %v3322_v54  ;;  %v3337_v6 = vcvt.s32.f32 %v3336_v40  ;;  %v3344_v63 = vcvt.f32.s32 %v4992_v3 }
 0x24f   :  { %6933 = vst [vmem:[#allocation91_spill] sm:$0xff] %v6932_v2  ;;  %v3330_v28 = vand.u32 2147483647, %v3329_v29  ;;  %vm5343_vm15 = vcmp.lt.f32.partialorder %v3342_v55, 8388608.0  ;;  %v6934_v21 = vmov 0  ;;  %v3347_v25 = vand.u32 2147483648, %v4992_v3 }
 0x250   :  { %v6935_v21 = vsel %vm5343_vm15, 4294967295, %v6934_v21  ;;  %v3350_v45 = vand.u32 2147483647, %v4995_v4  ;;  %v3338_v5 = vand.u32 2147483647, %v3337_v6  ;;  %v3345_v35 = vcvt.s32.f32 %v3344_v63 }
 0x251   :  { %6936 = vst [vmem:[#allocation92_spill] sm:$0xff] %v6935_v21  ;;  %v3352_v54 = vcvt.f32.s32 %v4995_v4  ;;  %v5354_v40 = vor.u32 %v3331_v41, %v3330_v28  ;;  %v6937_v55 = vmov 0  ;;  %v3355_v29 = vand.u32 2147483648, %v4995_v4 }
 0x252   :  { %vm5356_vm0 = vcmp.lt.f32.partialorder %v3350_v45, 8388608.0  ;;  %v3358_v57 = vand.u32 2147483647, %v4998_v38  ;;  %v5362_v61 = vor.u32 %v3339_v31, %v3338_v5  ;;  %v3346_v30 = vand.u32 2147483647, %v3345_v35 }
 0x253   :  { %v6938_v55 = vsel %vm5356_vm0, 4294967295, %v6937_v55  ;;  %v3353_v9 = vcvt.s32.f32 %v3352_v54  ;;  %v3360_v15 = vcvt.f32.s32 %v4998_v38  ;;  %v6941_v45 = vmov 0 }
 0x254   :  { %6939 = vst [vmem:[#allocation93_spill] sm:$0xff] %v6938_v55  ;;  %6940 = vst [vmem:[#allocation94_spill] sm:$0xff] %v5362_v61  ;;  %vm5369_vm1 = vcmp.lt.f32.partialorder %v3358_v57, 8388608.0  ;;  %v3363_v6 = vand.u32 2147483648, %v4998_v38  ;;  %v3366_v63 = vand.u32 2147483647, %v5001_v24  ;;  %v5379_v31 = vor.u32 %v3347_v25, %v3346_v30 }
 0x255   :  { %v6942_v45 = vsel %vm5369_vm1, 4294967295, %v6941_v45  ;;  %v3354_v28 = vand.u32 2147483647, %v3353_v9  ;;  %v3361_v35 = vcvt.s32.f32 %v3360_v15  ;;  %v6944_v54 = vmov 0 }
 0x256   :  { %6943 = vst [vmem:[#allocation95_spill] sm:$0xff] %v5379_v31  ;;  %vm5381_vm13 = vcmp.lt.f32.partialorder %v3366_v63, 8388608.0  ;;  %v3368_v57 = vcvt.f32.s32 %v5001_v24  ;;  %v3371_v41 = vand.u32 2147483648, %v5001_v24  ;;  %v3374_v10 = vand.u32 2147483647, %v5004_v22 }
 0x257   :  { %v6945_v54 = vsel %vm5381_vm13, 4294967295, %v6944_v54  ;;  %v5392_v5 = vor.u32 %v3355_v29, %v3354_v28  ;;  %v3362_v30 = vand.u32 2147483647, %v3361_v35  ;;  %v3376_v9 = vcvt.f32.s32 %v5004_v22 }
 0x258   :  { %v3369_v15 = vcvt.s32.f32 %v3368_v57  ;;  %vm5395_vm14 = vcmp.lt.f32.partialorder %v3374_v10, 8388608.0  ;;  %v6947_v25 = vmov 0  ;;  %v3379_v63 = vand.u32 2147483648, %v5004_v22 }
 0x259   :  { %6946 = vst [vmem:[#allocation96_spill] sm:$0xff] %v5392_v5  ;;  %v6948_v25 = vsel %vm5395_vm14, 4294967295, %v6947_v25  ;;  %v3382_v59 = vand.u32 2147483647, %v5007_v13  ;;  %v5405_v2 = vor.u32 %v3363_v6, %v3362_v30  ;;  %v3377_v29 = vcvt.s32.f32 %v3376_v9 }
 0x25a   :  { %6949 = vst [vmem:[#allocation97_spill] sm:$0xff] %v6948_v25  ;;  %v3384_v28 = vcvt.f32.s32 %v5007_v13  ;;  %v3370_v35 = vand.u32 2147483647, %v3369_v15  ;;  %v6950_v10 = vmov 0  ;;  %v3387_v57 = vand.u32 2147483648, %v5007_v13 }
 0x25b   :  { %vm5408_vm15 = vcmp.lt.f32.partialorder %v3382_v59, 8388608.0  ;;  %v3390_v3 = vand.u32 2147483647, %v5010_v27  ;;  %v3378_v21 = vand.u32 2147483647, %v3377_v29  ;;  %v3392_v30 = vcvt.f32.s32 %v5010_v27 }
 0x25c   :  { %v6951_v10 = vsel %vm5408_vm15, 4294967295, %v6950_v10  ;;  %v3385_v6 = vcvt.s32.f32 %v3384_v28  ;;  %v5419_v9 = vor.u32 %v3371_v41, %v3370_v35  ;;  %v6953_v59 = vmov 0 }
 0x25d   :  { %6952 = vst [vmem:[#allocation98_spill] sm:$0xff] %v6951_v10  ;;  %vm5421_vm0 = vcmp.lt.f32.partialorder %v3390_v3, 8388608.0  ;;  %v3395_v15 = vand.u32 2147483648, %v5010_v27  ;;  %v3398_v4 = vand.u32 2147483647, %v5013_v47  ;;  %v5427_v5 = vor.u32 %v3379_v63, %v3378_v21 }
 0x25e   :  { %v6954_v59 = vsel %vm5421_vm0, 4294967295, %v6953_v59  ;;  %v3386_v31 = vand.u32 2147483647, %v3385_v6  ;;  %v3393_v61 = vcvt.s32.f32 %v3392_v30  ;;  %v3400_v55 = vcvt.f32.s32 %v5013_v47 }
 0x25f   :  { %6955 = vst [vmem:[#allocation99_spill] sm:$0xff] %v6954_v59  ;;  %6956 = vst [vmem:[#allocation100_spill] sm:$0xff] %v5427_v5  ;;  %vm5434_vm1 = vcmp.lt.f32.partialorder %v3398_v4, 8388608.0  ;;  %v6957_v3 = vmov 0  ;;  %v3403_v29 = vand.u32 2147483648, %v5013_v47  ;;  %v6960_v30 = vmov 0 }
 0x260   :  { %v6958_v3 = vsel %vm5434_vm1, 4294967295, %v6957_v3  ;;  %v3406_v28 = vand.u32 2147483647, %v5016_v56  ;;  %v5444_v63 = vor.u32 %v3387_v57, %v3386_v31  ;;  %v3394_v35 = vand.u32 2147483647, %v3393_v61 }
 0x261   :  { %v3401_v6 = vcvt.s32.f32 %v3400_v55  ;;  %v3408_v4 = vcvt.f32.s32 %v5016_v56  ;;  %v3411_v41 = vand.u32 2147483648, %v5016_v56  ;;  %v3414_v24 = vand.u32 2147483647, %v5019_v42 }
 0x262   :  { %6959 = vst [vmem:[#allocation101_spill] sm:$0xff] %v5444_v63  ;;  %vm5446_vm12 = vcmp.lt.f32.partialorder %v3406_v28, 8388608.0  ;;  %v5457_v21 = vor.u32 %v3395_v15, %v3394_v35  ;;  %v3416_v61 = vcvt.f32.s32 %v5019_v42  ;;  %v6963_v57 = vmov 0 }
 0x263   :  { %v6961_v30 = vsel %vm5446_vm12, 4294967295, %v6960_v30  ;;  %v3402_v31 = vand.u32 2147483647, %v3401_v6  ;;  %v3409_v55 = vcvt.s32.f32 %v3408_v4  ;;  %vm5460_vm14 = vcmp.lt.f32.partialorder %v3414_v24, 8388608.0 }
 0x264   :  { %6962 = vst [vmem:[#allocation102_spill] sm:$0xff] %v5457_v21  ;;  %v6964_v57 = vsel %vm5460_vm14, 4294967295, %v6963_v57  ;;  %v3419_v28 = vand.u32 2147483648, %v5019_v42  ;;  %v3422_v22 = vand.u32 2147483647, %v5022_v62  ;;  %v3417_v15 = vcvt.s32.f32 %v3416_v61 }
 0x265   :  { %6965 = vst [vmem:[#allocation103_spill] sm:$0xff] %v6964_v57  ;;  %v5470_v25 = vor.u32 %v3403_v29, %v3402_v31  ;;  %v3424_v35 = vcvt.f32.s32 %v5022_v62  ;;  %v3410_v6 = vand.u32 2147483647, %v3409_v55  ;;  %v6966_v24 = vmov 0 }
 0x266   :  { %vm5473_vm15 = vcmp.lt.f32.partialorder %v3422_v22, 8388608.0  ;;  %v3427_v4 = vand.u32 2147483648, %v5022_v62  ;;  %v3430_v13 = vand.u32 2147483647, %v5025_v48  ;;  %v3418_v10 = vand.u32 2147483647, %v3417_v15 }
 0x267   :  { %v6967_v24 = vsel %vm5473_vm15, 4294967295, %v6966_v24  ;;  %v3425_v29 = vcvt.s32.f32 %v3424_v35  ;;  %v3432_v31 = vcvt.f32.s32 %v5025_v48  ;;  %v5484_v61 = vor.u32 %v3411_v41, %v3410_v6 }
 0x268   :  { %6968 = vst [vmem:[#allocation104_spill] sm:$0xff] %v6967_v24  ;;  %vm5486_vm0 = vcmp.lt.f32.partialorder %v3430_v13, 8388608.0  ;;  %v6969_v22 = vmov 0  ;;  %v3435_v55 = vand.u32 2147483648, %v5025_v48  ;;  %v3438_v27 = vand.u32 2147483647, %v5028_v52 }
 0x269   :  { %v6970_v22 = vsel %vm5486_vm0, 4294967295, %v6969_v22  ;;  %v5492_v21 = vor.u32 %v3419_v28, %v3418_v10  ;;  %v3426_v63 = vand.u32 2147483647, %v3425_v29  ;;  %v3433_v5 = vcvt.s32.f32 %v3432_v31 }
 0x26a   :  { %6971 = vst [vmem:[#allocation105_spill] sm:$0xff] %v6970_v22  ;;  %v3440_v59 = vcvt.f32.s32 %v5028_v52  ;;  %vm5499_vm1 = vcmp.lt.f32.partialorder %v3438_v27, 8388608.0  ;;  %v6973_v13 = vmov 0  ;;  %v3443_v15 = vand.u32 2147483648, %v5028_v52 }
 0x26b   :  { %6972 = vst [vmem:[#allocation106_spill] sm:$0xff] %v5492_v21  ;;  %v6974_v13 = vsel %vm5499_vm1, 4294967295, %v6973_v13  ;;  %v3446_v35 = vand.u32 2147483647, %v5031_v53  ;;  %v5509_v28 = vor.u32 %v3427_v4, %v3426_v63  ;;  %v3434_v6 = vand.u32 2147483647, %v3433_v5 }
 0x26c   :  { %v3441_v29 = vcvt.s32.f32 %v3440_v59  ;;  %v6976_v31 = vmov 0  ;;  %v3448_v27 = vcvt.f32.s32 %v5031_v53  ;;  %v3451_v41 = vand.u32 2147483648, %v5031_v53 }
 0x26d   :  { %6975 = vst [vmem:[#allocation107_spill] sm:$0xff] %v5509_v28  ;;  %vm5511_vm13 = vcmp.lt.f32.partialorder %v3446_v35, 8388608.0  ;;  %v3454_v56 = vand.u32 2147483647, %v5034_v51  ;;  %v5522_v10 = vor.u32 %v3435_v55, %v3434_v6  ;;  %v3456_v5 = vcvt.f32.s32 %v5034_v51 }
 0x26e   :  { %v6977_v31 = vsel %vm5511_vm13, 4294967295, %v6976_v31  ;;  %v3442_v63 = vand.u32 2147483647, %v3441_v29  ;;  %v3449_v59 = vcvt.s32.f32 %v3448_v27  ;;  %v6979_v4 = vmov 0 }
 0x26f   :  { %6978 = vst [vmem:[#allocation108_spill] sm:$0xff] %v5522_v10  ;;  %vm5525_vm14 = vcmp.lt.f32.partialorder %v3454_v56, 8388608.0  ;;  %v3459_v35 = vand.u32 2147483648, %v5034_v51  ;;  %v3462_v42 = vand.u32 2147483647, %v5037_v60  ;;  %v3457_v55 = vcvt.s32.f32 %v3456_v5 }
 0x270   :  { %v6980_v4 = vsel %vm5525_vm14, 4294967295, %v6979_v4  ;;  %v5535_v57 = vor.u32 %v3443_v15, %v3442_v63  ;;  %v3464_v6 = vcvt.f32.s32 %v5037_v60  ;;  %v3450_v29 = vand.u32 2147483647, %v3449_v59 }
 0x271   :  { %6981 = vst [vmem:[#allocation109_spill] sm:$0xff] %v6980_v4  ;;  %vm5538_vm15 = vcmp.lt.f32.partialorder %v3462_v42, 8388608.0  ;;  %v6982_v56 = vmov 0  ;;  %v3467_v27 = vand.u32 2147483648, %v5037_v60  ;;  %v3470_v62 = vand.u32 2147483647, %v5040_v7 }
 0x272   :  { %v6983_v56 = vsel %vm5538_vm15, 4294967295, %v6982_v56  ;;  %v3458_v24 = vand.u32 2147483647, %v3457_v55  ;;  %v3465_v15 = vcvt.s32.f32 %v3464_v6  ;;  %v3472_v63 = vcvt.f32.s32 %v5040_v7 }
 0x273   :  { %6984 = vst [vmem:[#allocation110_spill] sm:$0xff] %v6983_v56  ;;  %v5549_v5 = vor.u32 %v3451_v41, %v3450_v29  ;;  %vm5551_vm0 = vcmp.lt.f32.partialorder %v3470_v62, 8388608.0  ;;  %v6985_v42 = vmov 0  ;;  %v3475_v59 = vand.u32 2147483648, %v5040_v7 }
 0x274   :  { %v6986_v42 = vsel %vm5551_vm0, 4294967295, %v6985_v42  ;;  %v3478_v48 = vand.u32 2147483647, %v5043_v8  ;;  %v5557_v10 = vor.u32 %v3459_v35, %v3458_v24  ;;  %v3466_v28 = vand.u32 2147483647, %v3465_v15 }
 0x275   :  { %6987 = vst [vmem:[#allocation111_spill] sm:$0xff] %v6986_v42  ;;  %v3473_v21 = vcvt.s32.f32 %v3472_v63  ;;  %v3480_v22 = vcvt.f32.s32 %v5043_v8  ;;  %v6989_v62 = vmov 0  ;;  %v3483_v55 = vand.u32 2147483648, %v5043_v8 }
 0x276   :  { %6988 = vst [vmem:[#allocation112_spill] sm:$0xff] %v5557_v10  ;;  %vm5564_vm1 = vcmp.lt.f32.partialorder %v3478_v48, 8388608.0  ;;  %v3486_v6 = vand.u32 2147483647, %v5046_v12  ;;  %v5574_v35 = vor.u32 %v3467_v27, %v3466_v28  ;;  %v6993_v63 = vmov 0 }
 0x277   :  { %v6990_v62 = vsel %vm5564_vm1, 4294967295, %v6989_v62  ;;  %v3474_v29 = vand.u32 2147483647, %v3473_v21  ;;  %v3481_v15 = vcvt.s32.f32 %v3480_v22  ;;  %v3488_v48 = vcvt.f32.s32 %v5046_v12 }
 0x278   :  { %6991 = vst [vmem:[#allocation113_spill] sm:$0xff] %v6990_v62  ;;  %6992 = vst [vmem:[#allocation114_spill] sm:$0xff] %v5574_v35  ;;  %vm5576_vm12 = vcmp.lt.f32.partialorder %v3486_v6, 8388608.0  ;;  %v3491_v41 = vand.u32 2147483648, %v5046_v12  ;;  %v3494_v53 = vand.u32 2147483647, %v5049_v33  ;;  %v3496_v21 = vcvt.f32.s32 %v5049_v33 }
 0x279   :  { %v6994_v63 = vsel %vm5576_vm12, 4294967295, %v6993_v63  ;;  %v5587_v24 = vor.u32 %v3475_v59, %v3474_v29  ;;  %v3482_v28 = vand.u32 2147483647, %v3481_v15  ;;  %v3489_v22 = vcvt.s32.f32 %v3488_v48  ;;  %v7017_v12 = vld [vmem:[#allocation55_spill] sm:$0xff] }
 0x27a   :  { %6995 = vst [vmem:[#allocation115_spill] sm:$0xff] %v6994_v63  ;;  %vm5590_vm14 = vcmp.lt.f32.partialorder %v3494_v53, 8388608.0  ;;  %v6997_v27 = vmov 0  ;;  %v3499_v6 = vand.u32 2147483648, %v5049_v33  ;;  %v3502_v51 = vand.u32 2147483647, %v5052_v34 }
 0x27b   :  { %6996 = vst [vmem:[#allocation116_spill] sm:$0xff] %v5587_v24  ;;  %v6998_v27 = vsel %vm5590_vm14, 4294967295, %v6997_v27  ;;  %v5600_v4 = vor.u32 %v3483_v55, %v3482_v28  ;;  %v3497_v59 = vcvt.s32.f32 %v3496_v21  ;;  %v3504_v29 = vcvt.f32.s32 %v5052_v34  ;;  %v7022_v33 = vld [vmem:[#allocation56_spill] sm:$0xff] }
 0x27c   :  { %6999 = vst [vmem:[#allocation117_spill] sm:$0xff] %v6998_v27  ;;  %v3490_v15 = vand.u32 2147483647, %v3489_v22  ;;  %vm5603_vm15 = vcmp.lt.f32.partialorder %v3502_v51, 8388608.0  ;;  %v7001_v53 = vmov 0  ;;  %v3507_v48 = vand.u32 2147483648, %v5052_v34 }
 0x27d   :  { %7000 = vst [vmem:[#allocation118_spill] sm:$0xff] %v5600_v4  ;;  %v7002_v53 = vsel %vm5603_vm15, 4294967295, %v7001_v53  ;;  %v3510_v60 = vand.u32 2147483647, %v5055_v37  ;;  %v3498_v56 = vand.u32 2147483647, %v3497_v59  ;;  %v3505_v55 = vcvt.s32.f32 %v3504_v29 }
 0x27e   :  { %7003 = vst [vmem:[#allocation119_spill] sm:$0xff] %v7002_v53  ;;  %v3512_v28 = vcvt.f32.s32 %v5055_v37  ;;  %v5614_v21 = vor.u32 %v3491_v41, %v3490_v15  ;;  %v7005_v51 = vmov 0  ;;  %v3515_v22 = vand.u32 2147483648, %v5055_v37  ;;  %v7012_v29 = vld [vmem:[#allocation54_spill] sm:$0xff]  ;;  %v7027_v34 = vld [vmem:[#allocation57_spill] sm:$0xff] }
 0x27f   :  { %vm5616_vm0 = vcmp.lt.f32.partialorder %v3510_v60, 8388608.0  ;;  %v3518_v7 = vand.u32 2147483647, %v5058_v44  ;;  %v5622_v24 = vor.u32 %v3499_v6, %v3498_v56  ;;  %v3506_v35 = vand.u32 2147483647, %v3505_v55  ;;  %v7032_v37 = vld [vmem:[#allocation58_spill] sm:$0xff] }
 0x280   :  { %7004 = vst [vmem:[#allocation120_spill] sm:$0xff] %v5614_v21  ;;  %v7006_v51 = vsel %vm5616_vm0, 4294967295, %v7005_v51  ;;  %v3513_v10 = vcvt.s32.f32 %v3512_v28  ;;  %v3520_v42 = vcvt.f32.s32 %v5058_v44  ;;  %v7009_v60 = vmov 0 }
 0x281   :  { %7007 = vst [vmem:[#allocation121_spill] sm:$0xff] %v7006_v51  ;;  %7008 = vst [vmem:[#allocation122_spill] sm:$0xff] %v5622_v24  ;;  %vm5629_vm1 = vcmp.lt.f32.partialorder %v3518_v7, 8388608.0  ;;  %v3523_v59 = vand.u32 2147483648, %v5058_v44  ;;  %v3526_v15 = vand.u32 2147483647, %v7012_v29  ;;  %v5639_v6 = vor.u32 %v3507_v48, %v3506_v35 }
 0x282   :  { %v7010_v60 = vsel %vm5629_vm1, 4294967295, %v7009_v60  ;;  %v3514_v55 = vand.u32 2147483647, %v3513_v10  ;;  %v3521_v28 = vcvt.s32.f32 %v3520_v42  ;;  %v7014_v63 = vmov 0 }
 0x283   :  { %7011 = vst [vmem:[#allocation123_spill] sm:$0xff] %v7010_v60  ;;  %7013 = vst [vmem:[#allocation124_spill] sm:$0xff] %v5639_v6  ;;  %vm5641_vm13 = vcmp.lt.f32.partialorder %v3526_v15, 8388608.0  ;;  %v3528_v7 = vcvt.f32.s32 %v7012_v29  ;;  %v3531_v41 = vand.u32 2147483648, %v7012_v29  ;;  %v3534_v21 = vand.u32 2147483647, %v7017_v12 }
 0x284   :  { %v7015_v63 = vsel %vm5641_vm13, 4294967295, %v7014_v63  ;;  %v5652_v56 = vor.u32 %v3515_v22, %v3514_v55  ;;  %v3522_v35 = vand.u32 2147483647, %v3521_v28  ;;  %v3536_v10 = vcvt.f32.s32 %v7017_v12  ;;  %v7042_v29 = vld [vmem:[#allocation60_spill] sm:$0xff] }
 0x285   :  { %7016 = vst [vmem:[#allocation125_spill] sm:$0xff] %v7015_v63  ;;  %v3529_v42 = vcvt.s32.f32 %v3528_v7  ;;  %vm5655_vm14 = vcmp.lt.f32.partialorder %v3534_v21, 8388608.0  ;;  %v7019_v48 = vmov 0  ;;  %v3539_v15 = vand.u32 2147483648, %v7017_v12  ;;  %v7047_v12 = vld [vmem:[#allocation61_spill] sm:$0xff] }
 0x286   :  { %7018 = vst [vmem:[#allocation126_spill] sm:$0xff] %v5652_v56  ;;  %v7020_v48 = vsel %vm5655_vm14, 4294967295, %v7019_v48  ;;  %v3542_v24 = vand.u32 2147483647, %v7022_v33  ;;  %v5665_v27 = vor.u32 %v3523_v59, %v3522_v35  ;;  %v3537_v22 = vcvt.s32.f32 %v3536_v10 }
 0x287   :  { %7021 = vst [vmem:[#allocation127_spill] sm:$0xff] %v7020_v48  ;;  %v3544_v55 = vcvt.f32.s32 %v7022_v33  ;;  %v3530_v28 = vand.u32 2147483647, %v3529_v42  ;;  %v7024_v21 = vmov 0  ;;  %v3547_v7 = vand.u32 2147483648, %v7022_v33  ;;  %v7052_v33 = vld [vmem:[#allocation62_spill] sm:$0xff] }
 0x288   :  { %7023 = vst [vmem:[#allocation128_spill] sm:$0xff] %v5665_v27  ;;  %vm5668_vm15 = vcmp.lt.f32.partialorder %v3542_v24, 8388608.0  ;;  %v3550_v6 = vand.u32 2147483647, %v7027_v34  ;;  %v3538_v53 = vand.u32 2147483647, %v3537_v22  ;;  %v3552_v35 = vcvt.f32.s32 %v7027_v34 }
 0x289   :  { %v7025_v21 = vsel %vm5668_vm15, 4294967295, %v7024_v21  ;;  %v3545_v59 = vcvt.s32.f32 %v3544_v55  ;;  %v5679_v10 = vor.u32 %v3531_v41, %v3530_v28  ;;  %v7029_v24 = vmov 0  ;;  %v7037_v55 = vld [vmem:[#allocation59_spill] sm:$0xff] }
 0x28a   :  { %7026 = vst [vmem:[#allocation129_spill] sm:$0xff] %v7025_v21  ;;  %vm5681_vm0 = vcmp.lt.f32.partialorder %v3550_v6, 8388608.0  ;;  %v3555_v42 = vand.u32 2147483648, %v7027_v34  ;;  %v3558_v56 = vand.u32 2147483647, %v7032_v37  ;;  %v5687_v8 = vor.u32 %v3539_v15, %v3538_v53  ;;  %v7057_v34 = vld [vmem:[#allocation63_spill] sm:$0xff] }
 0x28b   :  { %7028 = vst [vmem:[#allocation130_spill] sm:$0xff] %v5679_v10  ;;  %v7030_v24 = vsel %vm5681_vm0, 4294967295, %v7029_v24  ;;  %v3546_v4 = vand.u32 2147483647, %v3545_v59  ;;  %v3553_v62 = vcvt.s32.f32 %v3552_v35  ;;  %v3560_v51 = vcvt.f32.s32 %v7032_v37 }
 0x28c   :  { %7031 = vst [vmem:[#allocation131_spill] sm:$0xff] %v7030_v24  ;;  %7033 = vst [vmem:[#allocation132_spill] sm:$0xff] %v5687_v8  ;;  %vm5694_vm1 = vcmp.lt.f32.partialorder %v3558_v56, 8388608.0  ;;  %v7034_v6 = vmov 0  ;;  %v3563_v22 = vand.u32 2147483648, %v7032_v37  ;;  %v7039_v63 = vmov 0 }
 0x28d   :  { %v7035_v6 = vsel %vm5694_vm1, 4294967295, %v7034_v6  ;;  %v3566_v28 = vand.u32 2147483647, %v7037_v55  ;;  %v5704_v15 = vor.u32 %v3547_v7, %v3546_v4  ;;  %v3554_v59 = vand.u32 2147483647, %v3553_v62 }
 0x28e   :  { %7036 = vst [vmem:[#allocation133_spill] sm:$0xff] %v7035_v6  ;;  %v3561_v35 = vcvt.s32.f32 %v3560_v51  ;;  %v3568_v56 = vcvt.f32.s32 %v7037_v55  ;;  %v3571_v41 = vand.u32 2147483648, %v7037_v55  ;;  %v3574_v10 = vand.u32 2147483647, %v7042_v29  ;;  %v7067_v55 = vld [vmem:[#allocation65_spill] sm:$0xff] }
 0x28f   :  { %7038 = vst [vmem:[#allocation134_spill] sm:$0xff] %v5704_v15  ;;  %vm5706_vm12 = vcmp.lt.f32.partialorder %v3566_v28, 8388608.0  ;;  %v5717_v53 = vor.u32 %v3555_v42, %v3554_v59  ;;  %v3576_v62 = vcvt.f32.s32 %v7042_v29  ;;  %v7044_v7 = vmov 0 }
 0x290   :  { %v7040_v63 = vsel %vm5706_vm12, 4294967295, %v7039_v63  ;;  %v3562_v4 = vand.u32 2147483647, %v3561_v35  ;;  %v3569_v51 = vcvt.s32.f32 %v3568_v56  ;;  %vm5720_vm14 = vcmp.lt.f32.partialorder %v3574_v10, 8388608.0 }
 0x291   :  { %7041 = vst [vmem:[#allocation135_spill] sm:$0xff] %v7040_v63  ;;  %7043 = vst [vmem:[#allocation136_spill] sm:$0xff] %v5717_v53  ;;  %v7045_v7 = vsel %vm5720_vm14, 4294967295, %v7044_v7  ;;  %v3579_v28 = vand.u32 2147483648, %v7042_v29  ;;  %v3582_v8 = vand.u32 2147483647, %v7047_v12  ;;  %v3577_v42 = vcvt.s32.f32 %v3576_v62 }
 0x292   :  { %7046 = vst [vmem:[#allocation137_spill] sm:$0xff] %v7045_v7  ;;  %v5730_v48 = vor.u32 %v3563_v22, %v3562_v4  ;;  %v3584_v59 = vcvt.f32.s32 %v7047_v12  ;;  %v3570_v35 = vand.u32 2147483647, %v3569_v51  ;;  %v7049_v10 = vmov 0  ;;  %v7072_v29 = vld [vmem:[#allocation66_spill] sm:$0xff] }
 0x293   :  { %vm5733_vm15 = vcmp.lt.f32.partialorder %v3582_v8, 8388608.0  ;;  %v3587_v56 = vand.u32 2147483648, %v7047_v12  ;;  %v3590_v15 = vand.u32 2147483647, %v7052_v33  ;;  %v3578_v21 = vand.u32 2147483647, %v3577_v42 }
 0x294   :  { %7048 = vst [vmem:[#allocation138_spill] sm:$0xff] %v5730_v48  ;;  %v7050_v10 = vsel %vm5733_vm15, 4294967295, %v7049_v10  ;;  %v3585_v22 = vcvt.s32.f32 %v3584_v59  ;;  %v3592_v4 = vcvt.f32.s32 %v7052_v33  ;;  %v5744_v62 = vor.u32 %v3571_v41, %v3570_v35  ;;  %v7062_v59 = vld [vmem:[#allocation64_spill] sm:$0xff]  ;;  %v7077_v12 = vld [vmem:[#allocation67_spill] sm:$0xff] }
 0x295   :  { %7051 = vst [vmem:[#allocation139_spill] sm:$0xff] %v7050_v10  ;;  %vm5746_vm0 = vcmp.lt.f32.partialorder %v3590_v15, 8388608.0  ;;  %v7054_v8 = vmov 0  ;;  %v3595_v51 = vand.u32 2147483648, %v7052_v33  ;;  %v3598_v53 = vand.u32 2147483647, %v7057_v34 }
 0x296   :  { %7053 = vst [vmem:[#allocation140_spill] sm:$0xff] %v5744_v62  ;;  %v7055_v8 = vsel %vm5746_vm0, 4294967295, %v7054_v8  ;;  %v5752_v44 = vor.u32 %v3579_v28, %v3578_v21  ;;  %v3586_v27 = vand.u32 2147483647, %v3585_v22  ;;  %v3593_v60 = vcvt.s32.f32 %v3592_v4  ;;  %v7082_v33 = vld [vmem:[#allocation68_spill] sm:$0xff] }
 0x297   :  { %7056 = vst [vmem:[#allocation141_spill] sm:$0xff] %v7055_v8  ;;  %v3600_v24 = vcvt.f32.s32 %v7057_v34  ;;  %vm5759_vm1 = vcmp.lt.f32.partialorder %v3598_v53, 8388608.0  ;;  %v7059_v15 = vmov 0  ;;  %v3603_v42 = vand.u32 2147483648, %v7057_v34 }
 0x298   :  { %7058 = vst [vmem:[#allocation142_spill] sm:$0xff] %v5752_v44  ;;  %v7060_v15 = vsel %vm5759_vm1, 4294967295, %v7059_v15  ;;  %v3606_v35 = vand.u32 2147483647, %v7062_v59  ;;  %v5769_v28 = vor.u32 %v3587_v56, %v3586_v27  ;;  %v3594_v22 = vand.u32 2147483647, %v3593_v60 }
 0x299   :  { %7061 = vst [vmem:[#allocation143_spill] sm:$0xff] %v7060_v15  ;;  %v3601_v4 = vcvt.s32.f32 %v3600_v24  ;;  %v7064_v63 = vmov 0  ;;  %v3608_v53 = vcvt.f32.s32 %v7062_v59  ;;  %v3611_v41 = vand.u32 2147483648, %v7062_v59  ;;  %v7091_v59 = vld [vmem:[#allocation70_spill] sm:$0xff] }
 0x29a   :  { %7063 = vst [vmem:[#allocation144_spill] sm:$0xff] %v5769_v28  ;;  %vm5771_vm13 = vcmp.lt.f32.partialorder %v3606_v35, 8388608.0  ;;  %v3614_v62 = vand.u32 2147483647, %v7067_v55  ;;  %v5782_v21 = vor.u32 %v3595_v51, %v3594_v22  ;;  %v3616_v60 = vcvt.f32.s32 %v7067_v55 }
 0x29b   :  { %v7065_v63 = vsel %vm5771_vm13, 4294967295, %v7064_v63  ;;  %v3602_v27 = vand.u32 2147483647, %v3601_v4  ;;  %v3609_v24 = vcvt.s32.f32 %v3608_v53  ;;  %v7069_v56 = vmov 0 }
 0x29c   :  { %7066 = vst [vmem:[#allocation145_spill] sm:$0xff] %v7065_v63  ;;  %7068 = vst [vmem:[#allocation146_spill] sm:$0xff] %v5782_v21  ;;  %vm5785_vm14 = vcmp.lt.f32.partialorder %v3614_v62, 8388608.0  ;;  %v3619_v35 = vand.u32 2147483648, %v7067_v55  ;;  %v3622_v44 = vand.u32 2147483647, %v7072_v29  ;;  %v3617_v51 = vcvt.s32.f32 %v3616_v60 }
 0x29d   :  { %v7070_v56 = vsel %vm5785_vm14, 4294967295, %v7069_v56  ;;  %v5795_v7 = vor.u32 %v3603_v42, %v3602_v27  ;;  %v3624_v22 = vcvt.f32.s32 %v7072_v29  ;;  %v3610_v4 = vand.u32 2147483647, %v3609_v24  ;;  %v7096_v55 = vld [vmem:[#allocation71_spill] sm:$0xff] }
 0x29e   :  { %7071 = vst [vmem:[#allocation147_spill] sm:$0xff] %v7070_v56  ;;  %vm5798_vm15 = vcmp.lt.f32.partialorder %v3622_v44, 8388608.0  ;;  %v7074_v62 = vmov 0  ;;  %v3627_v53 = vand.u32 2147483648, %v7072_v29  ;;  %v3630_v28 = vand.u32 2147483647, %v7077_v12 }
 0x29f   :  { %7073 = vst [vmem:[#allocation148_spill] sm:$0xff] %v5795_v7  ;;  %v7075_v62 = vsel %vm5798_vm15, 4294967295, %v7074_v62  ;;  %v3618_v10 = vand.u32 2147483647, %v3617_v51  ;;  %v3625_v42 = vcvt.s32.f32 %v3624_v22  ;;  %v3632_v27 = vcvt.f32.s32 %v7077_v12  ;;  %v7086_v22 = vld [vmem:[#allocation69_spill] sm:$0xff]  ;;  %v7100_v29 = vld [vmem:[#allocation72_spill] sm:$0xff] }
 0x2a0   :  { %7076 = vst [vmem:[#allocation149_spill] sm:$0xff] %v7075_v62  ;;  %v5809_v60 = vor.u32 %v3611_v41, %v3610_v4  ;;  %vm5811_vm0 = vcmp.lt.f32.partialorder %v3630_v28, 8388608.0  ;;  %v7079_v44 = vmov 0  ;;  %v3635_v24 = vand.u32 2147483648, %v7077_v12  ;;  %v7104_v12 = vld [vmem:[#allocation73_spill] sm:$0xff] }
 0x2a1   :  { %v7080_v44 = vsel %vm5811_vm0, 4294967295, %v7079_v44  ;;  %v3638_v21 = vand.u32 2147483647, %v7082_v33  ;;  %v5817_v37 = vor.u32 %v3619_v35, %v3618_v10  ;;  %v3626_v48 = vand.u32 2147483647, %v3625_v42 }
 0x2a2   :  { %7078 = vst [vmem:[#allocation150_spill] sm:$0xff] %v5809_v60  ;;  %7081 = vst [vmem:[#allocation151_spill] sm:$0xff] %v7080_v44  ;;  %v3633_v6 = vcvt.s32.f32 %v3632_v27  ;;  %v3640_v8 = vcvt.f32.s32 %v7082_v33  ;;  %v7084_v28 = vmov 0  ;;  %v3643_v51 = vand.u32 2147483648, %v7082_v33 }
 0x2a3   :  { %7083 = vst [vmem:[#allocation68_spill] sm:$0xff] %v5817_v37  ;;  %vm5824_vm1 = vcmp.lt.f32.partialorder %v3638_v21, 8388608.0  ;;  %v3646_v4 = vand.u32 2147483647, %v7086_v22  ;;  %v5834_v35 = vor.u32 %v3627_v53, %v3626_v48  ;;  %v7088_v63 = vmov 0 }
 0x2a4   :  { %v7085_v28 = vsel %vm5824_vm1, 4294967295, %v7084_v28  ;;  %v3634_v42 = vand.u32 2147483647, %v3633_v6  ;;  %v3641_v27 = vcvt.s32.f32 %v3640_v8  ;;  %v3648_v21 = vcvt.f32.s32 %v7086_v22 }
 0x2a5   :  { %7087 = vst [vmem:[#allocation152_spill] sm:$0xff] %v5834_v35  ;;  %vm5836_vm12 = vcmp.lt.f32.partialorder %v3646_v4, 8388608.0  ;;  %v3651_v41 = vand.u32 2147483648, %v7086_v22  ;;  %v3654_v60 = vand.u32 2147483647, %v7091_v59  ;;  %v3656_v6 = vcvt.f32.s32 %v7091_v59  ;;  %v7110_v22 = vld [vmem:[#allocation42_spill] sm:$0xff] }
 0x2a6   :  { %v7089_v63 = vsel %vm5836_vm12, 4294967295, %v7088_v63  ;;  %v5847_v10 = vor.u32 %v3635_v24, %v3634_v42  ;;  %v3642_v48 = vand.u32 2147483647, %v3641_v27  ;;  %v3649_v8 = vcvt.s32.f32 %v3648_v21 }
 0x2a7   :  { %7090 = vst [vmem:[#allocation153_spill] sm:$0xff] %v7089_v63  ;;  %vm5850_vm14 = vcmp.lt.f32.partialorder %v3654_v60, 8388608.0  ;;  %v7093_v53 = vmov 0  ;;  %v3659_v4 = vand.u32 2147483648, %v7091_v59  ;;  %v3662_v37 = vand.u32 2147483647, %v7096_v55 }
 0x2a8   :  { %7092 = vst [vmem:[#allocation70_spill] sm:$0xff] %v5847_v10  ;;  %v7094_v53 = vsel %vm5850_vm14, 4294967295, %v7093_v53  ;;  %v5860_v56 = vor.u32 %v3643_v51, %v3642_v48  ;;  %v3657_v24 = vcvt.s32.f32 %v3656_v6  ;;  %v3664_v42 = vcvt.f32.s32 %v7096_v55  ;;  %v7189_v63 = vld [vmem:[#allocation100_spill] sm:$0xff] }
 0x2a9   :  { %7095 = vst [vmem:[#allocation154_spill] sm:$0xff] %v7094_v53  ;;  %v3650_v27 = vand.u32 2147483647, %v3649_v8  ;;  %vm5863_vm15 = vcmp.lt.f32.partialorder %v3662_v37, 8388608.0  ;;  %v7097_v60 = vmov 0  ;;  %v3667_v21 = vand.u32 2147483648, %v7096_v55 }
 0x2aa   :  { %v7098_v60 = vsel %vm5863_vm15, 4294967295, %v7097_v60  ;;  %v3670_v35 = vand.u32 2147483647, %v7100_v29  ;;  %v3658_v62 = vand.u32 2147483647, %v3657_v24  ;;  %v3665_v51 = vcvt.s32.f32 %v3664_v42  ;;  %v7107_v42 = vld [vmem:[#allocation74_spill] sm:$0xff] }
 0x2ab   :  { %7099 = vst [vmem:[#allocation71_spill] sm:$0xff] %v7098_v60  ;;  %v3672_v48 = vcvt.f32.s32 %v7100_v29  ;;  %v5874_v6 = vor.u32 %v3651_v41, %v3650_v27  ;;  %v3675_v8 = vand.u32 2147483648, %v7100_v29  ;;  %v3694_v10 = vand.u32 2147483647, %v7104_v12  ;;  %v7131_v37 = vld [vmem:[#allocation82_spill] sm:$0xff] }
 0x2ac   :  { %vm5876_vm0 = vcmp.lt.f32.partialorder %v3670_v35, 8388608.0  ;;  %v5882_v34 = vor.u32 %v3659_v4, %v3658_v62  ;;  %v3666_v7 = vand.u32 2147483647, %v3665_v51  ;;  %v3696_v44 = vcvt.f32.s32 %v7104_v12  ;;  %v7150_v35 = vld [vmem:[#allocation28_spill] sm:$0xff] }
 0x2ad   :  { %7101 = vst [vmem:[#allocation72_spill] sm:$0xff] %v5874_v6  ;;  %v3673_v15 = vcvt.s32.f32 %v3672_v48  ;;  %vm5889_vm1 = vcmp.lt.f32.partialorder %v3694_v10, 8388608.0  ;;  %v3699_v24 = vand.u32 2147483648, %v7104_v12  ;;  %v3702_v27 = vand.u32 2147483647, %v7107_v42 }
 0x2ae   :  { %v5899_v4 = vor.u32 %v3667_v21, %v3666_v7  ;;  %v3697_v48 = vcvt.s32.f32 %v3696_v44  ;;  %v3704_v10 = vcvt.f32.s32 %v7107_v42  ;;  %v3707_v41 = vand.u32 2147483648, %v7107_v42  ;;  %v7113_v21 = vld [vmem:[#allocation18_spill] sm:$0xff] }
 0x2af   :  { %v3674_v51 = vand.u32 2147483647, %v3673_v15  ;;  %vm5901_vm13 = vcmp.lt.f32.partialorder %v3702_v27, 8388608.0  ;;  %v7111_v6 = vsel %vm5130_vm2, %v5153_v49, %v6873_v20  ;;  %v7114_v27 = vsel %vm5136_vm3, %v5156_v17, %v7113_v21  ;;  %v7116_v49 = vld [vmem:[#allocation22_spill] sm:$0xff]  ;;  %v7125_v21 = vld [vmem:[#allocation21_spill] sm:$0xff] }
 0x2b0   :  { %v5913_v53 = vmul.f32 %v7111_v6, %v7110_v22  ;;  %v3698_v44 = vand.u32 2147483647, %v3697_v48  ;;  %v5927_v14 = vmul.f32 %v7114_v27, %v7110_v22  ;;  %v3705_v62 = vcvt.s32.f32 %v3704_v10  ;;  %v7117_v6 = vld [vmem:[#allocation19_spill] sm:$0xff]  ;;  %v7121_v48 = vld [vmem:[#allocation20_spill] sm:$0xff]  ;;  %v7124_v10 = vld [vmem:[#allocation78_spill] sm:$0xff] }
 0x2b1   :  { %v5919_v15 = vor.u32 %v3675_v8, %v3674_v51  ;;  %v7120_v51 = vld [vmem:[#allocation77_spill] sm:$0xff]  ;;  %v7126_v27 = vsel %vm5158_vm6, %v7124_v10, %v7125_v21  ;;  %v7140_v21 = vld [vmem:[#allocation26_spill] sm:$0xff]  ;;  %vm7142_vm2 = vnez %v6911_v1  ;;  %vm7144_vm3 = vnez %v6914_v16 }
 0x2b2   :  { %7112 = vst [vmem:[#allocation73_spill] sm:$0xff] %v5913_v53  ;;  %v7118_v53 = vsel %vm5140_vm4, %v7116_v49, %v7117_v6  ;;  %v7122_v26 = vsel %vm5147_vm5, %v7120_v51, %v7121_v48  ;;  %v5951_v20 = vmul.f32 %v7126_v27, %v7110_v22  ;;  %v3700_v49 = vor.u32 %v3699_v24, %v3698_v44  ;;  %v7128_v51 = vld [vmem:[#allocation23_spill] sm:$0xff]  ;;  %v7132_v24 = vld [vmem:[#allocation24_spill] sm:$0xff]  ;;  %v7136_v44 = vld [vmem:[#allocation25_spill] sm:$0xff] }
 0x2b3   :  { %v5935_v60 = vmul.f32 %v7118_v53, %v7110_v22  ;;  %v5943_v7 = vmul.f32 %v7122_v26, %v7110_v22  ;;  %v3677_v53 = vsel %vm5876_vm0, %v5919_v15, %v7100_v29  ;;  %v7127_v6 = vsel %vm5174_vm7, %v5209_v11, %v6891_v19  ;;  %v7135_v19 = vld [vmem:[#allocation83_spill] sm:$0xff]  ;;  %v7147_v11 = vld [vmem:[#allocation85_spill] sm:$0xff] }
 0x2b4   :  { %v5963_v8 = vmul.f32 %v7127_v6, %v7110_v22  ;;  %v7129_v48 = vsel %vm5195_vm8, %v5224_v18, %v7128_v51  ;;  %v3706_v17 = vand.u32 2147483647, %v3705_v62  ;;  %v7133_v0 = vsel %vm5204_vm9, %v7131_v37, %v7132_v24  ;;  %v7139_v62 = vld [vmem:[#allocation84_spill] sm:$0xff]  ;;  %v7145_v37 = vld [vmem:[#allocation27_spill] sm:$0xff]  ;;  %v7159_v18 = vld [vmem:[#allocation90_spill] sm:$0xff] }
 0x2b5   :  { %v5971_v26 = vmul.f32 %v7129_v48, %v7110_v22  ;;  %v5979_v15 = vmul.f32 %v7133_v0, %v7110_v22  ;;  %v7137_v43 = vsel %vm5220_vm10, %v7135_v19, %v7136_v44  ;;  %v7141_v27 = vsel %vm5226_vm11, %v7139_v62, %v7140_v21  ;;  %v7155_v44 = vld [vmem:[#allocation29_spill] sm:$0xff]  ;;  %v7160_v62 = vld [vmem:[#allocation30_spill] sm:$0xff] }
 0x2b6   :  { %v5987_v10 = vmul.f32 %v7137_v43, %v7110_v22  ;;  %v5995_v6 = vmul.f32 %v7141_v27, %v7110_v22  ;;  %v3701_v51 = vsel %vm5889_vm1, %v3700_v49, %v7104_v12  ;;  %v7143_v48 = vsel %vm7142_vm2, %v5271_v36, %v4968_v46  ;;  %v7149_v12 = vld [vmem:[#allocation88_spill] sm:$0xff]  ;;  %v7152_v46 = vld [vmem:[#allocation86_spill] sm:$0xff]  ;;  %v7154_v36 = vld [vmem:[#allocation89_spill] sm:$0xff] }
 0x2b7   :  { %v6006_v29 = vmul.f32 %v7143_v48, %v7110_v22  ;;  %v7146_v24 = vsel %vm7144_vm3, %v5289_v32, %v7145_v37  ;;  %vm7148_vm4 = vnez %v7147_v11  ;;  %v3708_v19 = vor.u32 %v3707_v41, %v3706_v17  ;;  %v7157_v32 = vld [vmem:[#allocation87_spill] sm:$0xff] }
 0x2b8   :  { %v6014_v0 = vmul.f32 %v7146_v24, %v7110_v22  ;;  %v7151_v49 = vsel %vm7148_vm4, %v7149_v12, %v7150_v35  ;;  %vm7153_vm5 = vnez %v7152_v46  ;;  %vm7158_vm6 = vnez %v7157_v32  ;;  %v7165_v48 = vld [vmem:[#allocation31_spill] sm:$0xff]  ;;  %v7169_v12 = vld [vmem:[#allocation94_spill] sm:$0xff]  ;;  %v7170_v35 = vld [vmem:[#allocation32_spill] sm:$0xff] }
 0x2b9   :  { %v6022_v1 = vmul.f32 %v7151_v49, %v7110_v22  ;;  %v7156_v16 = vsel %vm7153_vm5, %v7154_v36, %v7155_v44  ;;  %v7161_v21 = vsel %vm7158_vm6, %v7159_v18, %v7160_v62  ;;  %vm7162_vm7 = vnez %v6926_v39  ;;  %v7167_v11 = vld [vmem:[#allocation91_spill] sm:$0xff]  ;;  %v7175_v46 = vld [vmem:[#allocation33_spill] sm:$0xff]  ;;  %v7179_v44 = vld [vmem:[#allocation96_spill] sm:$0xff] }
 0x2ba   :  { %v6030_v43 = vmul.f32 %v7156_v16, %v7110_v22  ;;  %v6038_v27 = vmul.f32 %v7161_v21, %v7110_v22  ;;  %v7163_v41 = vsel %vm7162_vm7, %v5340_v58, %v4983_v50  ;;  %vm7164_vm8 = vnez %v6929_v23  ;;  %v7172_v50 = vld [vmem:[#allocation92_spill] sm:$0xff]  ;;  %v7174_v58 = vld [vmem:[#allocation95_spill] sm:$0xff]  ;;  %v7180_v16 = vld [vmem:[#allocation34_spill] sm:$0xff] }
 0x2bb   :  { %v6046_v17 = vmul.f32 %v7163_v41, %v7110_v22  ;;  %v7166_v37 = vsel %vm7164_vm8, %v5354_v40, %v7165_v48  ;;  %vm7168_vm9 = vnez %v7167_v11  ;;  %vm7173_vm10 = vnez %v7172_v50  ;;  %v7177_v40 = vld [vmem:[#allocation93_spill] sm:$0xff]  ;;  %v7185_v48 = vld [vmem:[#allocation35_spill] sm:$0xff]  ;;  %v7199_v50 = vld [vmem:[#allocation102_spill] sm:$0xff] }
 0x2bc   :  { %v6054_v24 = vmul.f32 %v7166_v37, %v7110_v22  ;;  %v7171_v49 = vsel %vm7168_vm9, %v7169_v12, %v7170_v35  ;;  %v7176_v36 = vsel %vm7173_vm10, %v7174_v58, %v7175_v46  ;;  %vm7178_vm11 = vnez %v7177_v40  ;;  %v7187_v12 = vld [vmem:[#allocation97_spill] sm:$0xff]  ;;  %v7200_v58 = vld [vmem:[#allocation38_spill] sm:$0xff] }
 0x2bd   :  { %v6062_v39 = vmul.f32 %v7171_v49, %v7110_v22  ;;  %v6070_v23 = vmul.f32 %v7176_v36, %v7110_v22  ;;  %v7181_v32 = vsel %vm7178_vm11, %v7179_v44, %v7180_v16  ;;  %v3709_v62 = vsel %vm5901_vm13, %v3708_v19, %v7107_v42  ;;  %v7190_v42 = vld [vmem:[#allocation36_spill] sm:$0xff]  ;;  %v7195_v35 = vld [vmem:[#allocation37_spill] sm:$0xff]  ;;  %v7205_v16 = vld [vmem:[#allocation39_spill] sm:$0xff] }
 0x2be   :  { %v6078_v18 = vmul.f32 %v7181_v32, %v7110_v22  ;;  %vm7182_vm0 = vnez %v6942_v45  ;;  %vm7184_vm1 = vnez %v6945_v54  ;;  %vm7188_vm2 = vnez %v7187_v12  ;;  %v7210_v12 = vld [vmem:[#allocation40_spill] sm:$0xff] }
 0x2bf   :  { %v7183_v21 = vsel %vm7182_vm0, %v5405_v2, %v4998_v38  ;;  %v7186_v37 = vsel %vm7184_vm1, %v5419_v9, %v7185_v48  ;;  %v7191_v19 = vsel %vm7188_vm2, %v7189_v63, %v7190_v42  ;;  %v7192_v38 = vld [vmem:[#allocation98_spill] sm:$0xff]  ;;  %v7194_v2 = vld [vmem:[#allocation101_spill] sm:$0xff]  ;;  %v7197_v9 = vld [vmem:[#allocation99_spill] sm:$0xff]  ;;  %vm7202_vm4 = vnez %v6958_v3 }
 0x2c0   :  { %v6089_v41 = vmul.f32 %v7183_v21, %v7110_v22  ;;  %v6097_v11 = vmul.f32 %v7186_v37, %v7110_v22  ;;  %v6105_v45 = vmul.f32 %v7191_v19, %v7110_v22  ;;  %vm7193_vm13 = vnez %v7192_v38  ;;  %v7207_v48 = vld [vmem:[#allocation103_spill] sm:$0xff]  ;;  %v7209_v37 = vld [vmem:[#allocation106_spill] sm:$0xff]  ;;  %v7215_v42 = vld [vmem:[#allocation41_spill] sm:$0xff] }
 0x2c1   :  { %v7196_v49 = vsel %vm7193_vm13, %v7194_v2, %v7195_v35  ;;  %vm7198_vm3 = vnez %v7197_v9  ;;  %v7203_v40 = vsel %vm7202_vm4, %v5470_v25, %v5013_v47  ;;  %vm7204_vm5 = vnez %v6961_v30  ;;  %v7212_v47 = vld [vmem:[#allocation104_spill] sm:$0xff]  ;;  %v7214_v25 = vld [vmem:[#allocation107_spill] sm:$0xff] }
 0x2c2   :  { %v6113_v54 = vmul.f32 %v7196_v49, %v7110_v22  ;;  %v7201_v46 = vsel %vm7198_vm3, %v7199_v50, %v7200_v58  ;;  %v6129_v44 = vmul.f32 %v7203_v40, %v7110_v22  ;;  %v7206_v32 = vsel %vm7204_vm5, %v5484_v61, %v7205_v16  ;;  %v7217_v61 = vld [vmem:[#allocation105_spill] sm:$0xff]  ;;  %v7219_v38 = vld [vmem:[#allocation108_spill] sm:$0xff]  ;;  %v7220_v2 = vld [vmem:[#allocation43_spill] sm:$0xff] }
 0x2c3   :  { %v6121_v36 = vmul.f32 %v7201_v46, %v7110_v22  ;;  %v6137_v21 = vmul.f32 %v7206_v32, %v7110_v22  ;;  %vm7208_vm6 = vnez %v7207_v48  ;;  %vm7213_vm7 = vnez %v7212_v47  ;;  %v7225_v58 = vld [vmem:[#allocation44_spill] sm:$0xff]  ;;  %v7227_v16 = vld [vmem:[#allocation109_spill] sm:$0xff] }
 0x2c4   :  { %v7211_v63 = vsel %vm7208_vm6, %v7209_v37, %v7210_v12  ;;  %v7216_v19 = vsel %vm7213_vm7, %v7214_v25, %v7215_v42  ;;  %vm7218_vm8 = vnez %v7217_v61  ;;  %vm7222_vm9 = vnez %v6974_v13  ;;  %v7229_v32 = vld [vmem:[#allocation112_spill] sm:$0xff]  ;;  %v7230_v48 = vld [vmem:[#allocation45_spill] sm:$0xff]  ;;  %v7235_v12 = vld [vmem:[#allocation46_spill] sm:$0xff] }
 0x2c5   :  { %v6145_v3 = vmul.f32 %v7211_v63, %v7110_v22  ;;  %v6153_v30 = vmul.f32 %v7216_v19, %v7110_v22  ;;  %v7221_v35 = vsel %vm7218_vm8, %v7219_v38, %v7220_v2  ;;  %v7223_v9 = vsel %vm7222_vm9, %v5535_v57, %v5028_v52  ;;  %v7232_v52 = vld [vmem:[#allocation110_spill] sm:$0xff]  ;;  %v7239_v47 = vld [vmem:[#allocation116_spill] sm:$0xff]  ;;  %v7240_v25 = vld [vmem:[#allocation47_spill] sm:$0xff] }
 0x2c6   :  { %v6161_v49 = vmul.f32 %v7221_v35, %v7110_v22  ;;  %v6169_v50 = vmul.f32 %v7223_v9, %v7110_v22  ;;  %vm7224_vm10 = vnez %v6977_v31  ;;  %vm7228_vm11 = vnez %v7227_v16  ;;  %v7234_v57 = vld [vmem:[#allocation114_spill] sm:$0xff]  ;;  %v7242_v61 = vld [vmem:[#allocation113_spill] sm:$0xff]  ;;  %v7245_v2 = vld [vmem:[#allocation48_spill] sm:$0xff] }
 0x2c7   :  { %v7226_v46 = vsel %vm7224_vm10, %v5549_v5, %v7225_v58  ;;  %v7231_v37 = vsel %vm7228_vm11, %v7229_v32, %v7230_v48  ;;  %vm7233_vm0 = vnez %v7232_v52  ;;  %v7237_v5 = vld [vmem:[#allocation111_spill] sm:$0xff]  ;;  %vm7243_vm2 = vnez %v7242_v61  ;;  %v7244_v38 = vld [vmem:[#allocation118_spill] sm:$0xff]  ;;  %v7250_v16 = vld [vmem:[#allocation49_spill] sm:$0xff] }
 0x2c8   :  { %v6177_v40 = vmul.f32 %v7226_v46, %v7110_v22  ;;  %v6185_v13 = vmul.f32 %v7231_v37, %v7110_v22  ;;  %v7236_v63 = vsel %vm7233_vm0, %v7234_v57, %v7235_v12  ;;  %vm7238_vm1 = vnez %v7237_v5  ;;  %v7247_v58 = vld [vmem:[#allocation115_spill] sm:$0xff]  ;;  %v7249_v46 = vld [vmem:[#allocation120_spill] sm:$0xff]  ;;  %v7252_v37 = vld [vmem:[#allocation117_spill] sm:$0xff] }
 0x2c9   :  { %v6193_v31 = vmul.f32 %v7236_v63, %v7110_v22  ;;  %v7241_v42 = vsel %vm7238_vm1, %v7239_v47, %v7240_v25  ;;  %v7246_v35 = vsel %vm7243_vm2, %v7244_v38, %v7245_v2  ;;  %vm7248_vm13 = vnez %v7247_v58  ;;  %v7254_v52 = vld [vmem:[#allocation122_spill] sm:$0xff]  ;;  %v7257_v5 = vld [vmem:[#allocation119_spill] sm:$0xff]  ;;  %v7259_v47 = vld [vmem:[#allocation124_spill] sm:$0xff] }
 0x2ca   :  { %v6201_v19 = vmul.f32 %v7241_v42, %v7110_v22  ;;  %v6209_v9 = vmul.f32 %v7246_v35, %v7110_v22  ;;  %v7251_v32 = vsel %vm7248_vm13, %v7249_v46, %v7250_v16  ;;  %vm7253_vm3 = vnez %v7252_v37  ;;  %v7255_v57 = vld [vmem:[#allocation50_spill] sm:$0xff]  ;;  %v7260_v25 = vld [vmem:[#allocation51_spill] sm:$0xff]  ;;  %v7262_v38 = vld [vmem:[#allocation121_spill] sm:$0xff] }
 0x2cb   :  { %v6217_v48 = vmul.f32 %v7251_v32, %v7110_v22  ;;  %v7256_v12 = vsel %vm7253_vm3, %v7254_v52, %v7255_v57  ;;  %vm7258_vm4 = vnez %v7257_v5  ;;  %vm7263_vm5 = vnez %v7262_v38  ;;  %v7264_v2 = vld [vmem:[#allocation126_spill] sm:$0xff]  ;;  %v7265_v35 = vld [vmem:[#allocation52_spill] sm:$0xff]  ;;  %v7267_v16 = vld [vmem:[#allocation123_spill] sm:$0xff] }
 0x2cc   :  { %v6225_v63 = vmul.f32 %v7256_v12, %v7110_v22  ;;  %v7261_v42 = vsel %vm7258_vm4, %v7259_v47, %v7260_v25  ;;  %v7266_v58 = vsel %vm7263_vm5, %v7264_v2, %v7265_v35  ;;  %vm7268_vm6 = vnez %v7267_v16  ;;  %v7269_v32 = vld [vmem:[#allocation128_spill] sm:$0xff]  ;;  %v7270_v37 = vld [vmem:[#allocation53_spill] sm:$0xff]  ;;  %v7275_v5 = vld [vmem:[#allocation130_spill] sm:$0xff] }
 0x2cd   :  { %v6233_v61 = vmul.f32 %v7261_v42, %v7110_v22  ;;  %v6241_v46 = vmul.f32 %v7266_v58, %v7110_v22  ;;  %v7271_v52 = vsel %vm7268_vm6, %v7269_v32, %v7270_v37  ;;  %v7273_v12 = vld [vmem:[#allocation125_spill] sm:$0xff]  ;;  %v7276_v47 = vld [vmem:[#allocation54_spill] sm:$0xff]  ;;  %v7279_v38 = vld [vmem:[#allocation127_spill] sm:$0xff] }
 0x2ce   :  { %v6249_v57 = vmul.f32 %v7271_v52, %v7110_v22  ;;  %vm7274_vm7 = vnez %v7273_v12  ;;  %vm7280_vm8 = vnez %v7279_v38  ;;  %v7281_v2 = vld [vmem:[#allocation132_spill] sm:$0xff]  ;;  %v7282_v35 = vld [vmem:[#allocation55_spill] sm:$0xff]  ;;  %v7285_v32 = vld [vmem:[#allocation129_spill] sm:$0xff] }
 0x2cf   :  { %v7277_v25 = vsel %vm7274_vm7, %v7275_v5, %v7276_v47  ;;  %v7283_v58 = vsel %vm7280_vm8, %v7281_v2, %v7282_v35  ;;  %vm7286_vm9 = vnez %v7285_v32  ;;  %v7287_v37 = vld [vmem:[#allocation134_spill] sm:$0xff]  ;;  %v7288_v52 = vld [vmem:[#allocation56_spill] sm:$0xff]  ;;  %v7291_v5 = vld [vmem:[#allocation131_spill] sm:$0xff]  ;;  %vm7354_vm8 = vnez %v7085_v28 }
 0x2d0   :  { %7272 = vst [vmem:[#allocation74_spill] sm:$0xff] %v6249_v57  ;;  %v6257_v42 = vmul.f32 %v7277_v25, %v7110_v22  ;;  %v6265_v16 = vmul.f32 %v7283_v58, %v7110_v22  ;;  %v7289_v57 = vsel %vm7286_vm9, %v7287_v37, %v7288_v52  ;;  %vm7292_vm10 = vnez %v7291_v5  ;;  %v7293_v47 = vld [vmem:[#allocation136_spill] sm:$0xff]  ;;  %v7294_v25 = vld [vmem:[#allocation57_spill] sm:$0xff]  ;;  %v7299_v35 = vld [vmem:[#allocation138_spill] sm:$0xff] }
 0x2d1   :  { %v6273_v12 = vmul.f32 %v7289_v57, %v7110_v22  ;;  %v7297_v2 = vld [vmem:[#allocation133_spill] sm:$0xff]  ;;  %v7300_v58 = vld [vmem:[#allocation58_spill] sm:$0xff]  ;;  %v7303_v37 = vld [vmem:[#allocation135_spill] sm:$0xff] }
 0x2d2   :  { %7278 = vst [vmem:[#allocation42_spill] sm:$0xff] %v6257_v42  ;;  %7284 = vst [vmem:[#allocation18_spill] sm:$0xff] %v6265_v16  ;;  %v7295_v42 = vsel %vm7292_vm10, %v7293_v47, %v7294_v25  ;;  %vm7298_vm11 = vnez %v7297_v2  ;;  %vm7304_vm0 = vnez %v7303_v37  ;;  %v7305_v57 = vld [vmem:[#allocation140_spill] sm:$0xff]  ;;  %v7306_v52 = vld [vmem:[#allocation59_spill] sm:$0xff] }
 0x2d3   :  { %7290 = vst [vmem:[#allocation17_spill] sm:$0xff] %v6273_v12  ;;  %v6281_v38 = vmul.f32 %v7295_v42, %v7110_v22  ;;  %v7301_v16 = vsel %vm7298_vm11, %v7299_v35, %v7300_v58  ;;  %v7307_v12 = vsel %vm7304_vm0, %v7305_v57, %v7306_v52  ;;  %v7309_v47 = vld [vmem:[#allocation137_spill] sm:$0xff]  ;;  %v7311_v42 = vld [vmem:[#allocation142_spill] sm:$0xff]  ;;  %v7312_v25 = vld [vmem:[#allocation60_spill] sm:$0xff] }
 0x2d4   :  { %v6289_v32 = vmul.f32 %v7301_v16, %v7110_v22  ;;  %v6297_v5 = vmul.f32 %v7307_v12, %v7110_v22  ;;  %vm7310_vm1 = vnez %v7309_v47  ;;  %v7315_v35 = vld [vmem:[#allocation139_spill] sm:$0xff]  ;;  %v7317_v16 = vld [vmem:[#allocation144_spill] sm:$0xff]  ;;  %v7318_v58 = vld [vmem:[#allocation61_spill] sm:$0xff] }
 0x2d5   :  { %7296 = vst [vmem:[#allocation22_spill] sm:$0xff] %v6281_v38  ;;  %v7313_v38 = vsel %vm7310_vm1, %v7311_v42, %v7312_v25  ;;  %vm7316_vm2 = vnez %v7315_v35  ;;  %v7321_v57 = vld [vmem:[#allocation141_spill] sm:$0xff]  ;;  %v7323_v12 = vld [vmem:[#allocation146_spill] sm:$0xff]  ;;  %v7327_v42 = vld [vmem:[#allocation143_spill] sm:$0xff] }
 0x2d6   :  { %7302 = vst [vmem:[#allocation19_spill] sm:$0xff] %v6289_v32  ;;  %7308 = vst [vmem:[#allocation75_spill] sm:$0xff] %v6297_v5  ;;  %v6305_v2 = vmul.f32 %v7313_v38, %v7110_v22  ;;  %v7319_v32 = vsel %vm7316_vm2, %v7317_v16, %v7318_v58  ;;  %vm7322_vm13 = vnez %v7321_v57  ;;  %v7324_v52 = vld [vmem:[#allocation62_spill] sm:$0xff]  ;;  %vm7328_vm3 = vnez %v7327_v42  ;;  %v7329_v38 = vld [vmem:[#allocation148_spill] sm:$0xff] }
 0x2d7   :  { %v6313_v37 = vmul.f32 %v7319_v32, %v7110_v22  ;;  %v7325_v5 = vsel %vm7322_vm13, %v7323_v12, %v7324_v52  ;;  %v7330_v25 = vld [vmem:[#allocation63_spill] sm:$0xff]  ;;  %v7333_v16 = vld [vmem:[#allocation145_spill] sm:$0xff]  ;;  %v7335_v32 = vld [vmem:[#allocation150_spill] sm:$0xff] }
 0x2d8   :  { %7314 = vst [vmem:[#allocation77_spill] sm:$0xff] %v6305_v2  ;;  %v6321_v47 = vmul.f32 %v7325_v5, %v7110_v22  ;;  %v7331_v2 = vsel %vm7328_vm3, %v7329_v38, %v7330_v25  ;;  %vm7334_vm4 = vnez %v7333_v16  ;;  %v7336_v58 = vld [vmem:[#allocation64_spill] sm:$0xff]  ;;  %v7339_v12 = vld [vmem:[#allocation147_spill] sm:$0xff]  ;;  %v7342_v52 = vld [vmem:[#allocation65_spill] sm:$0xff] }
 0x2d9   :  { %7320 = vst [vmem:[#allocation20_spill] sm:$0xff] %v6313_v37  ;;  %v6329_v35 = vmul.f32 %v7331_v2, %v7110_v22  ;;  %v7337_v37 = vsel %vm7334_vm4, %v7335_v32, %v7336_v58  ;;  %vm7340_vm5 = vnez %v7339_v12  ;;  %v7341_v5 = vld [vmem:[#allocation68_spill] sm:$0xff]  ;;  %v7344_v38 = vld [vmem:[#allocation149_spill] sm:$0xff]  ;;  %v7347_v25 = vld [vmem:[#allocation66_spill] sm:$0xff] }
 0x2da   :  { %7326 = vst [vmem:[#allocation76_spill] sm:$0xff] %v6321_v47  ;;  %v6337_v57 = vmul.f32 %v7337_v37, %v7110_v22  ;;  %v7343_v47 = vsel %vm7340_vm5, %v7341_v5, %v7342_v52  ;;  %vm7345_vm6 = vnez %v7344_v38  ;;  %v7346_v2 = vld [vmem:[#allocation152_spill] sm:$0xff]  ;;  %v7349_v32 = vld [vmem:[#allocation151_spill] sm:$0xff]  ;;  %v7351_v37 = vld [vmem:[#allocation70_spill] sm:$0xff]  ;;  %v6402_v52 = vmul.f32 %v3709_v62, %v7110_v22 }
 0x2db   :  { %7332 = vst [vmem:[#allocation78_spill] sm:$0xff] %v6329_v35  ;;  %v6345_v42 = vmul.f32 %v7343_v47, %v7110_v22  ;;  %v7348_v35 = vsel %vm7345_vm6, %v7346_v2, %v7347_v25  ;;  %vm7350_vm7 = vnez %v7349_v32  ;;  %v7352_v58 = vld [vmem:[#allocation67_spill] sm:$0xff]  ;;  %v7355_v47 = vsel %vm7354_vm8, %v5860_v56, %v7082_v33  ;;  %v7358_v38 = vld [vmem:[#allocation69_spill] sm:$0xff] }
 0x2dc   :  { %7338 = vst [vmem:[#allocation21_spill] sm:$0xff] %v6337_v57  ;;  %v6353_v16 = vmul.f32 %v7348_v35, %v7110_v22  ;;  %v7353_v57 = vsel %vm7350_vm7, %v7351_v37, %v7352_v58  ;;  %v6369_v5 = vmul.f32 %v7355_v47, %v7110_v22  ;;  %v7357_v35 = vld [vmem:[#allocation72_spill] sm:$0xff]  ;;  %v7363_v56 = vsel %vm5863_vm15, %v5899_v4, %v7096_v55  ;;  %v7369_v62 = vld [vmem:[#allocation22_spill] sm:$0xff] }
 0x2dd   :  { %v6361_v12 = vmul.f32 %v7353_v57, %v7110_v22  ;;  %v7359_v2 = vsel %vm5836_vm12, %v7357_v35, %v7358_v38  ;;  %v7361_v57 = vsel %vm5850_vm14, %v5882_v34, %v7091_v59  ;;  %v6393_v37 = vmul.f32 %v7363_v56, %v7110_v22  ;;  %v7364_v34 = vld [vmem:[#allocation73_spill] sm:$0xff] }
 0x2de   :  { %v6377_v25 = vmul.f32 %v7359_v2, %v7110_v22  ;;  %v6385_v28 = vmul.f32 %v7361_v57, %v7110_v22  ;;  %v6396_v58 = vmul.f32 %v3677_v53, %v7110_v22  ;;  %v6399_v47 = vmul.f32 %v3701_v51, %v7110_v22 }
 0x2df   :  { %v2812_v59 = vpack.c.bf16 %v5927_v14, %v7364_v34  ;;  %v2817_v35 = vpack.c.bf16 %v5943_v7, %v5935_v60  ;;  %v2822_v55 = vpack.c.bf16 %v5963_v8, %v5951_v20  ;;  %v2827_v4 = vpack.c.bf16 %v5979_v15, %v5971_v26 }
 0x2e0   :  { %v2832_v53 = vpack.c.bf16 %v5995_v6, %v5987_v10  ;;  %v2837_v22 = vpack.c.bf16 %v6014_v0, %v6006_v29  ;;  %v2842_v51 = vpack.c.bf16 %v6030_v43, %v6022_v1  ;;  %v2847_v14 = vpack.c.bf16 %v6046_v17, %v6038_v27  ;;  %v7365_v27 = vld [vmem:[#allocation74_spill] sm:$0xff] }
 0x2e1   :  { %2813 = vst [vmem:[#allocation12] sm:$0xff] %v2812_v59   ;;  %v2852_v60 = vpack.c.bf16 %v6062_v39, %v6054_v24  ;;  %3031 = vst [vmem:[#allocation12 + $0x8] sm:$0xff] %v2817_v35   ;;  %v2857_v7 = vpack.c.bf16 %v6078_v18, %v6070_v23  ;;  %v2862_v20 = vpack.c.bf16 %v6097_v11, %v6089_v41  ;;  %v7366_v17 = vld [vmem:[#allocation42_spill] sm:$0xff]  ;;  %v7368_v23 = vld [vmem:[#allocation17_spill] sm:$0xff] }
 0x2e2   :  { %3032 = vst [vmem:[#allocation12 + $0x10] sm:$0xff] %v2822_v55   ;;  %3033 = vst [vmem:[#allocation12 + $0x18] sm:$0xff] %v2827_v4   ;;  %v2867_v8 = vpack.c.bf16 %v6113_v54, %v6105_v45  ;;  %v2872_v26 = vpack.c.bf16 %v6129_v44, %v6121_v36  ;;  %v2877_v15 = vpack.c.bf16 %v6145_v3, %v6137_v21  ;;  %v7367_v39 = vld [vmem:[#allocation18_spill] sm:$0xff]  ;;  %v7370_v41 = vld [vmem:[#allocation19_spill] sm:$0xff] }
 0x2e3   :  { %3034 = vst [vmem:[#allocation12 + $0x20] sm:$0xff] %v2832_v53   ;;  %3035 = vst [vmem:[#allocation12 + $0x28] sm:$0xff] %v2837_v22   ;;  %v2882_v10 = vpack.c.bf16 %v6161_v49, %v6153_v30  ;;  %v2887_v6 = vpack.c.bf16 %v6177_v40, %v6169_v50  ;;  %v2892_v29 = vpack.c.bf16 %v6193_v31, %v6185_v13  ;;  %v7371_v45 = vld [vmem:[#allocation75_spill] sm:$0xff]  ;;  %v7372_v54 = vld [vmem:[#allocation77_spill] sm:$0xff] }
 0x2e4   :  { %3036 = vst [vmem:[#allocation12 + $0x30] sm:$0xff] %v2842_v51   ;;  %3037 = vst [vmem:[#allocation12 + $0x38] sm:$0xff] %v2847_v14   ;;  %v2897_v0 = vpack.c.bf16 %v6209_v9, %v6201_v19  ;;  %v2902_v1 = vpack.c.bf16 %v6225_v63, %v6217_v48  ;;  %v2907_v43 = vpack.c.bf16 %v6241_v46, %v6233_v61  ;;  %v7373_v44 = vld [vmem:[#allocation20_spill] sm:$0xff]  ;;  %v7375_v30 = vld [vmem:[#allocation78_spill] sm:$0xff] }
 0x2e5   :  { %3038 = vst [vmem:[#allocation12 + $0x40] sm:$0xff] %v2852_v60   ;;  %3039 = vst [vmem:[#allocation12 + $0x48] sm:$0xff] %v2857_v7   ;;  %v2912_v24 = vpack.c.bf16 %v7366_v17, %v7365_v27  ;;  %v2917_v18 = vpack.c.bf16 %v7368_v23, %v7367_v39  ;;  %v2922_v11 = vpack.c.bf16 %v7370_v41, %v7369_v62  ;;  %v7374_v21 = vld [vmem:[#allocation76_spill] sm:$0xff]  ;;  %v7376_v49 = vld [vmem:[#allocation21_spill] sm:$0xff] }
 0x2e6   :  { %3040 = vst [vmem:[#allocation12 + $0x50] sm:$0xff] %v2862_v20   ;;  %3041 = vst [vmem:[#allocation12 + $0x58] sm:$0xff] %v2867_v8   ;;  %v2927_v36 = vpack.c.bf16 %v7372_v54, %v7371_v45  ;;  %v2932_v3 = vpack.c.bf16 %v7374_v21, %v7373_v44  ;;  %v2937_v50 = vpack.c.bf16 %v7376_v49, %v7375_v30 }
 0x2e7   :  { %3042 = vst [vmem:[#allocation12 + $0x60] sm:$0xff] %v2872_v26   ;;  %3043 = vst [vmem:[#allocation12 + $0x68] sm:$0xff] %v2877_v15   ;;  %v2942_v40 = vpack.c.bf16 %v6353_v16, %v6345_v42  ;;  %v2947_v13 = vpack.c.bf16 %v6369_v5, %v6361_v12  ;;  %v2952_v31 = vpack.c.bf16 %v6385_v28, %v6377_v25 }
 0x2e8   :  { %3044 = vst [vmem:[#allocation12 + $0x70] sm:$0xff] %v2882_v10   ;;  %3045 = vst [vmem:[#allocation12 + $0x78] sm:$0xff] %v2887_v6   ;;  %v2957_v19 = vpack.c.bf16 %v6396_v58, %v6393_v37  ;;  %v2967_v9 = vpack.c.bf16 %v6402_v52, %v6399_v47 }
 0x2e9   :  { %3046 = vst [vmem:[#allocation12 + $0x80] sm:$0xff] %v2892_v29   ;;  %3047 = vst [vmem:[#allocation12 + $0x88] sm:$0xff] %v2897_v0  }
 0x2ea   :  { %3048 = vst [vmem:[#allocation12 + $0x90] sm:$0xff] %v2902_v1   ;;  %3049 = vst [vmem:[#allocation12 + $0x98] sm:$0xff] %v2907_v43  }
 0x2eb   :  { %3050 = vst [vmem:[#allocation12 + $0xa0] sm:$0xff] %v2912_v24   ;;  %3051 = vst [vmem:[#allocation12 + $0xa8] sm:$0xff] %v2917_v18  }
 0x2ec   :  { %3052 = vst [vmem:[#allocation12 + $0xb0] sm:$0xff] %v2922_v11   ;;  %3053 = vst [vmem:[#allocation12 + $0xb8] sm:$0xff] %v2927_v36  }
 0x2ed   :  { %3054 = vst [vmem:[#allocation12 + $0xc0] sm:$0xff] %v2932_v3   ;;  %3055 = vst [vmem:[#allocation12 + $0xc8] sm:$0xff] %v2937_v50  }
 0x2ee   :  { %3056 = vst [vmem:[#allocation12 + $0xd0] sm:$0xff] %v2942_v40   ;;  %3057 = vst [vmem:[#allocation12 + $0xd8] sm:$0xff] %v2947_v13  }
 0x2ef   :  { %3058 = vst [vmem:[#allocation12 + $0xe0] sm:$0xff] %v2952_v31   ;;  %3059 = vst [vmem:[#allocation12 + $0xe8] sm:$0xff] %v2957_v19  }
 0x2f0   :  { %3061 = vst [vmem:[#allocation12 + $0xf8] sm:$0xff] %v2967_v9  }
 0x2f1   :  { %3822 = shalt.err (!%p3819_p5)
}
 0x2f2   :  { %2215 = dma.vmem_to_hbm [thread:$0]  %s2210_s3, 4096, %s6477_s5, [#allocation7], %s3840_s21, %s3840_s21, %s3841_s22  }
 0x2f3   :  { %3837 = dma.done.wait [#allocation7], 4096  }
 0x2f4   :  { %3838 = vsyncadd [#allocation7], 4294963200 }
 0x2f5   :  { %2219 = vsyncpa [#allocation6], 1 }
 0x2f6   :  { %2220 = vsyncpa [#allocation10], 1 }
 0x2f7   :  { %2221 = vsyncpa [#allocation7], 1 }
 0x2f8   :  { %2222 = vsyncpa [#allocation8], 1 }

</bundles_post_ra>
